<compile_context>
chip_gen: v5e
topology: v5e:2x2
jax: 0.10.0
libtpu: 0.0.40
codegen_flags: <defaults>
</compile_context>

<pallas_src>
import functools

import jax
import jax.numpy as jnp
from jax import lax
from jax.experimental import pallas as pl
from jax.experimental.pallas import tpu as pltpu

BN_EPS = 1e-5


def _round_up(v, m):
    return (v + m - 1) // m * m


def _tap_masks(Hin, Win, K, pad):
    """Host-side 0/1 boundary masks, one (1, Hin*Win) row per (kh, kw) tap."""
    hh, ww = jnp.meshgrid(jnp.arange(Hin), jnp.arange(Win), indexing="ij")
    rows = []
    for kh in range(K):
        for kw in range(K):
            dh, dw = kh - pad, kw - pad
            valid = ((hh + dh >= 0) & (hh + dh < Hin) &
                     (ww + dw >= 0) & (ww + dw < Win))
            rows.append(valid.reshape(1, Hin * Win))
    return jnp.stack(rows, axis=0).astype(jnp.float32)      # (K*K, 1, Hin*Win)


def _depthwise_taps(xext_ref, dw_ref, mask_ref, *, L, K, pad, Win, lpa):
    """Stride-1 'same' depthwise conv on the lane-flattened activation.

    xext_ref : VMEM scratch (R, EXT); the activation lives in lanes
               [lpa, lpa+L) of every row (row-major (h, w)); margins are zero.
    dw_ref   : VMEM (K*K, R, 1) per-row tap weights.
    mask_ref : VMEM (K*K, 1, L) 0/1 boundary masks.
    Returns an (R, L) float32 value.
    """
    acc = None
    for kh in range(K):
        for kw in range(K):
            t = kh * K + kw
            delta = (kh - pad) * Win + (kw - pad)
            shifted = xext_ref[:, lpa + delta: lpa + delta + L]    # lane shift
            term = (dw_ref[t] * shifted) * mask_ref[t]
            acc = term if acc is None else acc + term
    return acc


def _pointwise_rows(z2, pw_ref, *, N, Cin, Cout):
    """1x1 conv as VPU scalar MACs (channel counts too small for the MXU).

    z2 : (N*Cin, L) value.  Returns N*Cout rows of shape (1, L), ordered
    n*Cout + co (i.e. already in (N*Cout, L) row layout).
    """
    rows_in = [z2[r:r + 1, :] for r in range(N * Cin)]
    rows_out = []
    for n in range(N):
        for co in range(Cout):
            acc = None
            for ci in range(Cin):
                term = pw_ref[ci * Cout + co] * rows_in[n * Cin + ci]
                acc = term if acc is None else acc + term
            rows_out.append(acc)
    return rows_out


def _bn_coeffs(rows, g_ref, b_ref, *, N, C, count):
    """Per-channel BatchNorm affine (a, b) such that y_bn = y * a + b.

    Batch statistics (mean / biased variance, centered form) are computed
    exactly once over the whole batch (N rows per channel x L lanes).
    """
    inv = 1.0 / count
    coeffs = []
    for c in range(C):
        s11 = None
        for n in range(N):
            t = jnp.sum(rows[n * C + c], axis=1, keepdims=True)       # (1, 1)
            s11 = t if s11 is None else s11 + t
        m11 = s11 * inv
        v11 = None
        for n in range(N):
            d = rows[n * C + c] - m11
            q = jnp.sum(d * d, axis=1, keepdims=True)
            v11 = q if v11 is None else v11 + q
        v11 = v11 * inv
        a11 = g_ref[c] * lax.rsqrt(v11 + BN_EPS)
        b11 = b_ref[c] - m11 * a11
        coeffs.append((a11, b11))
    return coeffs


def _sepconv_kernel(x_ref, dw1_ref, dw2_ref, m1_ref, m2_ref,
                    pw1_ref, g1_ref, b1_ref, pw2_ref, g2_ref, b2_ref,
                    out_ref, xext_s, *,
                    N, C_in, C_out, K, stride, pad, H, W, H1, W1, lpa):
    R = N * C_in
    L0, L1 = H * W, H1 * W1

    # ---- first half: ReLU -> depthwise(K, stride) -> 1x1 (BN1 applied lazily)
    # ReLU(x) into the zero-margined flat scratch; ReLU(0)=0 so padding after
    # the ReLU is equivalent to the module's conv zero-padding.
    xext_s[...] = jnp.zeros_like(xext_s)
    xext_s[:, lpa:lpa + L0] = jnp.maximum(x_ref[...], 0.0)

    d1 = _depthwise_taps(xext_s, dw1_ref, m1_ref, L=L0, K=K, pad=pad, Win=W,
                         lpa=lpa)
    if stride > 1:
        # TODO(synk): strided first conv goes through value subsampling; the
        # shipped test (stride=1) never traces this branch.
        d1 = d1.reshape(R, H, W)[:, ::stride, ::stride].reshape(R, L1)

    y1_rows = _pointwise_rows(d1, pw1_ref, N=N, Cin=C_in, Cout=C_in)
    bn1 = _bn_coeffs(y1_rows, g1_ref, b1_ref, N=N, C=C_in, count=float(N * L1))

    # ---- second half: BN1 + ReLU -> depthwise(K, 1) -> 1x1 -> BN2 ----------
    if L1 != L0:
        xext_s[...] = jnp.zeros_like(xext_s)   # stride>1: clear stale interior
    for n in range(N):
        for c in range(C_in):
            a11, b11 = bn1[c]
            r = n * C_in + c
            z = jnp.maximum(y1_rows[r] * a11 + b11, 0.0)    # BN1 affine + ReLU
            xext_s[r:r + 1, lpa:lpa + L1] = z

    d2 = _depthwise_taps(xext_s, dw2_ref, m2_ref, L=L1, K=K, pad=pad, Win=W1,
                         lpa=lpa)
    y2_rows = _pointwise_rows(d2, pw2_ref, N=N, Cin=C_in, Cout=C_out)
    bn2 = _bn_coeffs(y2_rows, g2_ref, b2_ref, N=N, C=C_out, count=float(N * L1))

    # BN2 applied on the way out; every store is a full 256-lane (1, L1) row.
    for n in range(N):
        for co in range(C_out):
            a11, b11 = bn2[co]
            r = n * C_out + co
            out_ref[r:r + 1, :] = y2_rows[r] * a11 + b11


def sep_conv_forward(x_nchw, params, *, kernel_size, stride, padding):
    """Full SepConv forward.  Input/output are NCHW (PyTorch convention)."""
    x = x_nchw.astype(jnp.float32)
    N, C_in, H, W = x.shape
    K, p, s = kernel_size, padding, stride
    C_out = params['pw2'].shape[1]
    if K - 1 != 2 * p:
        # TODO(synk): only the DARTS 'same' configuration (padding == kernel//2)
        # is implemented for the lane-flattened tap shifts.
        raise NotImplementedError("SepConv kernel assumes 2*padding == kernel_size - 1")

    H1 = (H + 2 * p - K) // s + 1
    W1 = (W + 2 * p - K) // s + 1
    H2, W2 = H1, W1                       # second conv is stride-1 'same'
    L0, L1 = H * W, H1 * W1
    R_in, R_out = N * C_in, N * C_out

    # Zero margin (>= one padded row each side), rounded to a 128-lane tile so
    # the interior writes stay lane-aligned.
    lpa = _round_up(max(p * W + p, p * W1 + p, 1), 128)
    ext = 2 * lpa + max(L0, L1)

    def dw_cols(dw):          # (K, K, C_in) -> (K*K, N*C_in, 1) per-row taps
        t = dw.reshape(K * K, C_in).astype(jnp.float32)
        return jnp.tile(t, (1, N))[..., None]

    kernel = functools.partial(
        _sepconv_kernel, N=N, C_in=C_in, C_out=C_out, K=K, stride=s, pad=p,
        H=H, W=W, H1=H1, W1=W1, lpa=lpa)

    smem = pl.BlockSpec(memory_space=pltpu.MemorySpace.SMEM)
    grid_spec = pltpu.PrefetchScalarGridSpec(
        num_scalar_prefetch=0,
        grid=(1,),                                  # whole problem fits VMEM
        in_specs=[
            pl.BlockSpec((R_in, L0), lambda i: (0, 0)),           # x, lane-dense
            pl.BlockSpec((K * K, R_in, 1), lambda i: (0, 0, 0)),  # dw1 columns
            pl.BlockSpec((K * K, R_in, 1), lambda i: (0, 0, 0)),  # dw2 columns
            pl.BlockSpec((K * K, 1, L0), lambda i: (0, 0, 0)),    # conv1 masks
            pl.BlockSpec((K * K, 1, L1), lambda i: (0, 0, 0)),    # conv2 masks
            smem, smem, smem, smem, smem, smem,     # pw1, g1, b1, pw2, g2, b2
        ],
        out_specs=pl.BlockSpec((R_out, L1), lambda i: (0, 0)),
        scratch_shapes=[pltpu.VMEM((R_in, ext), jnp.float32)],
    )

    out2 = pl.pallas_call(
        kernel,
        out_shape=jax.ShapeDtypeStruct((R_out, L1), jnp.float32),
        grid_spec=grid_spec,
        compiler_params=pltpu.CompilerParams(
            dimension_semantics=("arbitrary",),
            vmem_limit_bytes=32 * 1024 * 1024),
    )(x.reshape(R_in, L0),
      dw_cols(params['dw1']),
      dw_cols(params['dw2']),
      _tap_masks(H, W, K, p),
      _tap_masks(H1, W1, K, p),
      params['pw1'].reshape(-1).astype(jnp.float32),
      params['g1'].reshape(-1).astype(jnp.float32),
      params['b1'].reshape(-1).astype(jnp.float32),
      params['pw2'].reshape(-1).astype(jnp.float32),
      params['g2'].reshape(-1).astype(jnp.float32),
      params['b2'].reshape(-1).astype(jnp.float32))

    return out2.reshape(N, C_out, H2, W2)


# ---------------- pure-JAX reference (for correctness check only) -------------
def sep_conv_reference(x_nchw, params, *, kernel_size, stride, padding):
    x = jnp.transpose(x_nchw, (0, 2, 3, 1)).astype(jnp.float32)
    C_in = x.shape[-1]
    K = kernel_size

    def dwconv(z, w, s):
        w_hwio = w.reshape(K, K, 1, C_in)
        return lax.conv_general_dilated(
            z, w_hwio, (s, s), [(padding, padding), (padding, padding)],
            dimension_numbers=('NHWC', 'HWIO', 'NHWC'),
            feature_group_count=C_in)

    def pwconv(z, w):
        return jnp.einsum('nhwc,cd->nhwd', z, w)

    def bn(z, g, b):
        mean = jnp.mean(z, axis=(0, 1, 2), keepdims=True)
        var = jnp.mean((z - mean) ** 2, axis=(0, 1, 2), keepdims=True)
        return ((z - mean) * lax.rsqrt(var + BN_EPS)
                * g.reshape(1, 1, 1, -1) + b.reshape(1, 1, 1, -1))

    z = jax.nn.relu(x)
    z = dwconv(z, params['dw1'], stride)
    z = pwconv(z, params['pw1'])
    z = bn(z, params['g1'], params['b1'])
    z = jax.nn.relu(z)
    z = dwconv(z, params['dw2'], 1)
    z = pwconv(z, params['pw2'])
    z = bn(z, params['g2'], params['b2'])
    return jnp.transpose(z, (0, 3, 1, 2))


if __name__ == "__main__":
    key = jax.random.PRNGKey(0)
    N, C_in, H, W = 2, 4, 16, 16
    C_out, K, stride, padding = 8, 3, 1, 1

    ks = jax.random.split(key, 5)
    x = jax.random.normal(ks[0], (N, C_in, H, W), jnp.float32)
    params = {
        # deterministic synthetic weights (shapes consistent with the module)
        'dw1': 0.2 * jax.random.normal(ks[1], (K, K, C_in), jnp.float32),
        'pw1': 0.2 * jax.random.normal(ks[2], (C_in, C_in), jnp.float32),
        'dw2': 0.2 * jax.random.normal(ks[3], (K, K, C_in), jnp.float32),
        'pw2': 0.2 * jax.random.normal(ks[4], (C_in, C_out), jnp.float32),
        # BatchNorm affine params at PyTorch defaults (weight=1, bias=0)
        'g1': jnp.ones((C_in,), jnp.float32),
        'b1': jnp.zeros((C_in,), jnp.float32),
        'g2': jnp.ones((C_out,), jnp.float32),
        'b2': jnp.zeros((C_out,), jnp.float32),
    }

    out = sep_conv_forward(x, params, kernel_size=K, stride=stride, padding=padding)
    out = jax.block_until_ready(out)

    ref = sep_conv_reference(x, params, kernel_size=K, stride=stride, padding=padding)
    assert out.shape == (N, C_out, H, W), out.shape
    max_err = float(jnp.max(jnp.abs(out - ref)))
    assert jnp.allclose(out, ref, atol=2e-4, rtol=2e-4), max_err
    print("KERNEL_OK")
</pallas_src>

<mosaic_0001>
module attributes {stable_mosaic.version = 11 : i64} {
  func.func @_sepconv_kernel(%arg0: i32, %arg1: memref<8x256xf32, #tpu.memory_space<vmem>>, %arg2: memref<9x8x1xf32, #tpu.memory_space<vmem>>, %arg3: memref<9x8x1xf32, #tpu.memory_space<vmem>>, %arg4: memref<9x1x256xf32, #tpu.memory_space<vmem>>, %arg5: memref<9x1x256xf32, #tpu.memory_space<vmem>>, %arg6: memref<16xf32, #tpu.memory_space<smem>>, %arg7: memref<4xf32, #tpu.memory_space<smem>>, %arg8: memref<4xf32, #tpu.memory_space<smem>>, %arg9: memref<32xf32, #tpu.memory_space<smem>>, %arg10: memref<8xf32, #tpu.memory_space<smem>>, %arg11: memref<8xf32, #tpu.memory_space<smem>>, %arg12: memref<16x256xf32, #tpu.memory_space<vmem>>, %arg13: memref<8x512xf32, #tpu.memory_space<vmem>>) attributes {dimension_semantics = [#tpu.dimension_semantics<arbitrary>], iteration_bounds = array<i64: 1>, scalar_prefetch = 0 : i64, scratch_operands = 1 : i64, tpu.core_type = #tpu.core_type<tc>, window_params = [{pipeline_mode = #tpu.pipeline_mode<synchronous>, transform_indices = @transform_0, window_bounds = array<i64: 8, 256>}, {pipeline_mode = #tpu.pipeline_mode<synchronous>, transform_indices = @transform_1, window_bounds = array<i64: 9, 8, 1>}, {pipeline_mode = #tpu.pipeline_mode<synchronous>, transform_indices = @transform_2, window_bounds = array<i64: 9, 8, 1>}, {pipeline_mode = #tpu.pipeline_mode<synchronous>, transform_indices = @transform_3, window_bounds = array<i64: 9, 1, 256>}, {pipeline_mode = #tpu.pipeline_mode<synchronous>, transform_indices = @transform_4, window_bounds = array<i64: 9, 1, 256>}, {transform_indices = @transform_5, window_bounds = array<i64: 16>}, {transform_indices = @transform_6, window_bounds = array<i64: 4>}, {transform_indices = @transform_7, window_bounds = array<i64: 4>}, {transform_indices = @transform_8, window_bounds = array<i64: 32>}, {transform_indices = @transform_9, window_bounds = array<i64: 8>}, {transform_indices = @transform_10, window_bounds = array<i64: 8>}, {pipeline_mode = #tpu.pipeline_mode<synchronous>, transform_indices = @transform_11, window_bounds = array<i64: 16, 256>}]} {
    %cst = arith.constant 0.000000e+00 : f32
    %0 = vector.broadcast %cst : f32 to vector<8x512xf32>
    %c0 = arith.constant 0 : index
    %c0_0 = arith.constant 0 : index
    %1 = vector.load %arg13[%c0, %c0_0] : memref<8x512xf32, #tpu.memory_space<vmem>>, vector<8x512xf32>
    tpu.vector_store %arg13[%c0, %c0_0], %0 {strides = array<i32>} : memref<8x512xf32, #tpu.memory_space<vmem>>, vector<8x512xf32>,
    %c0_1 = arith.constant 0 : index
    %c0_2 = arith.constant 0 : index
    %2 = vector.load %arg1[%c0_1, %c0_2] : memref<8x256xf32, #tpu.memory_space<vmem>>, vector<8x256xf32>
    %cst_3 = arith.constant 0.000000e+00 : f32
    %3 = vector.broadcast %cst_3 : f32 to vector<8x256xf32>
    %4 = arith.maximumf %2, %3 : vector<8x256xf32>
    %c0_4 = arith.constant 0 : index
    %c128 = arith.constant 128 : index
    %5 = vector.load %arg13[%c0_4, %c128] : memref<8x512xf32, #tpu.memory_space<vmem>>, vector<8x256xf32>
    tpu.vector_store %arg13[%c0_4, %c128], %4 {strides = array<i32>} : memref<8x512xf32, #tpu.memory_space<vmem>>, vector<8x256xf32>,
    %c0_5 = arith.constant 0 : index
    %c111 = arith.constant 111 : index
    %6 = vector.load %arg13[%c0_5, %c111] : memref<8x512xf32, #tpu.memory_space<vmem>>, vector<8x256xf32>
    %c0_6 = arith.constant 0 : index
    %c0_7 = arith.constant 0 : index
    %c0_8 = arith.constant 0 : index
    %7 = vector.load %arg2[%c0_6, %c0_7, %c0_8] : memref<9x8x1xf32, #tpu.memory_space<vmem>>, vector<1x8x1xf32>
    %8 = vector.shape_cast %7 : vector<1x8x1xf32> to vector<8x1xf32>
    %9 = vector.broadcast %8 : vector<8x1xf32> to vector<8x256xf32>
    %10 = arith.mulf %9, %6 : vector<8x256xf32>
    %c0_9 = arith.constant 0 : index
    %c0_10 = arith.constant 0 : index
    %c0_11 = arith.constant 0 : index
    %11 = vector.load %arg4[%c0_9, %c0_10, %c0_11] : memref<9x1x256xf32, #tpu.memory_space<vmem>>, vector<1x1x256xf32>
    %12 = vector.shape_cast %11 : vector<1x1x256xf32> to vector<1x256xf32>
    %13 = vector.broadcast %12 : vector<1x256xf32> to vector<8x256xf32>
    %14 = arith.mulf %10, %13 : vector<8x256xf32>
    %c0_12 = arith.constant 0 : index
    %c112 = arith.constant 112 : index
    %15 = vector.load %arg13[%c0_12, %c112] : memref<8x512xf32, #tpu.memory_space<vmem>>, vector<8x256xf32>
    %c1 = arith.constant 1 : index
    %c0_13 = arith.constant 0 : index
    %c0_14 = arith.constant 0 : index
    %16 = vector.load %arg2[%c1, %c0_13, %c0_14] : memref<9x8x1xf32, #tpu.memory_space<vmem>>, vector<1x8x1xf32>
    %17 = vector.shape_cast %16 : vector<1x8x1xf32> to vector<8x1xf32>
    %18 = vector.broadcast %17 : vector<8x1xf32> to vector<8x256xf32>
    %19 = arith.mulf %18, %15 : vector<8x256xf32>
    %c1_15 = arith.constant 1 : index
    %c0_16 = arith.constant 0 : index
    %c0_17 = arith.constant 0 : index
    %20 = vector.load %arg4[%c1_15, %c0_16, %c0_17] : memref<9x1x256xf32, #tpu.memory_space<vmem>>, vector<1x1x256xf32>
    %21 = vector.shape_cast %20 : vector<1x1x256xf32> to vector<1x256xf32>
    %22 = vector.broadcast %21 : vector<1x256xf32> to vector<8x256xf32>
    %23 = arith.mulf %19, %22 : vector<8x256xf32>
    %24 = arith.addf %14, %23 : vector<8x256xf32>
    %c0_18 = arith.constant 0 : index
    %c113 = arith.constant 113 : index
    %25 = vector.load %arg13[%c0_18, %c113] : memref<8x512xf32, #tpu.memory_space<vmem>>, vector<8x256xf32>
    %c2 = arith.constant 2 : index
    %c0_19 = arith.constant 0 : index
    %c0_20 = arith.constant 0 : index
    %26 = vector.load %arg2[%c2, %c0_19, %c0_20] : memref<9x8x1xf32, #tpu.memory_space<vmem>>, vector<1x8x1xf32>
    %27 = vector.shape_cast %26 : vector<1x8x1xf32> to vector<8x1xf32>
    %28 = vector.broadcast %27 : vector<8x1xf32> to vector<8x256xf32>
    %29 = arith.mulf %28, %25 : vector<8x256xf32>
    %c2_21 = arith.constant 2 : index
    %c0_22 = arith.constant 0 : index
    %c0_23 = arith.constant 0 : index
    %30 = vector.load %arg4[%c2_21, %c0_22, %c0_23] : memref<9x1x256xf32, #tpu.memory_space<vmem>>, vector<1x1x256xf32>
    %31 = vector.shape_cast %30 : vector<1x1x256xf32> to vector<1x256xf32>
    %32 = vector.broadcast %31 : vector<1x256xf32> to vector<8x256xf32>
    %33 = arith.mulf %29, %32 : vector<8x256xf32>
    %34 = arith.addf %24, %33 : vector<8x256xf32>
    %c0_24 = arith.constant 0 : index
    %c127 = arith.constant 127 : index
    %35 = vector.load %arg13[%c0_24, %c127] : memref<8x512xf32, #tpu.memory_space<vmem>>, vector<8x256xf32>
    %c3 = arith.constant 3 : index
    %c0_25 = arith.constant 0 : index
    %c0_26 = arith.constant 0 : index
    %36 = vector.load %arg2[%c3, %c0_25, %c0_26] : memref<9x8x1xf32, #tpu.memory_space<vmem>>, vector<1x8x1xf32>
    %37 = vector.shape_cast %36 : vector<1x8x1xf32> to vector<8x1xf32>
    %38 = vector.broadcast %37 : vector<8x1xf32> to vector<8x256xf32>
    %39 = arith.mulf %38, %35 : vector<8x256xf32>
    %c3_27 = arith.constant 3 : index
    %c0_28 = arith.constant 0 : index
    %c0_29 = arith.constant 0 : index
    %40 = vector.load %arg4[%c3_27, %c0_28, %c0_29] : memref<9x1x256xf32, #tpu.memory_space<vmem>>, vector<1x1x256xf32>
    %41 = vector.shape_cast %40 : vector<1x1x256xf32> to vector<1x256xf32>
    %42 = vector.broadcast %41 : vector<1x256xf32> to vector<8x256xf32>
    %43 = arith.mulf %39, %42 : vector<8x256xf32>
    %44 = arith.addf %34, %43 : vector<8x256xf32>
    %c0_30 = arith.constant 0 : index
    %c128_31 = arith.constant 128 : index
    %45 = vector.load %arg13[%c0_30, %c128_31] : memref<8x512xf32, #tpu.memory_space<vmem>>, vector<8x256xf32>
    %c4 = arith.constant 4 : index
    %c0_32 = arith.constant 0 : index
    %c0_33 = arith.constant 0 : index
    %46 = vector.load %arg2[%c4, %c0_32, %c0_33] : memref<9x8x1xf32, #tpu.memory_space<vmem>>, vector<1x8x1xf32>
    %47 = vector.shape_cast %46 : vector<1x8x1xf32> to vector<8x1xf32>
    %48 = vector.broadcast %47 : vector<8x1xf32> to vector<8x256xf32>
    %49 = arith.mulf %48, %45 : vector<8x256xf32>
    %c4_34 = arith.constant 4 : index
    %c0_35 = arith.constant 0 : index
    %c0_36 = arith.constant 0 : index
    %50 = vector.load %arg4[%c4_34, %c0_35, %c0_36] : memref<9x1x256xf32, #tpu.memory_space<vmem>>, vector<1x1x256xf32>
    %51 = vector.shape_cast %50 : vector<1x1x256xf32> to vector<1x256xf32>
    %52 = vector.broadcast %51 : vector<1x256xf32> to vector<8x256xf32>
    %53 = arith.mulf %49, %52 : vector<8x256xf32>
    %54 = arith.addf %44, %53 : vector<8x256xf32>
    %c0_37 = arith.constant 0 : index
    %c129 = arith.constant 129 : index
    %55 = vector.load %arg13[%c0_37, %c129] : memref<8x512xf32, #tpu.memory_space<vmem>>, vector<8x256xf32>
    %c5 = arith.constant 5 : index
    %c0_38 = arith.constant 0 : index
    %c0_39 = arith.constant 0 : index
    %56 = vector.load %arg2[%c5, %c0_38, %c0_39] : memref<9x8x1xf32, #tpu.memory_space<vmem>>, vector<1x8x1xf32>
    %57 = vector.shape_cast %56 : vector<1x8x1xf32> to vector<8x1xf32>
    %58 = vector.broadcast %57 : vector<8x1xf32> to vector<8x256xf32>
    %59 = arith.mulf %58, %55 : vector<8x256xf32>
    %c5_40 = arith.constant 5 : index
    %c0_41 = arith.constant 0 : index
    %c0_42 = arith.constant 0 : index
    %60 = vector.load %arg4[%c5_40, %c0_41, %c0_42] : memref<9x1x256xf32, #tpu.memory_space<vmem>>, vector<1x1x256xf32>
    %61 = vector.shape_cast %60 : vector<1x1x256xf32> to vector<1x256xf32>
    %62 = vector.broadcast %61 : vector<1x256xf32> to vector<8x256xf32>
    %63 = arith.mulf %59, %62 : vector<8x256xf32>
    %64 = arith.addf %54, %63 : vector<8x256xf32>
    %c0_43 = arith.constant 0 : index
    %c143 = arith.constant 143 : index
    %65 = vector.load %arg13[%c0_43, %c143] : memref<8x512xf32, #tpu.memory_space<vmem>>, vector<8x256xf32>
    %c6 = arith.constant 6 : index
    %c0_44 = arith.constant 0 : index
    %c0_45 = arith.constant 0 : index
    %66 = vector.load %arg2[%c6, %c0_44, %c0_45] : memref<9x8x1xf32, #tpu.memory_space<vmem>>, vector<1x8x1xf32>
    %67 = vector.shape_cast %66 : vector<1x8x1xf32> to vector<8x1xf32>
    %68 = vector.broadcast %67 : vector<8x1xf32> to vector<8x256xf32>
    %69 = arith.mulf %68, %65 : vector<8x256xf32>
    %c6_46 = arith.constant 6 : index
    %c0_47 = arith.constant 0 : index
    %c0_48 = arith.constant 0 : index
    %70 = vector.load %arg4[%c6_46, %c0_47, %c0_48] : memref<9x1x256xf32, #tpu.memory_space<vmem>>, vector<1x1x256xf32>
    %71 = vector.shape_cast %70 : vector<1x1x256xf32> to vector<1x256xf32>
    %72 = vector.broadcast %71 : vector<1x256xf32> to vector<8x256xf32>
    %73 = arith.mulf %69, %72 : vector<8x256xf32>
    %74 = arith.addf %64, %73 : vector<8x256xf32>
    %c0_49 = arith.constant 0 : index
    %c144 = arith.constant 144 : index
    %75 = vector.load %arg13[%c0_49, %c144] : memref<8x512xf32, #tpu.memory_space<vmem>>, vector<8x256xf32>
    %c7 = arith.constant 7 : index
    %c0_50 = arith.constant 0 : index
    %c0_51 = arith.constant 0 : index
    %76 = vector.load %arg2[%c7, %c0_50, %c0_51] : memref<9x8x1xf32, #tpu.memory_space<vmem>>, vector<1x8x1xf32>
    %77 = vector.shape_cast %76 : vector<1x8x1xf32> to vector<8x1xf32>
    %78 = vector.broadcast %77 : vector<8x1xf32> to vector<8x256xf32>
    %79 = arith.mulf %78, %75 : vector<8x256xf32>
    %c7_52 = arith.constant 7 : index
    %c0_53 = arith.constant 0 : index
    %c0_54 = arith.constant 0 : index
    %80 = vector.load %arg4[%c7_52, %c0_53, %c0_54] : memref<9x1x256xf32, #tpu.memory_space<vmem>>, vector<1x1x256xf32>
    %81 = vector.shape_cast %80 : vector<1x1x256xf32> to vector<1x256xf32>
    %82 = vector.broadcast %81 : vector<1x256xf32> to vector<8x256xf32>
    %83 = arith.mulf %79, %82 : vector<8x256xf32>
    %84 = arith.addf %74, %83 : vector<8x256xf32>
    %c0_55 = arith.constant 0 : index
    %c145 = arith.constant 145 : index
    %85 = vector.load %arg13[%c0_55, %c145] : memref<8x512xf32, #tpu.memory_space<vmem>>, vector<8x256xf32>
    %c8 = arith.constant 8 : index
    %c0_56 = arith.constant 0 : index
    %c0_57 = arith.constant 0 : index
    %86 = vector.load %arg2[%c8, %c0_56, %c0_57] : memref<9x8x1xf32, #tpu.memory_space<vmem>>, vector<1x8x1xf32>
    %87 = vector.shape_cast %86 : vector<1x8x1xf32> to vector<8x1xf32>
    %88 = vector.broadcast %87 : vector<8x1xf32> to vector<8x256xf32>
    %89 = arith.mulf %88, %85 : vector<8x256xf32>
    %c8_58 = arith.constant 8 : index
    %c0_59 = arith.constant 0 : index
    %c0_60 = arith.constant 0 : index
    %90 = vector.load %arg4[%c8_58, %c0_59, %c0_60] : memref<9x1x256xf32, #tpu.memory_space<vmem>>, vector<1x1x256xf32>
    %91 = vector.shape_cast %90 : vector<1x1x256xf32> to vector<1x256xf32>
    %92 = vector.broadcast %91 : vector<1x256xf32> to vector<8x256xf32>
    %93 = arith.mulf %89, %92 : vector<8x256xf32>
    %94 = arith.addf %84, %93 : vector<8x256xf32>
    %95 = vector.extract_strided_slice %94 {offsets = [0, 0], sizes = [1, 256], strides = [1, 1]} : vector<8x256xf32> to vector<1x256xf32>
    %96 = vector.extract_strided_slice %94 {offsets = [1, 0], sizes = [1, 256], strides = [1, 1]} : vector<8x256xf32> to vector<1x256xf32>
    %97 = vector.extract_strided_slice %94 {offsets = [2, 0], sizes = [1, 256], strides = [1, 1]} : vector<8x256xf32> to vector<1x256xf32>
    %98 = vector.extract_strided_slice %94 {offsets = [3, 0], sizes = [1, 256], strides = [1, 1]} : vector<8x256xf32> to vector<1x256xf32>
    %99 = vector.extract_strided_slice %94 {offsets = [4, 0], sizes = [1, 256], strides = [1, 1]} : vector<8x256xf32> to vector<1x256xf32>
    %100 = vector.extract_strided_slice %94 {offsets = [5, 0], sizes = [1, 256], strides = [1, 1]} : vector<8x256xf32> to vector<1x256xf32>
    %101 = vector.extract_strided_slice %94 {offsets = [6, 0], sizes = [1, 256], strides = [1, 1]} : vector<8x256xf32> to vector<1x256xf32>
    %102 = vector.extract_strided_slice %94 {offsets = [7, 0], sizes = [1, 256], strides = [1, 1]} : vector<8x256xf32> to vector<1x256xf32>
    %c0_61 = arith.constant 0 : index
    %103 = memref.load %arg6[%c0_61] : memref<16xf32, #tpu.memory_space<smem>>
    %104 = vector.broadcast %103 : f32 to vector<1x256xf32>
    %105 = arith.mulf %104, %95 : vector<1x256xf32>
    %c4_62 = arith.constant 4 : index
    %106 = memref.load %arg6[%c4_62] : memref<16xf32, #tpu.memory_space<smem>>
    %107 = vector.broadcast %106 : f32 to vector<1x256xf32>
    %108 = arith.mulf %107, %96 : vector<1x256xf32>
    %109 = arith.addf %105, %108 : vector<1x256xf32>
    %c8_63 = arith.constant 8 : index
    %110 = memref.load %arg6[%c8_63] : memref<16xf32, #tpu.memory_space<smem>>
    %111 = vector.broadcast %110 : f32 to vector<1x256xf32>
    %112 = arith.mulf %111, %97 : vector<1x256xf32>
    %113 = arith.addf %109, %112 : vector<1x256xf32>
    %c12 = arith.constant 12 : index
    %114 = memref.load %arg6[%c12] : memref<16xf32, #tpu.memory_space<smem>>
    %115 = vector.broadcast %114 : f32 to vector<1x256xf32>
    %116 = arith.mulf %115, %98 : vector<1x256xf32>
    %117 = arith.addf %113, %116 : vector<1x256xf32>
    %c1_64 = arith.constant 1 : index
    %118 = memref.load %arg6[%c1_64] : memref<16xf32, #tpu.memory_space<smem>>
    %119 = vector.broadcast %118 : f32 to vector<1x256xf32>
    %120 = arith.mulf %119, %95 : vector<1x256xf32>
    %c5_65 = arith.constant 5 : index
    %121 = memref.load %arg6[%c5_65] : memref<16xf32, #tpu.memory_space<smem>>
    %122 = vector.broadcast %121 : f32 to vector<1x256xf32>
    %123 = arith.mulf %122, %96 : vector<1x256xf32>
    %124 = arith.addf %120, %123 : vector<1x256xf32>
    %c9 = arith.constant 9 : index
    %125 = memref.load %arg6[%c9] : memref<16xf32, #tpu.memory_space<smem>>
    %126 = vector.broadcast %125 : f32 to vector<1x256xf32>
    %127 = arith.mulf %126, %97 : vector<1x256xf32>
    %128 = arith.addf %124, %127 : vector<1x256xf32>
    %c13 = arith.constant 13 : index
    %129 = memref.load %arg6[%c13] : memref<16xf32, #tpu.memory_space<smem>>
    %130 = vector.broadcast %129 : f32 to vector<1x256xf32>
    %131 = arith.mulf %130, %98 : vector<1x256xf32>
    %132 = arith.addf %128, %131 : vector<1x256xf32>
    %c2_66 = arith.constant 2 : index
    %133 = memref.load %arg6[%c2_66] : memref<16xf32, #tpu.memory_space<smem>>
    %134 = vector.broadcast %133 : f32 to vector<1x256xf32>
    %135 = arith.mulf %134, %95 : vector<1x256xf32>
    %c6_67 = arith.constant 6 : index
    %136 = memref.load %arg6[%c6_67] : memref<16xf32, #tpu.memory_space<smem>>
    %137 = vector.broadcast %136 : f32 to vector<1x256xf32>
    %138 = arith.mulf %137, %96 : vector<1x256xf32>
    %139 = arith.addf %135, %138 : vector<1x256xf32>
    %c10 = arith.constant 10 : index
    %140 = memref.load %arg6[%c10] : memref<16xf32, #tpu.memory_space<smem>>
    %141 = vector.broadcast %140 : f32 to vector<1x256xf32>
    %142 = arith.mulf %141, %97 : vector<1x256xf32>
    %143 = arith.addf %139, %142 : vector<1x256xf32>
    %c14 = arith.constant 14 : index
    %144 = memref.load %arg6[%c14] : memref<16xf32, #tpu.memory_space<smem>>
    %145 = vector.broadcast %144 : f32 to vector<1x256xf32>
    %146 = arith.mulf %145, %98 : vector<1x256xf32>
    %147 = arith.addf %143, %146 : vector<1x256xf32>
    %c3_68 = arith.constant 3 : index
    %148 = memref.load %arg6[%c3_68] : memref<16xf32, #tpu.memory_space<smem>>
    %149 = vector.broadcast %148 : f32 to vector<1x256xf32>
    %150 = arith.mulf %149, %95 : vector<1x256xf32>
    %c7_69 = arith.constant 7 : index
    %151 = memref.load %arg6[%c7_69] : memref<16xf32, #tpu.memory_space<smem>>
    %152 = vector.broadcast %151 : f32 to vector<1x256xf32>
    %153 = arith.mulf %152, %96 : vector<1x256xf32>
    %154 = arith.addf %150, %153 : vector<1x256xf32>
    %c11 = arith.constant 11 : index
    %155 = memref.load %arg6[%c11] : memref<16xf32, #tpu.memory_space<smem>>
    %156 = vector.broadcast %155 : f32 to vector<1x256xf32>
    %157 = arith.mulf %156, %97 : vector<1x256xf32>
    %158 = arith.addf %154, %157 : vector<1x256xf32>
    %c15 = arith.constant 15 : index
    %159 = memref.load %arg6[%c15] : memref<16xf32, #tpu.memory_space<smem>>
    %160 = vector.broadcast %159 : f32 to vector<1x256xf32>
    %161 = arith.mulf %160, %98 : vector<1x256xf32>
    %162 = arith.addf %158, %161 : vector<1x256xf32>
    %c0_70 = arith.constant 0 : index
    %163 = memref.load %arg6[%c0_70] : memref<16xf32, #tpu.memory_space<smem>>
    %164 = vector.broadcast %163 : f32 to vector<1x256xf32>
    %165 = arith.mulf %164, %99 : vector<1x256xf32>
    %c4_71 = arith.constant 4 : index
    %166 = memref.load %arg6[%c4_71] : memref<16xf32, #tpu.memory_space<smem>>
    %167 = vector.broadcast %166 : f32 to vector<1x256xf32>
    %168 = arith.mulf %167, %100 : vector<1x256xf32>
    %169 = arith.addf %165, %168 : vector<1x256xf32>
    %c8_72 = arith.constant 8 : index
    %170 = memref.load %arg6[%c8_72] : memref<16xf32, #tpu.memory_space<smem>>
    %171 = vector.broadcast %170 : f32 to vector<1x256xf32>
    %172 = arith.mulf %171, %101 : vector<1x256xf32>
    %173 = arith.addf %169, %172 : vector<1x256xf32>
    %c12_73 = arith.constant 12 : index
    %174 = memref.load %arg6[%c12_73] : memref<16xf32, #tpu.memory_space<smem>>
    %175 = vector.broadcast %174 : f32 to vector<1x256xf32>
    %176 = arith.mulf %175, %102 : vector<1x256xf32>
    %177 = arith.addf %173, %176 : vector<1x256xf32>
    %c1_74 = arith.constant 1 : index
    %178 = memref.load %arg6[%c1_74] : memref<16xf32, #tpu.memory_space<smem>>
    %179 = vector.broadcast %178 : f32 to vector<1x256xf32>
    %180 = arith.mulf %179, %99 : vector<1x256xf32>
    %c5_75 = arith.constant 5 : index
    %181 = memref.load %arg6[%c5_75] : memref<16xf32, #tpu.memory_space<smem>>
    %182 = vector.broadcast %181 : f32 to vector<1x256xf32>
    %183 = arith.mulf %182, %100 : vector<1x256xf32>
    %184 = arith.addf %180, %183 : vector<1x256xf32>
    %c9_76 = arith.constant 9 : index
    %185 = memref.load %arg6[%c9_76] : memref<16xf32, #tpu.memory_space<smem>>
    %186 = vector.broadcast %185 : f32 to vector<1x256xf32>
    %187 = arith.mulf %186, %101 : vector<1x256xf32>
    %188 = arith.addf %184, %187 : vector<1x256xf32>
    %c13_77 = arith.constant 13 : index
    %189 = memref.load %arg6[%c13_77] : memref<16xf32, #tpu.memory_space<smem>>
    %190 = vector.broadcast %189 : f32 to vector<1x256xf32>
    %191 = arith.mulf %190, %102 : vector<1x256xf32>
    %192 = arith.addf %188, %191 : vector<1x256xf32>
    %c2_78 = arith.constant 2 : index
    %193 = memref.load %arg6[%c2_78] : memref<16xf32, #tpu.memory_space<smem>>
    %194 = vector.broadcast %193 : f32 to vector<1x256xf32>
    %195 = arith.mulf %194, %99 : vector<1x256xf32>
    %c6_79 = arith.constant 6 : index
    %196 = memref.load %arg6[%c6_79] : memref<16xf32, #tpu.memory_space<smem>>
    %197 = vector.broadcast %196 : f32 to vector<1x256xf32>
    %198 = arith.mulf %197, %100 : vector<1x256xf32>
    %199 = arith.addf %195, %198 : vector<1x256xf32>
    %c10_80 = arith.constant 10 : index
    %200 = memref.load %arg6[%c10_80] : memref<16xf32, #tpu.memory_space<smem>>
    %201 = vector.broadcast %200 : f32 to vector<1x256xf32>
    %202 = arith.mulf %201, %101 : vector<1x256xf32>
    %203 = arith.addf %199, %202 : vector<1x256xf32>
    %c14_81 = arith.constant 14 : index
    %204 = memref.load %arg6[%c14_81] : memref<16xf32, #tpu.memory_space<smem>>
    %205 = vector.broadcast %204 : f32 to vector<1x256xf32>
    %206 = arith.mulf %205, %102 : vector<1x256xf32>
    %207 = arith.addf %203, %206 : vector<1x256xf32>
    %c3_82 = arith.constant 3 : index
    %208 = memref.load %arg6[%c3_82] : memref<16xf32, #tpu.memory_space<smem>>
    %209 = vector.broadcast %208 : f32 to vector<1x256xf32>
    %210 = arith.mulf %209, %99 : vector<1x256xf32>
    %c7_83 = arith.constant 7 : index
    %211 = memref.load %arg6[%c7_83] : memref<16xf32, #tpu.memory_space<smem>>
    %212 = vector.broadcast %211 : f32 to vector<1x256xf32>
    %213 = arith.mulf %212, %100 : vector<1x256xf32>
    %214 = arith.addf %210, %213 : vector<1x256xf32>
    %c11_84 = arith.constant 11 : index
    %215 = memref.load %arg6[%c11_84] : memref<16xf32, #tpu.memory_space<smem>>
    %216 = vector.broadcast %215 : f32 to vector<1x256xf32>
    %217 = arith.mulf %216, %101 : vector<1x256xf32>
    %218 = arith.addf %214, %217 : vector<1x256xf32>
    %c15_85 = arith.constant 15 : index
    %219 = memref.load %arg6[%c15_85] : memref<16xf32, #tpu.memory_space<smem>>
    %220 = vector.broadcast %219 : f32 to vector<1x256xf32>
    %221 = arith.mulf %220, %102 : vector<1x256xf32>
    %222 = arith.addf %218, %221 : vector<1x256xf32>
    %cst_86 = arith.constant dense<0.000000e+00> : vector<1xf32>
    %223 = vector.multi_reduction <add>, %117, %cst_86 [1] : vector<1x256xf32> to vector<1xf32>
    %224 = vector.shape_cast %223 : vector<1xf32> to vector<1x1xf32>
    %cst_87 = arith.constant dense<0.000000e+00> : vector<1xf32>
    %225 = vector.multi_reduction <add>, %177, %cst_87 [1] : vector<1x256xf32> to vector<1xf32>
    %226 = vector.shape_cast %225 : vector<1xf32> to vector<1x1xf32>
    %227 = arith.addf %224, %226 : vector<1x1xf32>
    %cst_88 = arith.constant 0.001953125 : f32
    %228 = vector.broadcast %cst_88 : f32 to vector<1x1xf32>
    %229 = arith.mulf %227, %228 : vector<1x1xf32>
    %230 = vector.broadcast %229 : vector<1x1xf32> to vector<1x256xf32>
    %231 = arith.subf %117, %230 : vector<1x256xf32>
    %232 = arith.mulf %231, %231 : vector<1x256xf32>
    %cst_89 = arith.constant dense<0.000000e+00> : vector<1xf32>
    %233 = vector.multi_reduction <add>, %232, %cst_89 [1] : vector<1x256xf32> to vector<1xf32>
    %234 = vector.shape_cast %233 : vector<1xf32> to vector<1x1xf32>
    %235 = vector.broadcast %229 : vector<1x1xf32> to vector<1x256xf32>
    %236 = arith.subf %177, %235 : vector<1x256xf32>
    %237 = arith.mulf %236, %236 : vector<1x256xf32>
    %cst_90 = arith.constant dense<0.000000e+00> : vector<1xf32>
    %238 = vector.multi_reduction <add>, %237, %cst_90 [1] : vector<1x256xf32> to vector<1xf32>
    %239 = vector.shape_cast %238 : vector<1xf32> to vector<1x1xf32>
    %240 = arith.addf %234, %239 : vector<1x1xf32>
    %cst_91 = arith.constant 0.001953125 : f32
    %241 = vector.broadcast %cst_91 : f32 to vector<1x1xf32>
    %242 = arith.mulf %240, %241 : vector<1x1xf32>
    %c0_92 = arith.constant 0 : index
    %243 = memref.load %arg7[%c0_92] : memref<4xf32, #tpu.memory_space<smem>>
    %cst_93 = arith.constant 9.99999974E-6 : f32
    %244 = vector.broadcast %cst_93 : f32 to vector<1x1xf32>
    %245 = arith.addf %242, %244 : vector<1x1xf32>
    %246 = math.rsqrt %245 : vector<1x1xf32>
    %247 = vector.broadcast %243 : f32 to vector<1x1xf32>
    %248 = arith.mulf %247, %246 : vector<1x1xf32>
    %c0_94 = arith.constant 0 : index
    %249 = memref.load %arg8[%c0_94] : memref<4xf32, #tpu.memory_space<smem>>
    %250 = arith.mulf %229, %248 : vector<1x1xf32>
    %251 = vector.broadcast %249 : f32 to vector<1x1xf32>
    %252 = arith.subf %251, %250 : vector<1x1xf32>
    %cst_95 = arith.constant dense<0.000000e+00> : vector<1xf32>
    %253 = vector.multi_reduction <add>, %132, %cst_95 [1] : vector<1x256xf32> to vector<1xf32>
    %254 = vector.shape_cast %253 : vector<1xf32> to vector<1x1xf32>
    %cst_96 = arith.constant dense<0.000000e+00> : vector<1xf32>
    %255 = vector.multi_reduction <add>, %192, %cst_96 [1] : vector<1x256xf32> to vector<1xf32>
    %256 = vector.shape_cast %255 : vector<1xf32> to vector<1x1xf32>
    %257 = arith.addf %254, %256 : vector<1x1xf32>
    %cst_97 = arith.constant 0.001953125 : f32
    %258 = vector.broadcast %cst_97 : f32 to vector<1x1xf32>
    %259 = arith.mulf %257, %258 : vector<1x1xf32>
    %260 = vector.broadcast %259 : vector<1x1xf32> to vector<1x256xf32>
    %261 = arith.subf %132, %260 : vector<1x256xf32>
    %262 = arith.mulf %261, %261 : vector<1x256xf32>
    %cst_98 = arith.constant dense<0.000000e+00> : vector<1xf32>
    %263 = vector.multi_reduction <add>, %262, %cst_98 [1] : vector<1x256xf32> to vector<1xf32>
    %264 = vector.shape_cast %263 : vector<1xf32> to vector<1x1xf32>
    %265 = vector.broadcast %259 : vector<1x1xf32> to vector<1x256xf32>
    %266 = arith.subf %192, %265 : vector<1x256xf32>
    %267 = arith.mulf %266, %266 : vector<1x256xf32>
    %cst_99 = arith.constant dense<0.000000e+00> : vector<1xf32>
    %268 = vector.multi_reduction <add>, %267, %cst_99 [1] : vector<1x256xf32> to vector<1xf32>
    %269 = vector.shape_cast %268 : vector<1xf32> to vector<1x1xf32>
    %270 = arith.addf %264, %269 : vector<1x1xf32>
    %cst_100 = arith.constant 0.001953125 : f32
    %271 = vector.broadcast %cst_100 : f32 to vector<1x1xf32>
    %272 = arith.mulf %270, %271 : vector<1x1xf32>
    %c1_101 = arith.constant 1 : index
    %273 = memref.load %arg7[%c1_101] : memref<4xf32, #tpu.memory_space<smem>>
    %cst_102 = arith.constant 9.99999974E-6 : f32
    %274 = vector.broadcast %cst_102 : f32 to vector<1x1xf32>
    %275 = arith.addf %272, %274 : vector<1x1xf32>
    %276 = math.rsqrt %275 : vector<1x1xf32>
    %277 = vector.broadcast %273 : f32 to vector<1x1xf32>
    %278 = arith.mulf %277, %276 : vector<1x1xf32>
    %c1_103 = arith.constant 1 : index
    %279 = memref.load %arg8[%c1_103] : memref<4xf32, #tpu.memory_space<smem>>
    %280 = arith.mulf %259, %278 : vector<1x1xf32>
    %281 = vector.broadcast %279 : f32 to vector<1x1xf32>
    %282 = arith.subf %281, %280 : vector<1x1xf32>
    %cst_104 = arith.constant dense<0.000000e+00> : vector<1xf32>
    %283 = vector.multi_reduction <add>, %147, %cst_104 [1] : vector<1x256xf32> to vector<1xf32>
    %284 = vector.shape_cast %283 : vector<1xf32> to vector<1x1xf32>
    %cst_105 = arith.constant dense<0.000000e+00> : vector<1xf32>
    %285 = vector.multi_reduction <add>, %207, %cst_105 [1] : vector<1x256xf32> to vector<1xf32>
    %286 = vector.shape_cast %285 : vector<1xf32> to vector<1x1xf32>
    %287 = arith.addf %284, %286 : vector<1x1xf32>
    %cst_106 = arith.constant 0.001953125 : f32
    %288 = vector.broadcast %cst_106 : f32 to vector<1x1xf32>
    %289 = arith.mulf %287, %288 : vector<1x1xf32>
    %290 = vector.broadcast %289 : vector<1x1xf32> to vector<1x256xf32>
    %291 = arith.subf %147, %290 : vector<1x256xf32>
    %292 = arith.mulf %291, %291 : vector<1x256xf32>
    %cst_107 = arith.constant dense<0.000000e+00> : vector<1xf32>
    %293 = vector.multi_reduction <add>, %292, %cst_107 [1] : vector<1x256xf32> to vector<1xf32>
    %294 = vector.shape_cast %293 : vector<1xf32> to vector<1x1xf32>
    %295 = vector.broadcast %289 : vector<1x1xf32> to vector<1x256xf32>
    %296 = arith.subf %207, %295 : vector<1x256xf32>
    %297 = arith.mulf %296, %296 : vector<1x256xf32>
    %cst_108 = arith.constant dense<0.000000e+00> : vector<1xf32>
    %298 = vector.multi_reduction <add>, %297, %cst_108 [1] : vector<1x256xf32> to vector<1xf32>
    %299 = vector.shape_cast %298 : vector<1xf32> to vector<1x1xf32>
    %300 = arith.addf %294, %299 : vector<1x1xf32>
    %cst_109 = arith.constant 0.001953125 : f32
    %301 = vector.broadcast %cst_109 : f32 to vector<1x1xf32>
    %302 = arith.mulf %300, %301 : vector<1x1xf32>
    %c2_110 = arith.constant 2 : index
    %303 = memref.load %arg7[%c2_110] : memref<4xf32, #tpu.memory_space<smem>>
    %cst_111 = arith.constant 9.99999974E-6 : f32
    %304 = vector.broadcast %cst_111 : f32 to vector<1x1xf32>
    %305 = arith.addf %302, %304 : vector<1x1xf32>
    %306 = math.rsqrt %305 : vector<1x1xf32>
    %307 = vector.broadcast %303 : f32 to vector<1x1xf32>
    %308 = arith.mulf %307, %306 : vector<1x1xf32>
    %c2_112 = arith.constant 2 : index
    %309 = memref.load %arg8[%c2_112] : memref<4xf32, #tpu.memory_space<smem>>
    %310 = arith.mulf %289, %308 : vector<1x1xf32>
    %311 = vector.broadcast %309 : f32 to vector<1x1xf32>
    %312 = arith.subf %311, %310 : vector<1x1xf32>
    %cst_113 = arith.constant dense<0.000000e+00> : vector<1xf32>
    %313 = vector.multi_reduction <add>, %162, %cst_113 [1] : vector<1x256xf32> to vector<1xf32>
    %314 = vector.shape_cast %313 : vector<1xf32> to vector<1x1xf32>
    %cst_114 = arith.constant dense<0.000000e+00> : vector<1xf32>
    %315 = vector.multi_reduction <add>, %222, %cst_114 [1] : vector<1x256xf32> to vector<1xf32>
    %316 = vector.shape_cast %315 : vector<1xf32> to vector<1x1xf32>
    %317 = arith.addf %314, %316 : vector<1x1xf32>
    %cst_115 = arith.constant 0.001953125 : f32
    %318 = vector.broadcast %cst_115 : f32 to vector<1x1xf32>
    %319 = arith.mulf %317, %318 : vector<1x1xf32>
    %320 = vector.broadcast %319 : vector<1x1xf32> to vector<1x256xf32>
    %321 = arith.subf %162, %320 : vector<1x256xf32>
    %322 = arith.mulf %321, %321 : vector<1x256xf32>
    %cst_116 = arith.constant dense<0.000000e+00> : vector<1xf32>
    %323 = vector.multi_reduction <add>, %322, %cst_116 [1] : vector<1x256xf32> to vector<1xf32>
    %324 = vector.shape_cast %323 : vector<1xf32> to vector<1x1xf32>
    %325 = vector.broadcast %319 : vector<1x1xf32> to vector<1x256xf32>
    %326 = arith.subf %222, %325 : vector<1x256xf32>
    %327 = arith.mulf %326, %326 : vector<1x256xf32>
    %cst_117 = arith.constant dense<0.000000e+00> : vector<1xf32>
    %328 = vector.multi_reduction <add>, %327, %cst_117 [1] : vector<1x256xf32> to vector<1xf32>
    %329 = vector.shape_cast %328 : vector<1xf32> to vector<1x1xf32>
    %330 = arith.addf %324, %329 : vector<1x1xf32>
    %cst_118 = arith.constant 0.001953125 : f32
    %331 = vector.broadcast %cst_118 : f32 to vector<1x1xf32>
    %332 = arith.mulf %330, %331 : vector<1x1xf32>
    %c3_119 = arith.constant 3 : index
    %333 = memref.load %arg7[%c3_119] : memref<4xf32, #tpu.memory_space<smem>>
    %cst_120 = arith.constant 9.99999974E-6 : f32
    %334 = vector.broadcast %cst_120 : f32 to vector<1x1xf32>
    %335 = arith.addf %332, %334 : vector<1x1xf32>
    %336 = math.rsqrt %335 : vector<1x1xf32>
    %337 = vector.broadcast %333 : f32 to vector<1x1xf32>
    %338 = arith.mulf %337, %336 : vector<1x1xf32>
    %c3_121 = arith.constant 3 : index
    %339 = memref.load %arg8[%c3_121] : memref<4xf32, #tpu.memory_space<smem>>
    %340 = arith.mulf %319, %338 : vector<1x1xf32>
    %341 = vector.broadcast %339 : f32 to vector<1x1xf32>
    %342 = arith.subf %341, %340 : vector<1x1xf32>
    %343 = vector.broadcast %248 : vector<1x1xf32> to vector<1x256xf32>
    %344 = arith.mulf %117, %343 : vector<1x256xf32>
    %345 = vector.broadcast %252 : vector<1x1xf32> to vector<1x256xf32>
    %346 = arith.addf %344, %345 : vector<1x256xf32>
    %cst_122 = arith.constant 0.000000e+00 : f32
    %347 = vector.broadcast %cst_122 : f32 to vector<1x256xf32>
    %348 = arith.maximumf %346, %347 : vector<1x256xf32>
    %c0_123 = arith.constant 0 : index
    %c128_124 = arith.constant 128 : index
    %349 = vector.load %arg13[%c0_123, %c128_124] : memref<8x512xf32, #tpu.memory_space<vmem>>, vector<1x256xf32>
    tpu.vector_store %arg13[%c0_123, %c128_124], %348 {strides = array<i32>} : memref<8x512xf32, #tpu.memory_space<vmem>>, vector<1x256xf32>,
    %350 = vector.broadcast %278 : vector<1x1xf32> to vector<1x256xf32>
    %351 = arith.mulf %132, %350 : vector<1x256xf32>
    %352 = vector.broadcast %282 : vector<1x1xf32> to vector<1x256xf32>
    %353 = arith.addf %351, %352 : vector<1x256xf32>
    %cst_125 = arith.constant 0.000000e+00 : f32
    %354 = vector.broadcast %cst_125 : f32 to vector<1x256xf32>
    %355 = arith.maximumf %353, %354 : vector<1x256xf32>
    %c1_126 = arith.constant 1 : index
    %c128_127 = arith.constant 128 : index
    %356 = vector.load %arg13[%c1_126, %c128_127] : memref<8x512xf32, #tpu.memory_space<vmem>>, vector<1x256xf32>
    tpu.vector_store %arg13[%c1_126, %c128_127], %355 {strides = array<i32>} : memref<8x512xf32, #tpu.memory_space<vmem>>, vector<1x256xf32>,
    %357 = vector.broadcast %308 : vector<1x1xf32> to vector<1x256xf32>
    %358 = arith.mulf %147, %357 : vector<1x256xf32>
    %359 = vector.broadcast %312 : vector<1x1xf32> to vector<1x256xf32>
    %360 = arith.addf %358, %359 : vector<1x256xf32>
    %cst_128 = arith.constant 0.000000e+00 : f32
    %361 = vector.broadcast %cst_128 : f32 to vector<1x256xf32>
    %362 = arith.maximumf %360, %361 : vector<1x256xf32>
    %c2_129 = arith.constant 2 : index
    %c128_130 = arith.constant 128 : index
    %363 = vector.load %arg13[%c2_129, %c128_130] : memref<8x512xf32, #tpu.memory_space<vmem>>, vector<1x256xf32>
    tpu.vector_store %arg13[%c2_129, %c128_130], %362 {strides = array<i32>} : memref<8x512xf32, #tpu.memory_space<vmem>>, vector<1x256xf32>,
    %364 = vector.broadcast %338 : vector<1x1xf32> to vector<1x256xf32>
    %365 = arith.mulf %162, %364 : vector<1x256xf32>
    %366 = vector.broadcast %342 : vector<1x1xf32> to vector<1x256xf32>
    %367 = arith.addf %365, %366 : vector<1x256xf32>
    %cst_131 = arith.constant 0.000000e+00 : f32
    %368 = vector.broadcast %cst_131 : f32 to vector<1x256xf32>
    %369 = arith.maximumf %367, %368 : vector<1x256xf32>
    %c3_132 = arith.constant 3 : index
    %c128_133 = arith.constant 128 : index
    %370 = vector.load %arg13[%c3_132, %c128_133] : memref<8x512xf32, #tpu.memory_space<vmem>>, vector<1x256xf32>
    tpu.vector_store %arg13[%c3_132, %c128_133], %369 {strides = array<i32>} : memref<8x512xf32, #tpu.memory_space<vmem>>, vector<1x256xf32>,
    %371 = vector.broadcast %248 : vector<1x1xf32> to vector<1x256xf32>
    %372 = arith.mulf %177, %371 : vector<1x256xf32>
    %373 = vector.broadcast %252 : vector<1x1xf32> to vector<1x256xf32>
    %374 = arith.addf %372, %373 : vector<1x256xf32>
    %cst_134 = arith.constant 0.000000e+00 : f32
    %375 = vector.broadcast %cst_134 : f32 to vector<1x256xf32>
    %376 = arith.maximumf %374, %375 : vector<1x256xf32>
    %c4_135 = arith.constant 4 : index
    %c128_136 = arith.constant 128 : index
    %377 = vector.load %arg13[%c4_135, %c128_136] : memref<8x512xf32, #tpu.memory_space<vmem>>, vector<1x256xf32>
    tpu.vector_store %arg13[%c4_135, %c128_136], %376 {strides = array<i32>} : memref<8x512xf32, #tpu.memory_space<vmem>>, vector<1x256xf32>,
    %378 = vector.broadcast %278 : vector<1x1xf32> to vector<1x256xf32>
    %379 = arith.mulf %192, %378 : vector<1x256xf32>
    %380 = vector.broadcast %282 : vector<1x1xf32> to vector<1x256xf32>
    %381 = arith.addf %379, %380 : vector<1x256xf32>
    %cst_137 = arith.constant 0.000000e+00 : f32
    %382 = vector.broadcast %cst_137 : f32 to vector<1x256xf32>
    %383 = arith.maximumf %381, %382 : vector<1x256xf32>
    %c5_138 = arith.constant 5 : index
    %c128_139 = arith.constant 128 : index
    %384 = vector.load %arg13[%c5_138, %c128_139] : memref<8x512xf32, #tpu.memory_space<vmem>>, vector<1x256xf32>
    tpu.vector_store %arg13[%c5_138, %c128_139], %383 {strides = array<i32>} : memref<8x512xf32, #tpu.memory_space<vmem>>, vector<1x256xf32>,
    %385 = vector.broadcast %308 : vector<1x1xf32> to vector<1x256xf32>
    %386 = arith.mulf %207, %385 : vector<1x256xf32>
    %387 = vector.broadcast %312 : vector<1x1xf32> to vector<1x256xf32>
    %388 = arith.addf %386, %387 : vector<1x256xf32>
    %cst_140 = arith.constant 0.000000e+00 : f32
    %389 = vector.broadcast %cst_140 : f32 to vector<1x256xf32>
    %390 = arith.maximumf %388, %389 : vector<1x256xf32>
    %c6_141 = arith.constant 6 : index
    %c128_142 = arith.constant 128 : index
    %391 = vector.load %arg13[%c6_141, %c128_142] : memref<8x512xf32, #tpu.memory_space<vmem>>, vector<1x256xf32>
    tpu.vector_store %arg13[%c6_141, %c128_142], %390 {strides = array<i32>} : memref<8x512xf32, #tpu.memory_space<vmem>>, vector<1x256xf32>,
    %392 = vector.broadcast %338 : vector<1x1xf32> to vector<1x256xf32>
    %393 = arith.mulf %222, %392 : vector<1x256xf32>
    %394 = vector.broadcast %342 : vector<1x1xf32> to vector<1x256xf32>
    %395 = arith.addf %393, %394 : vector<1x256xf32>
    %cst_143 = arith.constant 0.000000e+00 : f32
    %396 = vector.broadcast %cst_143 : f32 to vector<1x256xf32>
    %397 = arith.maximumf %395, %396 : vector<1x256xf32>
    %c7_144 = arith.constant 7 : index
    %c128_145 = arith.constant 128 : index
    %398 = vector.load %arg13[%c7_144, %c128_145] : memref<8x512xf32, #tpu.memory_space<vmem>>, vector<1x256xf32>
    tpu.vector_store %arg13[%c7_144, %c128_145], %397 {strides = array<i32>} : memref<8x512xf32, #tpu.memory_space<vmem>>, vector<1x256xf32>,
    %c0_146 = arith.constant 0 : index
    %c111_147 = arith.constant 111 : index
    %399 = vector.load %arg13[%c0_146, %c111_147] : memref<8x512xf32, #tpu.memory_space<vmem>>, vector<8x256xf32>
    %c0_148 = arith.constant 0 : index
    %c0_149 = arith.constant 0 : index
    %c0_150 = arith.constant 0 : index
    %400 = vector.load %arg3[%c0_148, %c0_149, %c0_150] : memref<9x8x1xf32, #tpu.memory_space<vmem>>, vector<1x8x1xf32>
    %401 = vector.shape_cast %400 : vector<1x8x1xf32> to vector<8x1xf32>
    %402 = vector.broadcast %401 : vector<8x1xf32> to vector<8x256xf32>
    %403 = arith.mulf %402, %399 : vector<8x256xf32>
    %c0_151 = arith.constant 0 : index
    %c0_152 = arith.constant 0 : index
    %c0_153 = arith.constant 0 : index
    %404 = vector.load %arg5[%c0_151, %c0_152, %c0_153] : memref<9x1x256xf32, #tpu.memory_space<vmem>>, vector<1x1x256xf32>
    %405 = vector.shape_cast %404 : vector<1x1x256xf32> to vector<1x256xf32>
    %406 = vector.broadcast %405 : vector<1x256xf32> to vector<8x256xf32>
    %407 = arith.mulf %403, %406 : vector<8x256xf32>
    %c0_154 = arith.constant 0 : index
    %c112_155 = arith.constant 112 : index
    %408 = vector.load %arg13[%c0_154, %c112_155] : memref<8x512xf32, #tpu.memory_space<vmem>>, vector<8x256xf32>
    %c1_156 = arith.constant 1 : index
    %c0_157 = arith.constant 0 : index
    %c0_158 = arith.constant 0 : index
    %409 = vector.load %arg3[%c1_156, %c0_157, %c0_158] : memref<9x8x1xf32, #tpu.memory_space<vmem>>, vector<1x8x1xf32>
    %410 = vector.shape_cast %409 : vector<1x8x1xf32> to vector<8x1xf32>
    %411 = vector.broadcast %410 : vector<8x1xf32> to vector<8x256xf32>
    %412 = arith.mulf %411, %408 : vector<8x256xf32>
    %c1_159 = arith.constant 1 : index
    %c0_160 = arith.constant 0 : index
    %c0_161 = arith.constant 0 : index
    %413 = vector.load %arg5[%c1_159, %c0_160, %c0_161] : memref<9x1x256xf32, #tpu.memory_space<vmem>>, vector<1x1x256xf32>
    %414 = vector.shape_cast %413 : vector<1x1x256xf32> to vector<1x256xf32>
    %415 = vector.broadcast %414 : vector<1x256xf32> to vector<8x256xf32>
    %416 = arith.mulf %412, %415 : vector<8x256xf32>
    %417 = arith.addf %407, %416 : vector<8x256xf32>
    %c0_162 = arith.constant 0 : index
    %c113_163 = arith.constant 113 : index
    %418 = vector.load %arg13[%c0_162, %c113_163] : memref<8x512xf32, #tpu.memory_space<vmem>>, vector<8x256xf32>
    %c2_164 = arith.constant 2 : index
    %c0_165 = arith.constant 0 : index
    %c0_166 = arith.constant 0 : index
    %419 = vector.load %arg3[%c2_164, %c0_165, %c0_166] : memref<9x8x1xf32, #tpu.memory_space<vmem>>, vector<1x8x1xf32>
    %420 = vector.shape_cast %419 : vector<1x8x1xf32> to vector<8x1xf32>
    %421 = vector.broadcast %420 : vector<8x1xf32> to vector<8x256xf32>
    %422 = arith.mulf %421, %418 : vector<8x256xf32>
    %c2_167 = arith.constant 2 : index
    %c0_168 = arith.constant 0 : index
    %c0_169 = arith.constant 0 : index
    %423 = vector.load %arg5[%c2_167, %c0_168, %c0_169] : memref<9x1x256xf32, #tpu.memory_space<vmem>>, vector<1x1x256xf32>
    %424 = vector.shape_cast %423 : vector<1x1x256xf32> to vector<1x256xf32>
    %425 = vector.broadcast %424 : vector<1x256xf32> to vector<8x256xf32>
    %426 = arith.mulf %422, %425 : vector<8x256xf32>
    %427 = arith.addf %417, %426 : vector<8x256xf32>
    %c0_170 = arith.constant 0 : index
    %c127_171 = arith.constant 127 : index
    %428 = vector.load %arg13[%c0_170, %c127_171] : memref<8x512xf32, #tpu.memory_space<vmem>>, vector<8x256xf32>
    %c3_172 = arith.constant 3 : index
    %c0_173 = arith.constant 0 : index
    %c0_174 = arith.constant 0 : index
    %429 = vector.load %arg3[%c3_172, %c0_173, %c0_174] : memref<9x8x1xf32, #tpu.memory_space<vmem>>, vector<1x8x1xf32>
    %430 = vector.shape_cast %429 : vector<1x8x1xf32> to vector<8x1xf32>
    %431 = vector.broadcast %430 : vector<8x1xf32> to vector<8x256xf32>
    %432 = arith.mulf %431, %428 : vector<8x256xf32>
    %c3_175 = arith.constant 3 : index
    %c0_176 = arith.constant 0 : index
    %c0_177 = arith.constant 0 : index
    %433 = vector.load %arg5[%c3_175, %c0_176, %c0_177] : memref<9x1x256xf32, #tpu.memory_space<vmem>>, vector<1x1x256xf32>
    %434 = vector.shape_cast %433 : vector<1x1x256xf32> to vector<1x256xf32>
    %435 = vector.broadcast %434 : vector<1x256xf32> to vector<8x256xf32>
    %436 = arith.mulf %432, %435 : vector<8x256xf32>
    %437 = arith.addf %427, %436 : vector<8x256xf32>
    %c0_178 = arith.constant 0 : index
    %c128_179 = arith.constant 128 : index
    %438 = vector.load %arg13[%c0_178, %c128_179] : memref<8x512xf32, #tpu.memory_space<vmem>>, vector<8x256xf32>
    %c4_180 = arith.constant 4 : index
    %c0_181 = arith.constant 0 : index
    %c0_182 = arith.constant 0 : index
    %439 = vector.load %arg3[%c4_180, %c0_181, %c0_182] : memref<9x8x1xf32, #tpu.memory_space<vmem>>, vector<1x8x1xf32>
    %440 = vector.shape_cast %439 : vector<1x8x1xf32> to vector<8x1xf32>
    %441 = vector.broadcast %440 : vector<8x1xf32> to vector<8x256xf32>
    %442 = arith.mulf %441, %438 : vector<8x256xf32>
    %c4_183 = arith.constant 4 : index
    %c0_184 = arith.constant 0 : index
    %c0_185 = arith.constant 0 : index
    %443 = vector.load %arg5[%c4_183, %c0_184, %c0_185] : memref<9x1x256xf32, #tpu.memory_space<vmem>>, vector<1x1x256xf32>
    %444 = vector.shape_cast %443 : vector<1x1x256xf32> to vector<1x256xf32>
    %445 = vector.broadcast %444 : vector<1x256xf32> to vector<8x256xf32>
    %446 = arith.mulf %442, %445 : vector<8x256xf32>
    %447 = arith.addf %437, %446 : vector<8x256xf32>
    %c0_186 = arith.constant 0 : index
    %c129_187 = arith.constant 129 : index
    %448 = vector.load %arg13[%c0_186, %c129_187] : memref<8x512xf32, #tpu.memory_space<vmem>>, vector<8x256xf32>
    %c5_188 = arith.constant 5 : index
    %c0_189 = arith.constant 0 : index
    %c0_190 = arith.constant 0 : index
    %449 = vector.load %arg3[%c5_188, %c0_189, %c0_190] : memref<9x8x1xf32, #tpu.memory_space<vmem>>, vector<1x8x1xf32>
    %450 = vector.shape_cast %449 : vector<1x8x1xf32> to vector<8x1xf32>
    %451 = vector.broadcast %450 : vector<8x1xf32> to vector<8x256xf32>
    %452 = arith.mulf %451, %448 : vector<8x256xf32>
    %c5_191 = arith.constant 5 : index
    %c0_192 = arith.constant 0 : index
    %c0_193 = arith.constant 0 : index
    %453 = vector.load %arg5[%c5_191, %c0_192, %c0_193] : memref<9x1x256xf32, #tpu.memory_space<vmem>>, vector<1x1x256xf32>
    %454 = vector.shape_cast %453 : vector<1x1x256xf32> to vector<1x256xf32>
    %455 = vector.broadcast %454 : vector<1x256xf32> to vector<8x256xf32>
    %456 = arith.mulf %452, %455 : vector<8x256xf32>
    %457 = arith.addf %447, %456 : vector<8x256xf32>
    %c0_194 = arith.constant 0 : index
    %c143_195 = arith.constant 143 : index
    %458 = vector.load %arg13[%c0_194, %c143_195] : memref<8x512xf32, #tpu.memory_space<vmem>>, vector<8x256xf32>
    %c6_196 = arith.constant 6 : index
    %c0_197 = arith.constant 0 : index
    %c0_198 = arith.constant 0 : index
    %459 = vector.load %arg3[%c6_196, %c0_197, %c0_198] : memref<9x8x1xf32, #tpu.memory_space<vmem>>, vector<1x8x1xf32>
    %460 = vector.shape_cast %459 : vector<1x8x1xf32> to vector<8x1xf32>
    %461 = vector.broadcast %460 : vector<8x1xf32> to vector<8x256xf32>
    %462 = arith.mulf %461, %458 : vector<8x256xf32>
    %c6_199 = arith.constant 6 : index
    %c0_200 = arith.constant 0 : index
    %c0_201 = arith.constant 0 : index
    %463 = vector.load %arg5[%c6_199, %c0_200, %c0_201] : memref<9x1x256xf32, #tpu.memory_space<vmem>>, vector<1x1x256xf32>
    %464 = vector.shape_cast %463 : vector<1x1x256xf32> to vector<1x256xf32>
    %465 = vector.broadcast %464 : vector<1x256xf32> to vector<8x256xf32>
    %466 = arith.mulf %462, %465 : vector<8x256xf32>
    %467 = arith.addf %457, %466 : vector<8x256xf32>
    %c0_202 = arith.constant 0 : index
    %c144_203 = arith.constant 144 : index
    %468 = vector.load %arg13[%c0_202, %c144_203] : memref<8x512xf32, #tpu.memory_space<vmem>>, vector<8x256xf32>
    %c7_204 = arith.constant 7 : index
    %c0_205 = arith.constant 0 : index
    %c0_206 = arith.constant 0 : index
    %469 = vector.load %arg3[%c7_204, %c0_205, %c0_206] : memref<9x8x1xf32, #tpu.memory_space<vmem>>, vector<1x8x1xf32>
    %470 = vector.shape_cast %469 : vector<1x8x1xf32> to vector<8x1xf32>
    %471 = vector.broadcast %470 : vector<8x1xf32> to vector<8x256xf32>
    %472 = arith.mulf %471, %468 : vector<8x256xf32>
    %c7_207 = arith.constant 7 : index
    %c0_208 = arith.constant 0 : index
    %c0_209 = arith.constant 0 : index
    %473 = vector.load %arg5[%c7_207, %c0_208, %c0_209] : memref<9x1x256xf32, #tpu.memory_space<vmem>>, vector<1x1x256xf32>
    %474 = vector.shape_cast %473 : vector<1x1x256xf32> to vector<1x256xf32>
    %475 = vector.broadcast %474 : vector<1x256xf32> to vector<8x256xf32>
    %476 = arith.mulf %472, %475 : vector<8x256xf32>
    %477 = arith.addf %467, %476 : vector<8x256xf32>
    %c0_210 = arith.constant 0 : index
    %c145_211 = arith.constant 145 : index
    %478 = vector.load %arg13[%c0_210, %c145_211] : memref<8x512xf32, #tpu.memory_space<vmem>>, vector<8x256xf32>
    %c8_212 = arith.constant 8 : index
    %c0_213 = arith.constant 0 : index
    %c0_214 = arith.constant 0 : index
    %479 = vector.load %arg3[%c8_212, %c0_213, %c0_214] : memref<9x8x1xf32, #tpu.memory_space<vmem>>, vector<1x8x1xf32>
    %480 = vector.shape_cast %479 : vector<1x8x1xf32> to vector<8x1xf32>
    %481 = vector.broadcast %480 : vector<8x1xf32> to vector<8x256xf32>
    %482 = arith.mulf %481, %478 : vector<8x256xf32>
    %c8_215 = arith.constant 8 : index
    %c0_216 = arith.constant 0 : index
    %c0_217 = arith.constant 0 : index
    %483 = vector.load %arg5[%c8_215, %c0_216, %c0_217] : memref<9x1x256xf32, #tpu.memory_space<vmem>>, vector<1x1x256xf32>
    %484 = vector.shape_cast %483 : vector<1x1x256xf32> to vector<1x256xf32>
    %485 = vector.broadcast %484 : vector<1x256xf32> to vector<8x256xf32>
    %486 = arith.mulf %482, %485 : vector<8x256xf32>
    %487 = arith.addf %477, %486 : vector<8x256xf32>
    %488 = vector.extract_strided_slice %487 {offsets = [0, 0], sizes = [1, 256], strides = [1, 1]} : vector<8x256xf32> to vector<1x256xf32>
    %489 = vector.extract_strided_slice %487 {offsets = [1, 0], sizes = [1, 256], strides = [1, 1]} : vector<8x256xf32> to vector<1x256xf32>
    %490 = vector.extract_strided_slice %487 {offsets = [2, 0], sizes = [1, 256], strides = [1, 1]} : vector<8x256xf32> to vector<1x256xf32>
    %491 = vector.extract_strided_slice %487 {offsets = [3, 0], sizes = [1, 256], strides = [1, 1]} : vector<8x256xf32> to vector<1x256xf32>
    %492 = vector.extract_strided_slice %487 {offsets = [4, 0], sizes = [1, 256], strides = [1, 1]} : vector<8x256xf32> to vector<1x256xf32>
    %493 = vector.extract_strided_slice %487 {offsets = [5, 0], sizes = [1, 256], strides = [1, 1]} : vector<8x256xf32> to vector<1x256xf32>
    %494 = vector.extract_strided_slice %487 {offsets = [6, 0], sizes = [1, 256], strides = [1, 1]} : vector<8x256xf32> to vector<1x256xf32>
    %495 = vector.extract_strided_slice %487 {offsets = [7, 0], sizes = [1, 256], strides = [1, 1]} : vector<8x256xf32> to vector<1x256xf32>
    %c0_218 = arith.constant 0 : index
    %496 = memref.load %arg9[%c0_218] : memref<32xf32, #tpu.memory_space<smem>>
    %497 = vector.broadcast %496 : f32 to vector<1x256xf32>
    %498 = arith.mulf %497, %488 : vector<1x256xf32>
    %c8_219 = arith.constant 8 : index
    %499 = memref.load %arg9[%c8_219] : memref<32xf32, #tpu.memory_space<smem>>
    %500 = vector.broadcast %499 : f32 to vector<1x256xf32>
    %501 = arith.mulf %500, %489 : vector<1x256xf32>
    %502 = arith.addf %498, %501 : vector<1x256xf32>
    %c16 = arith.constant 16 : index
    %503 = memref.load %arg9[%c16] : memref<32xf32, #tpu.memory_space<smem>>
    %504 = vector.broadcast %503 : f32 to vector<1x256xf32>
    %505 = arith.mulf %504, %490 : vector<1x256xf32>
    %506 = arith.addf %502, %505 : vector<1x256xf32>
    %c24 = arith.constant 24 : index
    %507 = memref.load %arg9[%c24] : memref<32xf32, #tpu.memory_space<smem>>
    %508 = vector.broadcast %507 : f32 to vector<1x256xf32>
    %509 = arith.mulf %508, %491 : vector<1x256xf32>
    %510 = arith.addf %506, %509 : vector<1x256xf32>
    %c1_220 = arith.constant 1 : index
    %511 = memref.load %arg9[%c1_220] : memref<32xf32, #tpu.memory_space<smem>>
    %512 = vector.broadcast %511 : f32 to vector<1x256xf32>
    %513 = arith.mulf %512, %488 : vector<1x256xf32>
    %c9_221 = arith.constant 9 : index
    %514 = memref.load %arg9[%c9_221] : memref<32xf32, #tpu.memory_space<smem>>
    %515 = vector.broadcast %514 : f32 to vector<1x256xf32>
    %516 = arith.mulf %515, %489 : vector<1x256xf32>
    %517 = arith.addf %513, %516 : vector<1x256xf32>
    %c17 = arith.constant 17 : index
    %518 = memref.load %arg9[%c17] : memref<32xf32, #tpu.memory_space<smem>>
    %519 = vector.broadcast %518 : f32 to vector<1x256xf32>
    %520 = arith.mulf %519, %490 : vector<1x256xf32>
    %521 = arith.addf %517, %520 : vector<1x256xf32>
    %c25 = arith.constant 25 : index
    %522 = memref.load %arg9[%c25] : memref<32xf32, #tpu.memory_space<smem>>
    %523 = vector.broadcast %522 : f32 to vector<1x256xf32>
    %524 = arith.mulf %523, %491 : vector<1x256xf32>
    %525 = arith.addf %521, %524 : vector<1x256xf32>
    %c2_222 = arith.constant 2 : index
    %526 = memref.load %arg9[%c2_222] : memref<32xf32, #tpu.memory_space<smem>>
    %527 = vector.broadcast %526 : f32 to vector<1x256xf32>
    %528 = arith.mulf %527, %488 : vector<1x256xf32>
    %c10_223 = arith.constant 10 : index
    %529 = memref.load %arg9[%c10_223] : memref<32xf32, #tpu.memory_space<smem>>
    %530 = vector.broadcast %529 : f32 to vector<1x256xf32>
    %531 = arith.mulf %530, %489 : vector<1x256xf32>
    %532 = arith.addf %528, %531 : vector<1x256xf32>
    %c18 = arith.constant 18 : index
    %533 = memref.load %arg9[%c18] : memref<32xf32, #tpu.memory_space<smem>>
    %534 = vector.broadcast %533 : f32 to vector<1x256xf32>
    %535 = arith.mulf %534, %490 : vector<1x256xf32>
    %536 = arith.addf %532, %535 : vector<1x256xf32>
    %c26 = arith.constant 26 : index
    %537 = memref.load %arg9[%c26] : memref<32xf32, #tpu.memory_space<smem>>
    %538 = vector.broadcast %537 : f32 to vector<1x256xf32>
    %539 = arith.mulf %538, %491 : vector<1x256xf32>
    %540 = arith.addf %536, %539 : vector<1x256xf32>
    %c3_224 = arith.constant 3 : index
    %541 = memref.load %arg9[%c3_224] : memref<32xf32, #tpu.memory_space<smem>>
    %542 = vector.broadcast %541 : f32 to vector<1x256xf32>
    %543 = arith.mulf %542, %488 : vector<1x256xf32>
    %c11_225 = arith.constant 11 : index
    %544 = memref.load %arg9[%c11_225] : memref<32xf32, #tpu.memory_space<smem>>
    %545 = vector.broadcast %544 : f32 to vector<1x256xf32>
    %546 = arith.mulf %545, %489 : vector<1x256xf32>
    %547 = arith.addf %543, %546 : vector<1x256xf32>
    %c19 = arith.constant 19 : index
    %548 = memref.load %arg9[%c19] : memref<32xf32, #tpu.memory_space<smem>>
    %549 = vector.broadcast %548 : f32 to vector<1x256xf32>
    %550 = arith.mulf %549, %490 : vector<1x256xf32>
    %551 = arith.addf %547, %550 : vector<1x256xf32>
    %c27 = arith.constant 27 : index
    %552 = memref.load %arg9[%c27] : memref<32xf32, #tpu.memory_space<smem>>
    %553 = vector.broadcast %552 : f32 to vector<1x256xf32>
    %554 = arith.mulf %553, %491 : vector<1x256xf32>
    %555 = arith.addf %551, %554 : vector<1x256xf32>
    %c4_226 = arith.constant 4 : index
    %556 = memref.load %arg9[%c4_226] : memref<32xf32, #tpu.memory_space<smem>>
    %557 = vector.broadcast %556 : f32 to vector<1x256xf32>
    %558 = arith.mulf %557, %488 : vector<1x256xf32>
    %c12_227 = arith.constant 12 : index
    %559 = memref.load %arg9[%c12_227] : memref<32xf32, #tpu.memory_space<smem>>
    %560 = vector.broadcast %559 : f32 to vector<1x256xf32>
    %561 = arith.mulf %560, %489 : vector<1x256xf32>
    %562 = arith.addf %558, %561 : vector<1x256xf32>
    %c20 = arith.constant 20 : index
    %563 = memref.load %arg9[%c20] : memref<32xf32, #tpu.memory_space<smem>>
    %564 = vector.broadcast %563 : f32 to vector<1x256xf32>
    %565 = arith.mulf %564, %490 : vector<1x256xf32>
    %566 = arith.addf %562, %565 : vector<1x256xf32>
    %c28 = arith.constant 28 : index
    %567 = memref.load %arg9[%c28] : memref<32xf32, #tpu.memory_space<smem>>
    %568 = vector.broadcast %567 : f32 to vector<1x256xf32>
    %569 = arith.mulf %568, %491 : vector<1x256xf32>
    %570 = arith.addf %566, %569 : vector<1x256xf32>
    %c5_228 = arith.constant 5 : index
    %571 = memref.load %arg9[%c5_228] : memref<32xf32, #tpu.memory_space<smem>>
    %572 = vector.broadcast %571 : f32 to vector<1x256xf32>
    %573 = arith.mulf %572, %488 : vector<1x256xf32>
    %c13_229 = arith.constant 13 : index
    %574 = memref.load %arg9[%c13_229] : memref<32xf32, #tpu.memory_space<smem>>
    %575 = vector.broadcast %574 : f32 to vector<1x256xf32>
    %576 = arith.mulf %575, %489 : vector<1x256xf32>
    %577 = arith.addf %573, %576 : vector<1x256xf32>
    %c21 = arith.constant 21 : index
    %578 = memref.load %arg9[%c21] : memref<32xf32, #tpu.memory_space<smem>>
    %579 = vector.broadcast %578 : f32 to vector<1x256xf32>
    %580 = arith.mulf %579, %490 : vector<1x256xf32>
    %581 = arith.addf %577, %580 : vector<1x256xf32>
    %c29 = arith.constant 29 : index
    %582 = memref.load %arg9[%c29] : memref<32xf32, #tpu.memory_space<smem>>
    %583 = vector.broadcast %582 : f32 to vector<1x256xf32>
    %584 = arith.mulf %583, %491 : vector<1x256xf32>
    %585 = arith.addf %581, %584 : vector<1x256xf32>
    %c6_230 = arith.constant 6 : index
    %586 = memref.load %arg9[%c6_230] : memref<32xf32, #tpu.memory_space<smem>>
    %587 = vector.broadcast %586 : f32 to vector<1x256xf32>
    %588 = arith.mulf %587, %488 : vector<1x256xf32>
    %c14_231 = arith.constant 14 : index
    %589 = memref.load %arg9[%c14_231] : memref<32xf32, #tpu.memory_space<smem>>
    %590 = vector.broadcast %589 : f32 to vector<1x256xf32>
    %591 = arith.mulf %590, %489 : vector<1x256xf32>
    %592 = arith.addf %588, %591 : vector<1x256xf32>
    %c22 = arith.constant 22 : index
    %593 = memref.load %arg9[%c22] : memref<32xf32, #tpu.memory_space<smem>>
    %594 = vector.broadcast %593 : f32 to vector<1x256xf32>
    %595 = arith.mulf %594, %490 : vector<1x256xf32>
    %596 = arith.addf %592, %595 : vector<1x256xf32>
    %c30 = arith.constant 30 : index
    %597 = memref.load %arg9[%c30] : memref<32xf32, #tpu.memory_space<smem>>
    %598 = vector.broadcast %597 : f32 to vector<1x256xf32>
    %599 = arith.mulf %598, %491 : vector<1x256xf32>
    %600 = arith.addf %596, %599 : vector<1x256xf32>
    %c7_232 = arith.constant 7 : index
    %601 = memref.load %arg9[%c7_232] : memref<32xf32, #tpu.memory_space<smem>>
    %602 = vector.broadcast %601 : f32 to vector<1x256xf32>
    %603 = arith.mulf %602, %488 : vector<1x256xf32>
    %c15_233 = arith.constant 15 : index
    %604 = memref.load %arg9[%c15_233] : memref<32xf32, #tpu.memory_space<smem>>
    %605 = vector.broadcast %604 : f32 to vector<1x256xf32>
    %606 = arith.mulf %605, %489 : vector<1x256xf32>
    %607 = arith.addf %603, %606 : vector<1x256xf32>
    %c23 = arith.constant 23 : index
    %608 = memref.load %arg9[%c23] : memref<32xf32, #tpu.memory_space<smem>>
    %609 = vector.broadcast %608 : f32 to vector<1x256xf32>
    %610 = arith.mulf %609, %490 : vector<1x256xf32>
    %611 = arith.addf %607, %610 : vector<1x256xf32>
    %c31 = arith.constant 31 : index
    %612 = memref.load %arg9[%c31] : memref<32xf32, #tpu.memory_space<smem>>
    %613 = vector.broadcast %612 : f32 to vector<1x256xf32>
    %614 = arith.mulf %613, %491 : vector<1x256xf32>
    %615 = arith.addf %611, %614 : vector<1x256xf32>
    %c0_234 = arith.constant 0 : index
    %616 = memref.load %arg9[%c0_234] : memref<32xf32, #tpu.memory_space<smem>>
    %617 = vector.broadcast %616 : f32 to vector<1x256xf32>
    %618 = arith.mulf %617, %492 : vector<1x256xf32>
    %c8_235 = arith.constant 8 : index
    %619 = memref.load %arg9[%c8_235] : memref<32xf32, #tpu.memory_space<smem>>
    %620 = vector.broadcast %619 : f32 to vector<1x256xf32>
    %621 = arith.mulf %620, %493 : vector<1x256xf32>
    %622 = arith.addf %618, %621 : vector<1x256xf32>
    %c16_236 = arith.constant 16 : index
    %623 = memref.load %arg9[%c16_236] : memref<32xf32, #tpu.memory_space<smem>>
    %624 = vector.broadcast %623 : f32 to vector<1x256xf32>
    %625 = arith.mulf %624, %494 : vector<1x256xf32>
    %626 = arith.addf %622, %625 : vector<1x256xf32>
    %c24_237 = arith.constant 24 : index
    %627 = memref.load %arg9[%c24_237] : memref<32xf32, #tpu.memory_space<smem>>
    %628 = vector.broadcast %627 : f32 to vector<1x256xf32>
    %629 = arith.mulf %628, %495 : vector<1x256xf32>
    %630 = arith.addf %626, %629 : vector<1x256xf32>
    %c1_238 = arith.constant 1 : index
    %631 = memref.load %arg9[%c1_238] : memref<32xf32, #tpu.memory_space<smem>>
    %632 = vector.broadcast %631 : f32 to vector<1x256xf32>
    %633 = arith.mulf %632, %492 : vector<1x256xf32>
    %c9_239 = arith.constant 9 : index
    %634 = memref.load %arg9[%c9_239] : memref<32xf32, #tpu.memory_space<smem>>
    %635 = vector.broadcast %634 : f32 to vector<1x256xf32>
    %636 = arith.mulf %635, %493 : vector<1x256xf32>
    %637 = arith.addf %633, %636 : vector<1x256xf32>
    %c17_240 = arith.constant 17 : index
    %638 = memref.load %arg9[%c17_240] : memref<32xf32, #tpu.memory_space<smem>>
    %639 = vector.broadcast %638 : f32 to vector<1x256xf32>
    %640 = arith.mulf %639, %494 : vector<1x256xf32>
    %641 = arith.addf %637, %640 : vector<1x256xf32>
    %c25_241 = arith.constant 25 : index
    %642 = memref.load %arg9[%c25_241] : memref<32xf32, #tpu.memory_space<smem>>
    %643 = vector.broadcast %642 : f32 to vector<1x256xf32>
    %644 = arith.mulf %643, %495 : vector<1x256xf32>
    %645 = arith.addf %641, %644 : vector<1x256xf32>
    %c2_242 = arith.constant 2 : index
    %646 = memref.load %arg9[%c2_242] : memref<32xf32, #tpu.memory_space<smem>>
    %647 = vector.broadcast %646 : f32 to vector<1x256xf32>
    %648 = arith.mulf %647, %492 : vector<1x256xf32>
    %c10_243 = arith.constant 10 : index
    %649 = memref.load %arg9[%c10_243] : memref<32xf32, #tpu.memory_space<smem>>
    %650 = vector.broadcast %649 : f32 to vector<1x256xf32>
    %651 = arith.mulf %650, %493 : vector<1x256xf32>
    %652 = arith.addf %648, %651 : vector<1x256xf32>
    %c18_244 = arith.constant 18 : index
    %653 = memref.load %arg9[%c18_244] : memref<32xf32, #tpu.memory_space<smem>>
    %654 = vector.broadcast %653 : f32 to vector<1x256xf32>
    %655 = arith.mulf %654, %494 : vector<1x256xf32>
    %656 = arith.addf %652, %655 : vector<1x256xf32>
    %c26_245 = arith.constant 26 : index
    %657 = memref.load %arg9[%c26_245] : memref<32xf32, #tpu.memory_space<smem>>
    %658 = vector.broadcast %657 : f32 to vector<1x256xf32>
    %659 = arith.mulf %658, %495 : vector<1x256xf32>
    %660 = arith.addf %656, %659 : vector<1x256xf32>
    %c3_246 = arith.constant 3 : index
    %661 = memref.load %arg9[%c3_246] : memref<32xf32, #tpu.memory_space<smem>>
    %662 = vector.broadcast %661 : f32 to vector<1x256xf32>
    %663 = arith.mulf %662, %492 : vector<1x256xf32>
    %c11_247 = arith.constant 11 : index
    %664 = memref.load %arg9[%c11_247] : memref<32xf32, #tpu.memory_space<smem>>
    %665 = vector.broadcast %664 : f32 to vector<1x256xf32>
    %666 = arith.mulf %665, %493 : vector<1x256xf32>
    %667 = arith.addf %663, %666 : vector<1x256xf32>
    %c19_248 = arith.constant 19 : index
    %668 = memref.load %arg9[%c19_248] : memref<32xf32, #tpu.memory_space<smem>>
    %669 = vector.broadcast %668 : f32 to vector<1x256xf32>
    %670 = arith.mulf %669, %494 : vector<1x256xf32>
    %671 = arith.addf %667, %670 : vector<1x256xf32>
    %c27_249 = arith.constant 27 : index
    %672 = memref.load %arg9[%c27_249] : memref<32xf32, #tpu.memory_space<smem>>
    %673 = vector.broadcast %672 : f32 to vector<1x256xf32>
    %674 = arith.mulf %673, %495 : vector<1x256xf32>
    %675 = arith.addf %671, %674 : vector<1x256xf32>
    %c4_250 = arith.constant 4 : index
    %676 = memref.load %arg9[%c4_250] : memref<32xf32, #tpu.memory_space<smem>>
    %677 = vector.broadcast %676 : f32 to vector<1x256xf32>
    %678 = arith.mulf %677, %492 : vector<1x256xf32>
    %c12_251 = arith.constant 12 : index
    %679 = memref.load %arg9[%c12_251] : memref<32xf32, #tpu.memory_space<smem>>
    %680 = vector.broadcast %679 : f32 to vector<1x256xf32>
    %681 = arith.mulf %680, %493 : vector<1x256xf32>
    %682 = arith.addf %678, %681 : vector<1x256xf32>
    %c20_252 = arith.constant 20 : index
    %683 = memref.load %arg9[%c20_252] : memref<32xf32, #tpu.memory_space<smem>>
    %684 = vector.broadcast %683 : f32 to vector<1x256xf32>
    %685 = arith.mulf %684, %494 : vector<1x256xf32>
    %686 = arith.addf %682, %685 : vector<1x256xf32>
    %c28_253 = arith.constant 28 : index
    %687 = memref.load %arg9[%c28_253] : memref<32xf32, #tpu.memory_space<smem>>
    %688 = vector.broadcast %687 : f32 to vector<1x256xf32>
    %689 = arith.mulf %688, %495 : vector<1x256xf32>
    %690 = arith.addf %686, %689 : vector<1x256xf32>
    %c5_254 = arith.constant 5 : index
    %691 = memref.load %arg9[%c5_254] : memref<32xf32, #tpu.memory_space<smem>>
    %692 = vector.broadcast %691 : f32 to vector<1x256xf32>
    %693 = arith.mulf %692, %492 : vector<1x256xf32>
    %c13_255 = arith.constant 13 : index
    %694 = memref.load %arg9[%c13_255] : memref<32xf32, #tpu.memory_space<smem>>
    %695 = vector.broadcast %694 : f32 to vector<1x256xf32>
    %696 = arith.mulf %695, %493 : vector<1x256xf32>
    %697 = arith.addf %693, %696 : vector<1x256xf32>
    %c21_256 = arith.constant 21 : index
    %698 = memref.load %arg9[%c21_256] : memref<32xf32, #tpu.memory_space<smem>>
    %699 = vector.broadcast %698 : f32 to vector<1x256xf32>
    %700 = arith.mulf %699, %494 : vector<1x256xf32>
    %701 = arith.addf %697, %700 : vector<1x256xf32>
    %c29_257 = arith.constant 29 : index
    %702 = memref.load %arg9[%c29_257] : memref<32xf32, #tpu.memory_space<smem>>
    %703 = vector.broadcast %702 : f32 to vector<1x256xf32>
    %704 = arith.mulf %703, %495 : vector<1x256xf32>
    %705 = arith.addf %701, %704 : vector<1x256xf32>
    %c6_258 = arith.constant 6 : index
    %706 = memref.load %arg9[%c6_258] : memref<32xf32, #tpu.memory_space<smem>>
    %707 = vector.broadcast %706 : f32 to vector<1x256xf32>
    %708 = arith.mulf %707, %492 : vector<1x256xf32>
    %c14_259 = arith.constant 14 : index
    %709 = memref.load %arg9[%c14_259] : memref<32xf32, #tpu.memory_space<smem>>
    %710 = vector.broadcast %709 : f32 to vector<1x256xf32>
    %711 = arith.mulf %710, %493 : vector<1x256xf32>
    %712 = arith.addf %708, %711 : vector<1x256xf32>
    %c22_260 = arith.constant 22 : index
    %713 = memref.load %arg9[%c22_260] : memref<32xf32, #tpu.memory_space<smem>>
    %714 = vector.broadcast %713 : f32 to vector<1x256xf32>
    %715 = arith.mulf %714, %494 : vector<1x256xf32>
    %716 = arith.addf %712, %715 : vector<1x256xf32>
    %c30_261 = arith.constant 30 : index
    %717 = memref.load %arg9[%c30_261] : memref<32xf32, #tpu.memory_space<smem>>
    %718 = vector.broadcast %717 : f32 to vector<1x256xf32>
    %719 = arith.mulf %718, %495 : vector<1x256xf32>
    %720 = arith.addf %716, %719 : vector<1x256xf32>
    %c7_262 = arith.constant 7 : index
    %721 = memref.load %arg9[%c7_262] : memref<32xf32, #tpu.memory_space<smem>>
    %722 = vector.broadcast %721 : f32 to vector<1x256xf32>
    %723 = arith.mulf %722, %492 : vector<1x256xf32>
    %c15_263 = arith.constant 15 : index
    %724 = memref.load %arg9[%c15_263] : memref<32xf32, #tpu.memory_space<smem>>
    %725 = vector.broadcast %724 : f32 to vector<1x256xf32>
    %726 = arith.mulf %725, %493 : vector<1x256xf32>
    %727 = arith.addf %723, %726 : vector<1x256xf32>
    %c23_264 = arith.constant 23 : index
    %728 = memref.load %arg9[%c23_264] : memref<32xf32, #tpu.memory_space<smem>>
    %729 = vector.broadcast %728 : f32 to vector<1x256xf32>
    %730 = arith.mulf %729, %494 : vector<1x256xf32>
    %731 = arith.addf %727, %730 : vector<1x256xf32>
    %c31_265 = arith.constant 31 : index
    %732 = memref.load %arg9[%c31_265] : memref<32xf32, #tpu.memory_space<smem>>
    %733 = vector.broadcast %732 : f32 to vector<1x256xf32>
    %734 = arith.mulf %733, %495 : vector<1x256xf32>
    %735 = arith.addf %731, %734 : vector<1x256xf32>
    %cst_266 = arith.constant dense<0.000000e+00> : vector<1xf32>
    %736 = vector.multi_reduction <add>, %510, %cst_266 [1] : vector<1x256xf32> to vector<1xf32>
    %737 = vector.shape_cast %736 : vector<1xf32> to vector<1x1xf32>
    %cst_267 = arith.constant dense<0.000000e+00> : vector<1xf32>
    %738 = vector.multi_reduction <add>, %630, %cst_267 [1] : vector<1x256xf32> to vector<1xf32>
    %739 = vector.shape_cast %738 : vector<1xf32> to vector<1x1xf32>
    %740 = arith.addf %737, %739 : vector<1x1xf32>
    %cst_268 = arith.constant 0.001953125 : f32
    %741 = vector.broadcast %cst_268 : f32 to vector<1x1xf32>
    %742 = arith.mulf %740, %741 : vector<1x1xf32>
    %743 = vector.broadcast %742 : vector<1x1xf32> to vector<1x256xf32>
    %744 = arith.subf %510, %743 : vector<1x256xf32>
    %745 = arith.mulf %744, %744 : vector<1x256xf32>
    %cst_269 = arith.constant dense<0.000000e+00> : vector<1xf32>
    %746 = vector.multi_reduction <add>, %745, %cst_269 [1] : vector<1x256xf32> to vector<1xf32>
    %747 = vector.shape_cast %746 : vector<1xf32> to vector<1x1xf32>
    %748 = vector.broadcast %742 : vector<1x1xf32> to vector<1x256xf32>
    %749 = arith.subf %630, %748 : vector<1x256xf32>
    %750 = arith.mulf %749, %749 : vector<1x256xf32>
    %cst_270 = arith.constant dense<0.000000e+00> : vector<1xf32>
    %751 = vector.multi_reduction <add>, %750, %cst_270 [1] : vector<1x256xf32> to vector<1xf32>
    %752 = vector.shape_cast %751 : vector<1xf32> to vector<1x1xf32>
    %753 = arith.addf %747, %752 : vector<1x1xf32>
    %cst_271 = arith.constant 0.001953125 : f32
    %754 = vector.broadcast %cst_271 : f32 to vector<1x1xf32>
    %755 = arith.mulf %753, %754 : vector<1x1xf32>
    %c0_272 = arith.constant 0 : index
    %756 = memref.load %arg10[%c0_272] : memref<8xf32, #tpu.memory_space<smem>>
    %cst_273 = arith.constant 9.99999974E-6 : f32
    %757 = vector.broadcast %cst_273 : f32 to vector<1x1xf32>
    %758 = arith.addf %755, %757 : vector<1x1xf32>
    %759 = math.rsqrt %758 : vector<1x1xf32>
    %760 = vector.broadcast %756 : f32 to vector<1x1xf32>
    %761 = arith.mulf %760, %759 : vector<1x1xf32>
    %c0_274 = arith.constant 0 : index
    %762 = memref.load %arg11[%c0_274] : memref<8xf32, #tpu.memory_space<smem>>
    %763 = arith.mulf %742, %761 : vector<1x1xf32>
    %764 = vector.broadcast %762 : f32 to vector<1x1xf32>
    %765 = arith.subf %764, %763 : vector<1x1xf32>
    %cst_275 = arith.constant dense<0.000000e+00> : vector<1xf32>
    %766 = vector.multi_reduction <add>, %525, %cst_275 [1] : vector<1x256xf32> to vector<1xf32>
    %767 = vector.shape_cast %766 : vector<1xf32> to vector<1x1xf32>
    %cst_276 = arith.constant dense<0.000000e+00> : vector<1xf32>
    %768 = vector.multi_reduction <add>, %645, %cst_276 [1] : vector<1x256xf32> to vector<1xf32>
    %769 = vector.shape_cast %768 : vector<1xf32> to vector<1x1xf32>
    %770 = arith.addf %767, %769 : vector<1x1xf32>
    %cst_277 = arith.constant 0.001953125 : f32
    %771 = vector.broadcast %cst_277 : f32 to vector<1x1xf32>
    %772 = arith.mulf %770, %771 : vector<1x1xf32>
    %773 = vector.broadcast %772 : vector<1x1xf32> to vector<1x256xf32>
    %774 = arith.subf %525, %773 : vector<1x256xf32>
    %775 = arith.mulf %774, %774 : vector<1x256xf32>
    %cst_278 = arith.constant dense<0.000000e+00> : vector<1xf32>
    %776 = vector.multi_reduction <add>, %775, %cst_278 [1] : vector<1x256xf32> to vector<1xf32>
    %777 = vector.shape_cast %776 : vector<1xf32> to vector<1x1xf32>
    %778 = vector.broadcast %772 : vector<1x1xf32> to vector<1x256xf32>
    %779 = arith.subf %645, %778 : vector<1x256xf32>
    %780 = arith.mulf %779, %779 : vector<1x256xf32>
    %cst_279 = arith.constant dense<0.000000e+00> : vector<1xf32>
    %781 = vector.multi_reduction <add>, %780, %cst_279 [1] : vector<1x256xf32> to vector<1xf32>
    %782 = vector.shape_cast %781 : vector<1xf32> to vector<1x1xf32>
    %783 = arith.addf %777, %782 : vector<1x1xf32>
    %cst_280 = arith.constant 0.001953125 : f32
    %784 = vector.broadcast %cst_280 : f32 to vector<1x1xf32>
    %785 = arith.mulf %783, %784 : vector<1x1xf32>
    %c1_281 = arith.constant 1 : index
    %786 = memref.load %arg10[%c1_281] : memref<8xf32, #tpu.memory_space<smem>>
    %cst_282 = arith.constant 9.99999974E-6 : f32
    %787 = vector.broadcast %cst_282 : f32 to vector<1x1xf32>
    %788 = arith.addf %785, %787 : vector<1x1xf32>
    %789 = math.rsqrt %788 : vector<1x1xf32>
    %790 = vector.broadcast %786 : f32 to vector<1x1xf32>
    %791 = arith.mulf %790, %789 : vector<1x1xf32>
    %c1_283 = arith.constant 1 : index
    %792 = memref.load %arg11[%c1_283] : memref<8xf32, #tpu.memory_space<smem>>
    %793 = arith.mulf %772, %791 : vector<1x1xf32>
    %794 = vector.broadcast %792 : f32 to vector<1x1xf32>
    %795 = arith.subf %794, %793 : vector<1x1xf32>
    %cst_284 = arith.constant dense<0.000000e+00> : vector<1xf32>
    %796 = vector.multi_reduction <add>, %540, %cst_284 [1] : vector<1x256xf32> to vector<1xf32>
    %797 = vector.shape_cast %796 : vector<1xf32> to vector<1x1xf32>
    %cst_285 = arith.constant dense<0.000000e+00> : vector<1xf32>
    %798 = vector.multi_reduction <add>, %660, %cst_285 [1] : vector<1x256xf32> to vector<1xf32>
    %799 = vector.shape_cast %798 : vector<1xf32> to vector<1x1xf32>
    %800 = arith.addf %797, %799 : vector<1x1xf32>
    %cst_286 = arith.constant 0.001953125 : f32
    %801 = vector.broadcast %cst_286 : f32 to vector<1x1xf32>
    %802 = arith.mulf %800, %801 : vector<1x1xf32>
    %803 = vector.broadcast %802 : vector<1x1xf32> to vector<1x256xf32>
    %804 = arith.subf %540, %803 : vector<1x256xf32>
    %805 = arith.mulf %804, %804 : vector<1x256xf32>
    %cst_287 = arith.constant dense<0.000000e+00> : vector<1xf32>
    %806 = vector.multi_reduction <add>, %805, %cst_287 [1] : vector<1x256xf32> to vector<1xf32>
    %807 = vector.shape_cast %806 : vector<1xf32> to vector<1x1xf32>
    %808 = vector.broadcast %802 : vector<1x1xf32> to vector<1x256xf32>
    %809 = arith.subf %660, %808 : vector<1x256xf32>
    %810 = arith.mulf %809, %809 : vector<1x256xf32>
    %cst_288 = arith.constant dense<0.000000e+00> : vector<1xf32>
    %811 = vector.multi_reduction <add>, %810, %cst_288 [1] : vector<1x256xf32> to vector<1xf32>
    %812 = vector.shape_cast %811 : vector<1xf32> to vector<1x1xf32>
    %813 = arith.addf %807, %812 : vector<1x1xf32>
    %cst_289 = arith.constant 0.001953125 : f32
    %814 = vector.broadcast %cst_289 : f32 to vector<1x1xf32>
    %815 = arith.mulf %813, %814 : vector<1x1xf32>
    %c2_290 = arith.constant 2 : index
    %816 = memref.load %arg10[%c2_290] : memref<8xf32, #tpu.memory_space<smem>>
    %cst_291 = arith.constant 9.99999974E-6 : f32
    %817 = vector.broadcast %cst_291 : f32 to vector<1x1xf32>
    %818 = arith.addf %815, %817 : vector<1x1xf32>
    %819 = math.rsqrt %818 : vector<1x1xf32>
    %820 = vector.broadcast %816 : f32 to vector<1x1xf32>
    %821 = arith.mulf %820, %819 : vector<1x1xf32>
    %c2_292 = arith.constant 2 : index
    %822 = memref.load %arg11[%c2_292] : memref<8xf32, #tpu.memory_space<smem>>
    %823 = arith.mulf %802, %821 : vector<1x1xf32>
    %824 = vector.broadcast %822 : f32 to vector<1x1xf32>
    %825 = arith.subf %824, %823 : vector<1x1xf32>
    %cst_293 = arith.constant dense<0.000000e+00> : vector<1xf32>
    %826 = vector.multi_reduction <add>, %555, %cst_293 [1] : vector<1x256xf32> to vector<1xf32>
    %827 = vector.shape_cast %826 : vector<1xf32> to vector<1x1xf32>
    %cst_294 = arith.constant dense<0.000000e+00> : vector<1xf32>
    %828 = vector.multi_reduction <add>, %675, %cst_294 [1] : vector<1x256xf32> to vector<1xf32>
    %829 = vector.shape_cast %828 : vector<1xf32> to vector<1x1xf32>
    %830 = arith.addf %827, %829 : vector<1x1xf32>
    %cst_295 = arith.constant 0.001953125 : f32
    %831 = vector.broadcast %cst_295 : f32 to vector<1x1xf32>
    %832 = arith.mulf %830, %831 : vector<1x1xf32>
    %833 = vector.broadcast %832 : vector<1x1xf32> to vector<1x256xf32>
    %834 = arith.subf %555, %833 : vector<1x256xf32>
    %835 = arith.mulf %834, %834 : vector<1x256xf32>
    %cst_296 = arith.constant dense<0.000000e+00> : vector<1xf32>
    %836 = vector.multi_reduction <add>, %835, %cst_296 [1] : vector<1x256xf32> to vector<1xf32>
    %837 = vector.shape_cast %836 : vector<1xf32> to vector<1x1xf32>
    %838 = vector.broadcast %832 : vector<1x1xf32> to vector<1x256xf32>
    %839 = arith.subf %675, %838 : vector<1x256xf32>
    %840 = arith.mulf %839, %839 : vector<1x256xf32>
    %cst_297 = arith.constant dense<0.000000e+00> : vector<1xf32>
    %841 = vector.multi_reduction <add>, %840, %cst_297 [1] : vector<1x256xf32> to vector<1xf32>
    %842 = vector.shape_cast %841 : vector<1xf32> to vector<1x1xf32>
    %843 = arith.addf %837, %842 : vector<1x1xf32>
    %cst_298 = arith.constant 0.001953125 : f32
    %844 = vector.broadcast %cst_298 : f32 to vector<1x1xf32>
    %845 = arith.mulf %843, %844 : vector<1x1xf32>
    %c3_299 = arith.constant 3 : index
    %846 = memref.load %arg10[%c3_299] : memref<8xf32, #tpu.memory_space<smem>>
    %cst_300 = arith.constant 9.99999974E-6 : f32
    %847 = vector.broadcast %cst_300 : f32 to vector<1x1xf32>
    %848 = arith.addf %845, %847 : vector<1x1xf32>
    %849 = math.rsqrt %848 : vector<1x1xf32>
    %850 = vector.broadcast %846 : f32 to vector<1x1xf32>
    %851 = arith.mulf %850, %849 : vector<1x1xf32>
    %c3_301 = arith.constant 3 : index
    %852 = memref.load %arg11[%c3_301] : memref<8xf32, #tpu.memory_space<smem>>
    %853 = arith.mulf %832, %851 : vector<1x1xf32>
    %854 = vector.broadcast %852 : f32 to vector<1x1xf32>
    %855 = arith.subf %854, %853 : vector<1x1xf32>
    %cst_302 = arith.constant dense<0.000000e+00> : vector<1xf32>
    %856 = vector.multi_reduction <add>, %570, %cst_302 [1] : vector<1x256xf32> to vector<1xf32>
    %857 = vector.shape_cast %856 : vector<1xf32> to vector<1x1xf32>
    %cst_303 = arith.constant dense<0.000000e+00> : vector<1xf32>
    %858 = vector.multi_reduction <add>, %690, %cst_303 [1] : vector<1x256xf32> to vector<1xf32>
    %859 = vector.shape_cast %858 : vector<1xf32> to vector<1x1xf32>
    %860 = arith.addf %857, %859 : vector<1x1xf32>
    %cst_304 = arith.constant 0.001953125 : f32
    %861 = vector.broadcast %cst_304 : f32 to vector<1x1xf32>
    %862 = arith.mulf %860, %861 : vector<1x1xf32>
    %863 = vector.broadcast %862 : vector<1x1xf32> to vector<1x256xf32>
    %864 = arith.subf %570, %863 : vector<1x256xf32>
    %865 = arith.mulf %864, %864 : vector<1x256xf32>
    %cst_305 = arith.constant dense<0.000000e+00> : vector<1xf32>
    %866 = vector.multi_reduction <add>, %865, %cst_305 [1] : vector<1x256xf32> to vector<1xf32>
    %867 = vector.shape_cast %866 : vector<1xf32> to vector<1x1xf32>
    %868 = vector.broadcast %862 : vector<1x1xf32> to vector<1x256xf32>
    %869 = arith.subf %690, %868 : vector<1x256xf32>
    %870 = arith.mulf %869, %869 : vector<1x256xf32>
    %cst_306 = arith.constant dense<0.000000e+00> : vector<1xf32>
    %871 = vector.multi_reduction <add>, %870, %cst_306 [1] : vector<1x256xf32> to vector<1xf32>
    %872 = vector.shape_cast %871 : vector<1xf32> to vector<1x1xf32>
    %873 = arith.addf %867, %872 : vector<1x1xf32>
    %cst_307 = arith.constant 0.001953125 : f32
    %874 = vector.broadcast %cst_307 : f32 to vector<1x1xf32>
    %875 = arith.mulf %873, %874 : vector<1x1xf32>
    %c4_308 = arith.constant 4 : index
    %876 = memref.load %arg10[%c4_308] : memref<8xf32, #tpu.memory_space<smem>>
    %cst_309 = arith.constant 9.99999974E-6 : f32
    %877 = vector.broadcast %cst_309 : f32 to vector<1x1xf32>
    %878 = arith.addf %875, %877 : vector<1x1xf32>
    %879 = math.rsqrt %878 : vector<1x1xf32>
    %880 = vector.broadcast %876 : f32 to vector<1x1xf32>
    %881 = arith.mulf %880, %879 : vector<1x1xf32>
    %c4_310 = arith.constant 4 : index
    %882 = memref.load %arg11[%c4_310] : memref<8xf32, #tpu.memory_space<smem>>
    %883 = arith.mulf %862, %881 : vector<1x1xf32>
    %884 = vector.broadcast %882 : f32 to vector<1x1xf32>
    %885 = arith.subf %884, %883 : vector<1x1xf32>
    %cst_311 = arith.constant dense<0.000000e+00> : vector<1xf32>
    %886 = vector.multi_reduction <add>, %585, %cst_311 [1] : vector<1x256xf32> to vector<1xf32>
    %887 = vector.shape_cast %886 : vector<1xf32> to vector<1x1xf32>
    %cst_312 = arith.constant dense<0.000000e+00> : vector<1xf32>
    %888 = vector.multi_reduction <add>, %705, %cst_312 [1] : vector<1x256xf32> to vector<1xf32>
    %889 = vector.shape_cast %888 : vector<1xf32> to vector<1x1xf32>
    %890 = arith.addf %887, %889 : vector<1x1xf32>
    %cst_313 = arith.constant 0.001953125 : f32
    %891 = vector.broadcast %cst_313 : f32 to vector<1x1xf32>
    %892 = arith.mulf %890, %891 : vector<1x1xf32>
    %893 = vector.broadcast %892 : vector<1x1xf32> to vector<1x256xf32>
    %894 = arith.subf %585, %893 : vector<1x256xf32>
    %895 = arith.mulf %894, %894 : vector<1x256xf32>
    %cst_314 = arith.constant dense<0.000000e+00> : vector<1xf32>
    %896 = vector.multi_reduction <add>, %895, %cst_314 [1] : vector<1x256xf32> to vector<1xf32>
    %897 = vector.shape_cast %896 : vector<1xf32> to vector<1x1xf32>
    %898 = vector.broadcast %892 : vector<1x1xf32> to vector<1x256xf32>
    %899 = arith.subf %705, %898 : vector<1x256xf32>
    %900 = arith.mulf %899, %899 : vector<1x256xf32>
    %cst_315 = arith.constant dense<0.000000e+00> : vector<1xf32>
    %901 = vector.multi_reduction <add>, %900, %cst_315 [1] : vector<1x256xf32> to vector<1xf32>
    %902 = vector.shape_cast %901 : vector<1xf32> to vector<1x1xf32>
    %903 = arith.addf %897, %902 : vector<1x1xf32>
    %cst_316 = arith.constant 0.001953125 : f32
    %904 = vector.broadcast %cst_316 : f32 to vector<1x1xf32>
    %905 = arith.mulf %903, %904 : vector<1x1xf32>
    %c5_317 = arith.constant 5 : index
    %906 = memref.load %arg10[%c5_317] : memref<8xf32, #tpu.memory_space<smem>>
    %cst_318 = arith.constant 9.99999974E-6 : f32
    %907 = vector.broadcast %cst_318 : f32 to vector<1x1xf32>
    %908 = arith.addf %905, %907 : vector<1x1xf32>
    %909 = math.rsqrt %908 : vector<1x1xf32>
    %910 = vector.broadcast %906 : f32 to vector<1x1xf32>
    %911 = arith.mulf %910, %909 : vector<1x1xf32>
    %c5_319 = arith.constant 5 : index
    %912 = memref.load %arg11[%c5_319] : memref<8xf32, #tpu.memory_space<smem>>
    %913 = arith.mulf %892, %911 : vector<1x1xf32>
    %914 = vector.broadcast %912 : f32 to vector<1x1xf32>
    %915 = arith.subf %914, %913 : vector<1x1xf32>
    %cst_320 = arith.constant dense<0.000000e+00> : vector<1xf32>
    %916 = vector.multi_reduction <add>, %600, %cst_320 [1] : vector<1x256xf32> to vector<1xf32>
    %917 = vector.shape_cast %916 : vector<1xf32> to vector<1x1xf32>
    %cst_321 = arith.constant dense<0.000000e+00> : vector<1xf32>
    %918 = vector.multi_reduction <add>, %720, %cst_321 [1] : vector<1x256xf32> to vector<1xf32>
    %919 = vector.shape_cast %918 : vector<1xf32> to vector<1x1xf32>
    %920 = arith.addf %917, %919 : vector<1x1xf32>
    %cst_322 = arith.constant 0.001953125 : f32
    %921 = vector.broadcast %cst_322 : f32 to vector<1x1xf32>
    %922 = arith.mulf %920, %921 : vector<1x1xf32>
    %923 = vector.broadcast %922 : vector<1x1xf32> to vector<1x256xf32>
    %924 = arith.subf %600, %923 : vector<1x256xf32>
    %925 = arith.mulf %924, %924 : vector<1x256xf32>
    %cst_323 = arith.constant dense<0.000000e+00> : vector<1xf32>
    %926 = vector.multi_reduction <add>, %925, %cst_323 [1] : vector<1x256xf32> to vector<1xf32>
    %927 = vector.shape_cast %926 : vector<1xf32> to vector<1x1xf32>
    %928 = vector.broadcast %922 : vector<1x1xf32> to vector<1x256xf32>
    %929 = arith.subf %720, %928 : vector<1x256xf32>
    %930 = arith.mulf %929, %929 : vector<1x256xf32>
    %cst_324 = arith.constant dense<0.000000e+00> : vector<1xf32>
    %931 = vector.multi_reduction <add>, %930, %cst_324 [1] : vector<1x256xf32> to vector<1xf32>
    %932 = vector.shape_cast %931 : vector<1xf32> to vector<1x1xf32>
    %933 = arith.addf %927, %932 : vector<1x1xf32>
    %cst_325 = arith.constant 0.001953125 : f32
    %934 = vector.broadcast %cst_325 : f32 to vector<1x1xf32>
    %935 = arith.mulf %933, %934 : vector<1x1xf32>
    %c6_326 = arith.constant 6 : index
    %936 = memref.load %arg10[%c6_326] : memref<8xf32, #tpu.memory_space<smem>>
    %cst_327 = arith.constant 9.99999974E-6 : f32
    %937 = vector.broadcast %cst_327 : f32 to vector<1x1xf32>
    %938 = arith.addf %935, %937 : vector<1x1xf32>
    %939 = math.rsqrt %938 : vector<1x1xf32>
    %940 = vector.broadcast %936 : f32 to vector<1x1xf32>
    %941 = arith.mulf %940, %939 : vector<1x1xf32>
    %c6_328 = arith.constant 6 : index
    %942 = memref.load %arg11[%c6_328] : memref<8xf32, #tpu.memory_space<smem>>
    %943 = arith.mulf %922, %941 : vector<1x1xf32>
    %944 = vector.broadcast %942 : f32 to vector<1x1xf32>
    %945 = arith.subf %944, %943 : vector<1x1xf32>
    %cst_329 = arith.constant dense<0.000000e+00> : vector<1xf32>
    %946 = vector.multi_reduction <add>, %615, %cst_329 [1] : vector<1x256xf32> to vector<1xf32>
    %947 = vector.shape_cast %946 : vector<1xf32> to vector<1x1xf32>
    %cst_330 = arith.constant dense<0.000000e+00> : vector<1xf32>
    %948 = vector.multi_reduction <add>, %735, %cst_330 [1] : vector<1x256xf32> to vector<1xf32>
    %949 = vector.shape_cast %948 : vector<1xf32> to vector<1x1xf32>
    %950 = arith.addf %947, %949 : vector<1x1xf32>
    %cst_331 = arith.constant 0.001953125 : f32
    %951 = vector.broadcast %cst_331 : f32 to vector<1x1xf32>
    %952 = arith.mulf %950, %951 : vector<1x1xf32>
    %953 = vector.broadcast %952 : vector<1x1xf32> to vector<1x256xf32>
    %954 = arith.subf %615, %953 : vector<1x256xf32>
    %955 = arith.mulf %954, %954 : vector<1x256xf32>
    %cst_332 = arith.constant dense<0.000000e+00> : vector<1xf32>
    %956 = vector.multi_reduction <add>, %955, %cst_332 [1] : vector<1x256xf32> to vector<1xf32>
    %957 = vector.shape_cast %956 : vector<1xf32> to vector<1x1xf32>
    %958 = vector.broadcast %952 : vector<1x1xf32> to vector<1x256xf32>
    %959 = arith.subf %735, %958 : vector<1x256xf32>
    %960 = arith.mulf %959, %959 : vector<1x256xf32>
    %cst_333 = arith.constant dense<0.000000e+00> : vector<1xf32>
    %961 = vector.multi_reduction <add>, %960, %cst_333 [1] : vector<1x256xf32> to vector<1xf32>
    %962 = vector.shape_cast %961 : vector<1xf32> to vector<1x1xf32>
    %963 = arith.addf %957, %962 : vector<1x1xf32>
    %cst_334 = arith.constant 0.001953125 : f32
    %964 = vector.broadcast %cst_334 : f32 to vector<1x1xf32>
    %965 = arith.mulf %963, %964 : vector<1x1xf32>
    %c7_335 = arith.constant 7 : index
    %966 = memref.load %arg10[%c7_335] : memref<8xf32, #tpu.memory_space<smem>>
    %cst_336 = arith.constant 9.99999974E-6 : f32
    %967 = vector.broadcast %cst_336 : f32 to vector<1x1xf32>
    %968 = arith.addf %965, %967 : vector<1x1xf32>
    %969 = math.rsqrt %968 : vector<1x1xf32>
    %970 = vector.broadcast %966 : f32 to vector<1x1xf32>
    %971 = arith.mulf %970, %969 : vector<1x1xf32>
    %c7_337 = arith.constant 7 : index
    %972 = memref.load %arg11[%c7_337] : memref<8xf32, #tpu.memory_space<smem>>
    %973 = arith.mulf %952, %971 : vector<1x1xf32>
    %974 = vector.broadcast %972 : f32 to vector<1x1xf32>
    %975 = arith.subf %974, %973 : vector<1x1xf32>
    %976 = vector.broadcast %761 : vector<1x1xf32> to vector<1x256xf32>
    %977 = arith.mulf %510, %976 : vector<1x256xf32>
    %978 = vector.broadcast %765 : vector<1x1xf32> to vector<1x256xf32>
    %979 = arith.addf %977, %978 : vector<1x256xf32>
    %c0_338 = arith.constant 0 : index
    %c0_339 = arith.constant 0 : index
    %980 = vector.load %arg12[%c0_338, %c0_339] : memref<16x256xf32, #tpu.memory_space<vmem>>, vector<1x256xf32>
    tpu.vector_store %arg12[%c0_338, %c0_339], %979 {strides = array<i32>} : memref<16x256xf32, #tpu.memory_space<vmem>>, vector<1x256xf32>,
    %981 = vector.broadcast %791 : vector<1x1xf32> to vector<1x256xf32>
    %982 = arith.mulf %525, %981 : vector<1x256xf32>
    %983 = vector.broadcast %795 : vector<1x1xf32> to vector<1x256xf32>
    %984 = arith.addf %982, %983 : vector<1x256xf32>
    %c1_340 = arith.constant 1 : index
    %c0_341 = arith.constant 0 : index
    %985 = vector.load %arg12[%c1_340, %c0_341] : memref<16x256xf32, #tpu.memory_space<vmem>>, vector<1x256xf32>
    tpu.vector_store %arg12[%c1_340, %c0_341], %984 {strides = array<i32>} : memref<16x256xf32, #tpu.memory_space<vmem>>, vector<1x256xf32>,
    %986 = vector.broadcast %821 : vector<1x1xf32> to vector<1x256xf32>
    %987 = arith.mulf %540, %986 : vector<1x256xf32>
    %988 = vector.broadcast %825 : vector<1x1xf32> to vector<1x256xf32>
    %989 = arith.addf %987, %988 : vector<1x256xf32>
    %c2_342 = arith.constant 2 : index
    %c0_343 = arith.constant 0 : index
    %990 = vector.load %arg12[%c2_342, %c0_343] : memref<16x256xf32, #tpu.memory_space<vmem>>, vector<1x256xf32>
    tpu.vector_store %arg12[%c2_342, %c0_343], %989 {strides = array<i32>} : memref<16x256xf32, #tpu.memory_space<vmem>>, vector<1x256xf32>,
    %991 = vector.broadcast %851 : vector<1x1xf32> to vector<1x256xf32>
    %992 = arith.mulf %555, %991 : vector<1x256xf32>
    %993 = vector.broadcast %855 : vector<1x1xf32> to vector<1x256xf32>
    %994 = arith.addf %992, %993 : vector<1x256xf32>
    %c3_344 = arith.constant 3 : index
    %c0_345 = arith.constant 0 : index
    %995 = vector.load %arg12[%c3_344, %c0_345] : memref<16x256xf32, #tpu.memory_space<vmem>>, vector<1x256xf32>
    tpu.vector_store %arg12[%c3_344, %c0_345], %994 {strides = array<i32>} : memref<16x256xf32, #tpu.memory_space<vmem>>, vector<1x256xf32>,
    %996 = vector.broadcast %881 : vector<1x1xf32> to vector<1x256xf32>
    %997 = arith.mulf %570, %996 : vector<1x256xf32>
    %998 = vector.broadcast %885 : vector<1x1xf32> to vector<1x256xf32>
    %999 = arith.addf %997, %998 : vector<1x256xf32>
    %c4_346 = arith.constant 4 : index
    %c0_347 = arith.constant 0 : index
    %1000 = vector.load %arg12[%c4_346, %c0_347] : memref<16x256xf32, #tpu.memory_space<vmem>>, vector<1x256xf32>
    tpu.vector_store %arg12[%c4_346, %c0_347], %999 {strides = array<i32>} : memref<16x256xf32, #tpu.memory_space<vmem>>, vector<1x256xf32>,
    %1001 = vector.broadcast %911 : vector<1x1xf32> to vector<1x256xf32>
    %1002 = arith.mulf %585, %1001 : vector<1x256xf32>
    %1003 = vector.broadcast %915 : vector<1x1xf32> to vector<1x256xf32>
    %1004 = arith.addf %1002, %1003 : vector<1x256xf32>
    %c5_348 = arith.constant 5 : index
    %c0_349 = arith.constant 0 : index
    %1005 = vector.load %arg12[%c5_348, %c0_349] : memref<16x256xf32, #tpu.memory_space<vmem>>, vector<1x256xf32>
    tpu.vector_store %arg12[%c5_348, %c0_349], %1004 {strides = array<i32>} : memref<16x256xf32, #tpu.memory_space<vmem>>, vector<1x256xf32>,
    %1006 = vector.broadcast %941 : vector<1x1xf32> to vector<1x256xf32>
    %1007 = arith.mulf %600, %1006 : vector<1x256xf32>
    %1008 = vector.broadcast %945 : vector<1x1xf32> to vector<1x256xf32>
    %1009 = arith.addf %1007, %1008 : vector<1x256xf32>
    %c6_350 = arith.constant 6 : index
    %c0_351 = arith.constant 0 : index
    %1010 = vector.load %arg12[%c6_350, %c0_351] : memref<16x256xf32, #tpu.memory_space<vmem>>, vector<1x256xf32>
    tpu.vector_store %arg12[%c6_350, %c0_351], %1009 {strides = array<i32>} : memref<16x256xf32, #tpu.memory_space<vmem>>, vector<1x256xf32>,
    %1011 = vector.broadcast %971 : vector<1x1xf32> to vector<1x256xf32>
    %1012 = arith.mulf %615, %1011 : vector<1x256xf32>
    %1013 = vector.broadcast %975 : vector<1x1xf32> to vector<1x256xf32>
    %1014 = arith.addf %1012, %1013 : vector<1x256xf32>
    %c7_352 = arith.constant 7 : index
    %c0_353 = arith.constant 0 : index
    %1015 = vector.load %arg12[%c7_352, %c0_353] : memref<16x256xf32, #tpu.memory_space<vmem>>, vector<1x256xf32>
    tpu.vector_store %arg12[%c7_352, %c0_353], %1014 {strides = array<i32>} : memref<16x256xf32, #tpu.memory_space<vmem>>, vector<1x256xf32>,
    %1016 = vector.broadcast %761 : vector<1x1xf32> to vector<1x256xf32>
    %1017 = arith.mulf %630, %1016 : vector<1x256xf32>
    %1018 = vector.broadcast %765 : vector<1x1xf32> to vector<1x256xf32>
    %1019 = arith.addf %1017, %1018 : vector<1x256xf32>
    %c8_354 = arith.constant 8 : index
    %c0_355 = arith.constant 0 : index
    %1020 = vector.load %arg12[%c8_354, %c0_355] : memref<16x256xf32, #tpu.memory_space<vmem>>, vector<1x256xf32>
    tpu.vector_store %arg12[%c8_354, %c0_355], %1019 {strides = array<i32>} : memref<16x256xf32, #tpu.memory_space<vmem>>, vector<1x256xf32>,
    %1021 = vector.broadcast %791 : vector<1x1xf32> to vector<1x256xf32>
    %1022 = arith.mulf %645, %1021 : vector<1x256xf32>
    %1023 = vector.broadcast %795 : vector<1x1xf32> to vector<1x256xf32>
    %1024 = arith.addf %1022, %1023 : vector<1x256xf32>
    %c9_356 = arith.constant 9 : index
    %c0_357 = arith.constant 0 : index
    %1025 = vector.load %arg12[%c9_356, %c0_357] : memref<16x256xf32, #tpu.memory_space<vmem>>, vector<1x256xf32>
    tpu.vector_store %arg12[%c9_356, %c0_357], %1024 {strides = array<i32>} : memref<16x256xf32, #tpu.memory_space<vmem>>, vector<1x256xf32>,
    %1026 = vector.broadcast %821 : vector<1x1xf32> to vector<1x256xf32>
    %1027 = arith.mulf %660, %1026 : vector<1x256xf32>
    %1028 = vector.broadcast %825 : vector<1x1xf32> to vector<1x256xf32>
    %1029 = arith.addf %1027, %1028 : vector<1x256xf32>
    %c10_358 = arith.constant 10 : index
    %c0_359 = arith.constant 0 : index
    %1030 = vector.load %arg12[%c10_358, %c0_359] : memref<16x256xf32, #tpu.memory_space<vmem>>, vector<1x256xf32>
    tpu.vector_store %arg12[%c10_358, %c0_359], %1029 {strides = array<i32>} : memref<16x256xf32, #tpu.memory_space<vmem>>, vector<1x256xf32>,
    %1031 = vector.broadcast %851 : vector<1x1xf32> to vector<1x256xf32>
    %1032 = arith.mulf %675, %1031 : vector<1x256xf32>
    %1033 = vector.broadcast %855 : vector<1x1xf32> to vector<1x256xf32>
    %1034 = arith.addf %1032, %1033 : vector<1x256xf32>
    %c11_360 = arith.constant 11 : index
    %c0_361 = arith.constant 0 : index
    %1035 = vector.load %arg12[%c11_360, %c0_361] : memref<16x256xf32, #tpu.memory_space<vmem>>, vector<1x256xf32>
    tpu.vector_store %arg12[%c11_360, %c0_361], %1034 {strides = array<i32>} : memref<16x256xf32, #tpu.memory_space<vmem>>, vector<1x256xf32>,
    %1036 = vector.broadcast %881 : vector<1x1xf32> to vector<1x256xf32>
    %1037 = arith.mulf %690, %1036 : vector<1x256xf32>
    %1038 = vector.broadcast %885 : vector<1x1xf32> to vector<1x256xf32>
    %1039 = arith.addf %1037, %1038 : vector<1x256xf32>
    %c12_362 = arith.constant 12 : index
    %c0_363 = arith.constant 0 : index
    %1040 = vector.load %arg12[%c12_362, %c0_363] : memref<16x256xf32, #tpu.memory_space<vmem>>, vector<1x256xf32>
    tpu.vector_store %arg12[%c12_362, %c0_363], %1039 {strides = array<i32>} : memref<16x256xf32, #tpu.memory_space<vmem>>, vector<1x256xf32>,
    %1041 = vector.broadcast %911 : vector<1x1xf32> to vector<1x256xf32>
    %1042 = arith.mulf %705, %1041 : vector<1x256xf32>
    %1043 = vector.broadcast %915 : vector<1x1xf32> to vector<1x256xf32>
    %1044 = arith.addf %1042, %1043 : vector<1x256xf32>
    %c13_364 = arith.constant 13 : index
    %c0_365 = arith.constant 0 : index
    %1045 = vector.load %arg12[%c13_364, %c0_365] : memref<16x256xf32, #tpu.memory_space<vmem>>, vector<1x256xf32>
    tpu.vector_store %arg12[%c13_364, %c0_365], %1044 {strides = array<i32>} : memref<16x256xf32, #tpu.memory_space<vmem>>, vector<1x256xf32>,
    %1046 = vector.broadcast %941 : vector<1x1xf32> to vector<1x256xf32>
    %1047 = arith.mulf %720, %1046 : vector<1x256xf32>
    %1048 = vector.broadcast %945 : vector<1x1xf32> to vector<1x256xf32>
    %1049 = arith.addf %1047, %1048 : vector<1x256xf32>
    %c14_366 = arith.constant 14 : index
    %c0_367 = arith.constant 0 : index
    %1050 = vector.load %arg12[%c14_366, %c0_367] : memref<16x256xf32, #tpu.memory_space<vmem>>, vector<1x256xf32>
    tpu.vector_store %arg12[%c14_366, %c0_367], %1049 {strides = array<i32>} : memref<16x256xf32, #tpu.memory_space<vmem>>, vector<1x256xf32>,
    %1051 = vector.broadcast %971 : vector<1x1xf32> to vector<1x256xf32>
    %1052 = arith.mulf %735, %1051 : vector<1x256xf32>
    %1053 = vector.broadcast %975 : vector<1x1xf32> to vector<1x256xf32>
    %1054 = arith.addf %1052, %1053 : vector<1x256xf32>
    %c15_368 = arith.constant 15 : index
    %c0_369 = arith.constant 0 : index
    %1055 = vector.load %arg12[%c15_368, %c0_369] : memref<16x256xf32, #tpu.memory_space<vmem>>, vector<1x256xf32>
    tpu.vector_store %arg12[%c15_368, %c0_369], %1054 {strides = array<i32>} : memref<16x256xf32, #tpu.memory_space<vmem>>, vector<1x256xf32>,
    return
  }
  func.func @transform_0(%arg0: i32) -> (i32, i32) {
    %c0_i32 = arith.constant 0 : i32
    %c0_i32_0 = arith.constant 0 : i32
    %c0_i32_1 = arith.constant 0 : i32
    return %c0_i32, %c0_i32_0 : i32, i32
  }
  func.func @transform_1(%arg0: i32) -> (i32, i32, i32) {
    %c0_i32 = arith.constant 0 : i32
    %c0_i32_0 = arith.constant 0 : i32
    %c0_i32_1 = arith.constant 0 : i32
    %c0_i32_2 = arith.constant 0 : i32
    return %c0_i32, %c0_i32_0, %c0_i32_1 : i32, i32, i32
  }
  func.func @transform_2(%arg0: i32) -> (i32, i32, i32) {
    %c0_i32 = arith.constant 0 : i32
    %c0_i32_0 = arith.constant 0 : i32
    %c0_i32_1 = arith.constant 0 : i32
    %c0_i32_2 = arith.constant 0 : i32
    return %c0_i32, %c0_i32_0, %c0_i32_1 : i32, i32, i32
  }
  func.func @transform_3(%arg0: i32) -> (i32, i32, i32) {
    %c0_i32 = arith.constant 0 : i32
    %c0_i32_0 = arith.constant 0 : i32
    %c0_i32_1 = arith.constant 0 : i32
    %c0_i32_2 = arith.constant 0 : i32
    return %c0_i32, %c0_i32_0, %c0_i32_1 : i32, i32, i32
  }
  func.func @transform_4(%arg0: i32) -> (i32, i32, i32) {
    %c0_i32 = arith.constant 0 : i32
    %c0_i32_0 = arith.constant 0 : i32
    %c0_i32_1 = arith.constant 0 : i32
    %c0_i32_2 = arith.constant 0 : i32
    return %c0_i32, %c0_i32_0, %c0_i32_1 : i32, i32, i32
  }
  func.func @transform_5(%arg0: i32) -> i32 {
    %c0_i32 = arith.constant 0 : i32
    %c0_i32_0 = arith.constant 0 : i32
    return %c0_i32 : i32
  }
  func.func @transform_6(%arg0: i32) -> i32 {
    %c0_i32 = arith.constant 0 : i32
    %c0_i32_0 = arith.constant 0 : i32
    return %c0_i32 : i32
  }
  func.func @transform_7(%arg0: i32) -> i32 {
    %c0_i32 = arith.constant 0 : i32
    %c0_i32_0 = arith.constant 0 : i32
    return %c0_i32 : i32
  }
  func.func @transform_8(%arg0: i32) -> i32 {
    %c0_i32 = arith.constant 0 : i32
    %c0_i32_0 = arith.constant 0 : i32
    return %c0_i32 : i32
  }
  func.func @transform_9(%arg0: i32) -> i32 {
    %c0_i32 = arith.constant 0 : i32
    %c0_i32_0 = arith.constant 0 : i32
    return %c0_i32 : i32
  }
  func.func @transform_10(%arg0: i32) -> i32 {
    %c0_i32 = arith.constant 0 : i32
    %c0_i32_0 = arith.constant 0 : i32
    return %c0_i32 : i32
  }
  func.func @transform_11(%arg0: i32) -> (i32, i32) {
    %c0_i32 = arith.constant 0 : i32
    %c0_i32_0 = arith.constant 0 : i32
    %c0_i32_1 = arith.constant 0 : i32
    return %c0_i32, %c0_i32_0 : i32, i32
  }
}

</mosaic_0001>

<bundles_post_ra>
// kernel: tpu_custom_call.1
= control target key start
LH: loop header
LB: loop body
LE: loop exit
PB: predicated region body
PF: predicated region fallthrough
CT: control target
= control target key end

     0   :  { %16 = vsyncpa [#allocation5], 0  ;;  %s5680_s0 = inlined_call_operand.vmem [shape: f32[8,256], index: 0, kind: input, shape index: {}]   ;;  %s5681_s1 = inlined_call_operand.vmem [shape: f32[9,8,1], index: 1, kind: input, shape index: {}]   ;;  %s5682_s2 = inlined_call_operand.vmem [shape: f32[9,8,1], index: 2, kind: input, shape index: {}]   ;;  %s5683_s3 = inlined_call_operand.vmem [shape: f32[9,1,256], index: 3, kind: input, shape index: {}]   ;;  %s5684_s4 = inlined_call_operand.vmem [shape: f32[9,1,256], index: 4, kind: input, shape index: {}]   ;;  %s5685_s5 = inlined_call_operand.vmem [shape: f32[16], index: 5, kind: input, shape index: {}]   ;;  %s5686_s6 = inlined_call_operand.vmem [shape: f32[4], index: 6, kind: input, shape index: {}]   ;;  %s5687_s7 = inlined_call_operand.vmem [shape: f32[4], index: 7, kind: input, shape index: {}]   ;;  %s5688_s8 = inlined_call_operand.vmem [shape: f32[32], index: 8, kind: input, shape index: {}]   ;;  %s5689_s9 = inlined_call_operand.vmem [shape: f32[8], index: 9, kind: input, shape index: {}]   ;;  %s5690_s10 = inlined_call_operand.vmem [shape: f32[8], index: 10, kind: input, shape index: {}]   ;;  %s5691_s11 = inlined_call_operand.hbm [shape: f32[16,256], index: 11, kind: output, shape index: {}]  }
   0x1   :  { %17 = vsyncpa [#allocation7], 0 }
   0x2   :  { %18 = vsyncpa [#allocation10], 0 }
   0x3   :  { %19 = vsyncpa [#allocation13], 0  ;;  %s45_s19 = sshll.u32 %s5686_s6, 4  ;;  %s46_s19 = int_to_ptr.vmem [resolvable:$true] %s45_s19 }
   0x4   :  { %20 = vsyncpa [#allocation4], 0  ;;  %s63_s22 = sshll.u32 %s5688_s8, 4  ;;  %s3792_s23 = smov [#allocation6]   ;;  %s64_s22 = int_to_ptr.vmem [resolvable:$true] %s63_s22 }
   0x5   :  { %48 = dma.vmem_to_smem %s46_s19, 16, %s3792_s23, [#allocation7]  }
   0x6   :  { %s3793_s24 = smov [#allocation9]   ;;  %s36_s27 = sshll.u32 %s5685_s5, 4  ;;  %s37_s27 = int_to_ptr.vmem [resolvable:$true] %s36_s27 }
   0x7   :  { %66 = dma.vmem_to_smem %s64_s22, 16, %s3793_s24, [#allocation10]  }
   0x8   :  { %s54_s6 = sshll.u32 %s5687_s7, 4  ;;  %s3794_s30 = smov [#allocation3]   ;;  %s55_s6 = int_to_ptr.vmem [resolvable:$true] %s54_s6 }
   0x9   :  { %39 = dma.vmem_to_smem %s37_s27, 16, %s3794_s30, [#allocation5]  }
   0xa   :  { %s3795_s12 = smov [#allocation8]   ;;  %s72_s14 = sshll.u32 %s5689_s9, 4  ;;  %s73_s14 = int_to_ptr.vmem [resolvable:$true] %s72_s14 }
   0xb   :  { %57 = dma.vmem_to_smem %s55_s6, 16, %s3795_s12, [#allocation7]  }
   0xc   :  { %s81_s17 = sshll.u32 %s5690_s10, 4  ;;  %s3796_s5 = smov [#allocation11]   ;;  %s82_s17 = int_to_ptr.vmem [resolvable:$true] %s81_s17 }
   0xd   :  { %75 = dma.vmem_to_smem %s73_s14, 16, %s3796_s5, [#allocation10]  }
   0xe   :  { %s3797_s18 = smov [#allocation12]  }
   0xf   :  { %84 = dma.vmem_to_smem %s82_s17, 16, %s3797_s18, [#allocation13]  }
  0x10   :  { %3782 = dma.done.wait [#allocation5], 16  }
  0x11   :  { %3783 = vsyncadd [#allocation5], 4294967280 }
  0x12   :  { %3784 = dma.done.wait [#allocation7], 32  }
  0x13   :  { %3785 = vsyncadd [#allocation7], 4294967264 }
  0x14   :  { %3786 = dma.done.wait [#allocation10], 32  }
  0x15   :  { %3787 = vsyncadd [#allocation10], 4294967264 }
  0x16   :  { %3788 = dma.done.wait [#allocation13], 16  }
  0x17   :  { %3789 = vsyncadd [#allocation13], 4294967280 }
  0x18   :  { %109 = sfence }
  0x19   :  { %v123_v0 = vld [vmem:[%s5681_s1] sm:$0xff]  ;;  %v3798_v2 = vmov 0   ;;  %s3799_s22 = smov 111   ;;  %s3800_s23 = smov 112   ;;  %v3537_v7 = vld [vmem:[%s5681_s1 + $0x8] sm:$0xff]  ;;  %v3539_v10 = vld [vmem:[%s5681_s1 + $0x10] sm:$0xff] }
  0x1a   :  { %v132_v1 = vld [vmem:[%s5683_s3] sm:$0x3]  ;;  %3658 = vset.pattern.permute.xlu0 %v3798_v2  ;;  %3659 = vset.pattern.permute.xlu1 %v3798_v2  ;;  %v3538_v4 = vld [vmem:[%s5683_s3 + $0x2] sm:$0x3]  ;;  %v3540_v9 = vld [vmem:[%s5683_s3 + $0x4] sm:$0x3] }
  0x1b   :  { %v135_v3 = vperm.slane %v132_v1, 1  ;;  %126 = vperm.xlu0 %3658, %v123_v0   ;;  %3660 = vset.pattern.permute.xlu2 %v3798_v2  ;;  %v161_v5 = vperm.slane %v3538_v4, 0  ;;  %v134_v6 = vperm.slane %v132_v1, 0  ;;  %v162_v8 = vperm.slane %v3538_v4, 1  ;;  %s3801_s6 = smov 113   ;;  %v3541_v14 = vld [vmem:[%s5681_s1 + $0x18] sm:$0xff] }
  0x1c   :  { %v206_v11 = vperm.slane %v3540_v9, 0  ;;  %v207_v12 = vperm.slane %v3540_v9, 1  ;;  %v3542_v13 = vld [vmem:[%s5683_s3 + $0x6] sm:$0x3]  ;;  %s3802_s14 = smov 127   ;;  %s3803_s18 = smov 1  }
  0x1d   :  { %138 = vrot.lane.b32.xlu1 %v135_v3, %s3799_s22  ;;  %163 = vrot.lane.b32.xlu2 %v161_v5, %s3800_s23  ;;  %v251_v15 = vperm.slane %v3542_v13, 0  ;;  %v252_v16 = vperm.slane %v3542_v13, 1  ;;  %v3546_v17 = vld [vmem:[%s5683_s3 + $0xa] sm:$0x3]  ;;  %v3543_v18 = vld [vmem:[%s5681_s1 + $0x20] sm:$0xff]  ;;  %s3804_s20 = smov 15  }
  0x1e   :  { %v328_v19 = vperm.slane %v3546_v17, 0  ;;  %v329_v20 = vperm.slane %v3546_v17, 1  ;;  %v3548_v21 = vld [vmem:[%s5683_s3 + $0xc] sm:$0x3]  ;;  %v3550_v25 = vld [vmem:[%s5683_s3 + $0xe] sm:$0x3] }
  0x1f   :  { %v3545_v22 = vld [vmem:[%s5681_s1 + $0x28] sm:$0xff]  ;;  %v373_v23 = vperm.slane %v3548_v21, 0  ;;  %v374_v24 = vperm.slane %v3548_v21, 1  ;;  %v3547_v26 = vld [vmem:[%s5681_s1 + $0x30] sm:$0xff]  ;;  %v418_v27 = vperm.slane %v3550_v25, 0  ;;  %v419_v28 = vperm.slane %v3550_v25, 1 }
  0x20   :  { %s3805_s27 = smov 16   ;;  %v3552_v29 = vld [vmem:[%s5683_s3 + $0x10] sm:$0x3]  ;;  %v3549_v30 = vld [vmem:[%s5681_s1 + $0x38] sm:$0xff]  ;;  %s3806_s8 = smov 17   ;;  %v3551_v33 = vld [vmem:[%s5681_s1 + $0x40] sm:$0xff] }
  0x21   :  { %v463_v31 = vperm.slane %v3552_v29, 0  ;;  %v464_v32 = vperm.slane %v3552_v29, 1  ;;  %v114_v34 = vld [vmem:[%s5680_s0] sm:$0xff]  ;;  %v115_v35 = vld [vmem:[%s5680_s0 + $0x8] sm:$0xff]  ;;  %v3807_v37 = vmov 0.0   ;;  %vm167_vm0 = vcmask 916480  }
  0x22   :  { %v3966_v36 = vmax.f32 %v114_v34, 0.0  ;;  %110 = vst [vmem:[#allocation2] sm:$0xff] %v3807_v37  ;;  %v3969_v38 = vmax.f32 %v115_v35, 0.0  ;;  %vm212_vm1 = vcmask 924672   ;;  %s3808_s0 = smov 126   ;;  %vm184_vm2 = vcmask 1039360  }
  0x23   :  { %136 = vrot.lane.b32.xlu0 %v134_v6, %s3799_s22  ;;  %vm334_vm3 = vcmask 7168   ;;  %vm379_vm4 = vcmask 121856   ;;  %s3810_s19 = smov 96   ;;  %vm424_vm5 = vcmask 130048   ;;  %s3811_s10 = smov 95   ;;  %vm469_vm6 = vcmask 138240  }
  0x24   :  { %118 = vst [vmem:[#allocation2 + $0x8] sm:$0xff] %v3966_v36  ;;  %s3812_s21 = smov 94   ;;  %vm140_vm7 = vcmask 908288   ;;  %vm229_vm8 = vcmask 1031168   ;;  %vm5698_vm9 = vcmask 900096   ;;  %s4102_s30 = sld [smem:[#allocation3]] }
  0x25   :  { %152 = vperm.xlu1 %3659, %v3537_v7   ;;  %165 = vrot.lane.b32.xlu2 %v162_v8, %s3800_s23  ;;  %119 = vst [vmem:[#allocation2 + $0x10] sm:$0xff] %v3969_v38  ;;  %v3544_v8 = vld [vmem:[%s5683_s3 + $0x8] sm:$0x3]  ;;  %s3809_s3 = smov 110   ;;  %vm5697_vm10 = vcmask 785408   ;;  %s4104_s12 = sld [smem:[#allocation3 + $0x4]] }
  0x26   :  { %v294_v9 = vperm.slane %v3544_v8, 1  ;;  %vm5695_vm11 = vcmask 777216   ;;  %s4108_s13 = sld [smem:[#allocation3 + $0x8]]  ;;  %vm5694_vm12 = vcmask 769024   ;;  %vm5693_vm13 = vcmask 1044484  }
  0x27   :  { %s4112_s15 = sld [smem:[#allocation3 + $0xc]]  ;;  %vm732_vm14 = vcmask 1040384  }
  0x28   :  { %s4114_s16 = sld [smem:[#allocation3 + $0x5]] }
  0x29   :  { %s4118_s17 = sld [smem:[#allocation3 + $0x6]] }
  0x2a   :  { %s3558_s5 = sld [smem:[#allocation3 + $0x9]] }
  0x2b   :  { %197 = vperm.xlu0 %3658, %v3539_v10   ;;  %v293_v10 = vperm.slane %v3544_v8, 0  ;;  %s3556_s7 = sld [smem:[#allocation3 + $0x1]] }
  0x2c   :  { %s3559_s1 = sld [smem:[#allocation3 + $0xd]] }
  0x2d   :  { %208 = vrot.lane.b32.xlu1 %v206_v11, %s3801_s6  ;;  %210 = vrot.lane.b32.xlu2 %v207_v12, %s3801_s6  ;;  %s3560_s9 = sld [smem:[#allocation3 + $0x2]] }
  0x2e   :  { %s3562_s24 = sld [smem:[#allocation3 + $0xa]] }
  0x2f   :  { %s3568_s25 = sld [smem:[#allocation6 + $0x1]] }
  0x30   :  { %s3570_s26 = sld [smem:[#allocation6 + $0x2]] }
  0x31   :  { %s3572_s28 = sld [smem:[#allocation6 + $0x3]] }
  0x32   :  { %s3573_s29 = sld [smem:[#allocation8 + $0x3]] }
  0x33   :  { %242 = vperm.xlu0 %3658, %v3541_v14  }
  0x35   :  { %253 = vrot.lane.b32.xlu1 %v251_v15, %s3802_s14  ;;  %255 = vrot.lane.b32.xlu2 %v252_v16, %s3802_s14 }
  0x3b   :  { %285 = vperm.xlu0 %3658, %v3543_v18  }
  0x3d   :  { %330 = vrot.lane.b32.xlu1 %v328_v19, %s3803_s18  ;;  %332 = vrot.lane.b32.xlu2 %v329_v20, %s3803_s18 }
  0x43   :  { %319 = vperm.xlu0 %3658, %v3545_v22  }
  0x45   :  { %375 = vrot.lane.b32.xlu1 %v373_v23, %s3804_s20  ;;  %377 = vrot.lane.b32.xlu2 %v374_v24, %s3804_s20 }
  0x4b   :  { %364 = vperm.xlu0 %3658, %v3547_v26  }
  0x4d   :  { %420 = vrot.lane.b32.xlu1 %v418_v27, %s3805_s27  ;;  %422 = vrot.lane.b32.xlu2 %v419_v28, %s3805_s27 }
  0x53   :  { %409 = vperm.xlu0 %3658, %v3549_v30  }
  0x55   :  { %465 = vrot.lane.b32.xlu1 %v463_v31, %s3806_s8  ;;  %467 = vrot.lane.b32.xlu2 %v464_v32, %s3806_s8 }
  0x5b   :  { %454 = vperm.xlu0 %3658, %v3551_v33  }
  0x77   :  { %v164_v39 = vpop.permute.xlu2 %163 }
  0x7f   :  { %v166_v42 = vpop.permute.xlu2 %165 }
  0x80   :  { %v168_v48 = vsel %vm167_vm0, %v164_v39, %v166_v42 }
  0x87   :  { %v211_v52 = vpop.permute.xlu2 %210 }
  0x8d   :  { %v3972_v40 = vpop.permute.xlu0 %126 }
  0x8f   :  { %v3974_v41 = vpop.permute.xlu1 %138  ;;  %v256_v62 = vpop.permute.xlu2 %255 }
  0x95   :  { %v3976_v43 = vpop.permute.xlu0 %136 }
  0x97   :  { %v153_v44 = vpop.permute.xlu1 %152  ;;  %v333_v11 = vpop.permute.xlu2 %332 }
  0x98   :  { %v155_v45 = vmul.f32 0.0, %v153_v44  ;;  %v156_v46 = vmul.f32 %v153_v44, %v3966_v36  ;;  %v157_v47 = vmul.f32 %v153_v44, %v3969_v38 }
  0x9a   :  { %v174_v49 = vmul.f32 %v166_v42, %v157_v47  ;;  %v173_v50 = vmul.f32 %v168_v48, %v156_v46  ;;  %v172_v51 = vmul.f32 %v164_v39, %v155_v45 }
  0x9c   :  { %182 = vrot.lane.b32.xlu2 %v174_v49, %s3802_s14  ;;  %180 = vrot.lane.b32.xlu1 %v173_v50, %s3802_s14 }
  0x9d   :  { %178 = vrot.lane.b32.xlu0 %v172_v51, %s3802_s14  ;;  %v198_v53 = vpop.permute.xlu0 %197 }
  0x9e   :  { %v201_v54 = vmul.f32 %v198_v53, %v3966_v36  ;;  %v202_v55 = vmul.f32 %v198_v53, %v3969_v38  ;;  %v200_v57 = vmul.f32 0.0, %v198_v53 }
  0x9f   :  { %v209_v56 = vpop.permute.xlu1 %208  ;;  %v378_v23 = vpop.permute.xlu2 %377 }
  0xa0   :  { %v213_v58 = vsel %vm212_vm1, %v209_v56, %v211_v52  ;;  %v219_v59 = vmul.f32 %v211_v52, %v202_v55  ;;  %v217_v60 = vmul.f32 %v209_v56, %v200_v57 }
  0xa1   :  { %v218_v61 = vmul.f32 %v213_v58, %v201_v54 }
  0xa4   :  { %227 = vrot.lane.b32.xlu2 %v219_v59, %s3808_s0  ;;  %225 = vrot.lane.b32.xlu1 %v218_v61, %s3808_s0  ;;  %v1414_v61 = vld [vmem:[%s5684_s4] sm:$0x3] }
  0xa5   :  { %223 = vrot.lane.b32.xlu0 %v217_v60, %s3808_s0  ;;  %v243_v63 = vpop.permute.xlu0 %242 }
  0xa6   :  { %v246_v0 = vmul.f32 %v243_v63, %v3966_v36  ;;  %v247_v1 = vmul.f32 %v243_v63, %v3969_v38  ;;  %v245_v3 = vmul.f32 0.0, %v243_v63  ;;  %v1416_v63 = vperm.slane %v1414_v61, 0 }
  0xa7   :  { %v254_v2 = vpop.permute.xlu1 %253  ;;  %v423_v37 = vpop.permute.xlu2 %422 }
  0xa8   :  { %v257_v4 = vsel %vm184_vm2, %v254_v2, %v256_v62  ;;  %v263_v5 = vmul.f32 %v256_v62, %v247_v1  ;;  %v261_v6 = vmul.f32 %v254_v2, %v245_v3  ;;  %v1417_v62 = vperm.slane %v1414_v61, 1  ;;  %v3575_v1 = vld [vmem:[%s5684_s4 + $0x2] sm:$0x3] }
  0xa9   :  { %v262_v7 = vmul.f32 %v257_v4, %v246_v0  ;;  %v1405_v0 = vld [vmem:[%s5682_s2] sm:$0xff]  ;;  %v1443_v2 = vperm.slane %v3575_v1, 1  ;;  %v1442_v3 = vperm.slane %v3575_v1, 0  ;;  %v3574_v4 = vld [vmem:[%s5682_s2 + $0x8] sm:$0xff] }
  0xac   :  { %271 = vrot.lane.b32.xlu2 %v263_v5, %s3800_s23  ;;  %269 = vrot.lane.b32.xlu1 %v262_v7, %s3800_s23 }
  0xad   :  { %267 = vrot.lane.b32.xlu0 %v261_v6, %s3800_s23  ;;  %v286_v12 = vpop.permute.xlu0 %285  ;;  %v4046_v6 = vld [vmem:[%s5684_s4 + $0x4] sm:$0x3] }
  0xae   :  { %v288_v13 = vmul.f32 %v286_v12, %v3966_v36  ;;  %v289_v14 = vmul.f32 %v286_v12, %v3969_v38  ;;  %v1485_v7 = vperm.slane %v4046_v6, 0  ;;  %v4060_v12 = vld [vmem:[%s5684_s4 + $0xa] sm:$0x3] }
  0xaf   :  { %v331_v15 = vpop.permute.xlu1 %330  ;;  %v468_v51 = vpop.permute.xlu2 %467 }
  0xb0   :  { %v298_v16 = vmul.f32 %v294_v9, %v289_v14  ;;  %v297_v17 = vmul.f32 %v293_v10, %v288_v13  ;;  %v335_v19 = vsel %vm334_vm3, %v331_v15, %v333_v11  ;;  %v4053_v9 = vld [vmem:[%s5684_s4 + $0x6] sm:$0x3]  ;;  %v1605_v14 = vperm.slane %v4060_v12, 0 }
  0xb1   :  { %v1528_v10 = vperm.slane %v4053_v9, 0 }
  0xb4   :  { %303 = vrot.lane.b32.xlu2 %v298_v16, %s3799_s22  ;;  %301 = vrot.lane.b32.xlu1 %v297_v17, %s3799_s22  ;;  %v4067_v17 = vld [vmem:[%s5684_s4 + $0xc] sm:$0x3] }
  0xb5   :  { %v320_v18 = vpop.permute.xlu0 %319 }
  0xb6   :  { %v323_v20 = vmul.f32 %v320_v18, %v3969_v38  ;;  %v324_v21 = vmul.f32 0.0, %v320_v18  ;;  %v322_v22 = vmul.f32 %v320_v18, %v3966_v36  ;;  %v1648_v18 = vperm.slane %v4067_v17, 0 }
  0xb7   :  { %v376_v24 = vpop.permute.xlu1 %375 }
  0xb8   :  { %v341_v25 = vmul.f32 %v333_v11, %v324_v21  ;;  %v339_v26 = vmul.f32 %v331_v15, %v322_v22  ;;  %v340_v27 = vmul.f32 %v335_v19, %v323_v20  ;;  %v380_v29 = vsel %vm379_vm4, %v376_v24, %v378_v23  ;;  %v4074_v22 = vld [vmem:[%s5684_s4 + $0xe] sm:$0x3] }
  0xba   :  { %345 = vrot.lane.b32.xlu0 %v339_v26, %s3809_s3 }
  0xbc   :  { %349 = vrot.lane.b32.xlu2 %v341_v25, %s3809_s3  ;;  %347 = vrot.lane.b32.xlu1 %v340_v27, %s3809_s3  ;;  %v4081_v27 = vld [vmem:[%s5684_s4 + $0x10] sm:$0x3] }
  0xbd   :  { %v365_v28 = vpop.permute.xlu0 %364 }
  0xbe   :  { %v368_v30 = vmul.f32 %v365_v28, %v3969_v38  ;;  %v369_v31 = vmul.f32 0.0, %v365_v28  ;;  %v367_v32 = vmul.f32 %v365_v28, %v3966_v36  ;;  %v1734_v28 = vperm.slane %v4081_v27, 0 }
  0xbf   :  { %v421_v39 = vpop.permute.xlu1 %420 }
  0xc0   :  { %v386_v33 = vmul.f32 %v378_v23, %v369_v31  ;;  %v384_v34 = vmul.f32 %v376_v24, %v367_v32  ;;  %v385_v35 = vmul.f32 %v380_v29, %v368_v30  ;;  %v425_v44 = vsel %vm424_vm5, %v421_v39, %v423_v37 }
  0xc1   :  { %v1691_v23 = vperm.slane %v4074_v22, 0  ;;  %v131_v32 = vmul.f32 %v3972_v40, %v3969_v38 }
  0xc2   :  { %390 = vrot.lane.b32.xlu0 %v384_v34, %s3810_s19  ;;  %v141_v34 = vsel %vm140_vm7, %v3976_v43, %v3974_v41 }
  0xc4   :  { %394 = vrot.lane.b32.xlu2 %v386_v33, %s3810_s19  ;;  %392 = vrot.lane.b32.xlu1 %v385_v35, %s3810_s19  ;;  %v129_v33 = vmul.f32 0.0, %v3972_v40 }
  0xc5   :  { %v410_v42 = vpop.permute.xlu0 %409 }
  0xc6   :  { %v413_v45 = vmul.f32 %v410_v42, %v3969_v38  ;;  %v414_v46 = vmul.f32 0.0, %v410_v42  ;;  %v412_v47 = vmul.f32 %v410_v42, %v3966_v36  ;;  %v145_v42 = vmul.f32 %v3976_v43, %v129_v33 }
  0xc7   :  { %v466_v52 = vpop.permute.xlu1 %465 }
  0xc8   :  { %v431_v48 = vmul.f32 %v423_v37, %v414_v46  ;;  %v429_v49 = vmul.f32 %v421_v39, %v412_v47  ;;  %v430_v50 = vmul.f32 %v425_v44, %v413_v45  ;;  %v470_v54 = vsel %vm469_vm6, %v466_v52, %v468_v51 }
  0xc9   :  { %v130_v39 = vmul.f32 %v3972_v40, %v3966_v36  ;;  %v147_v46 = vmul.f32 %v3974_v41, %v131_v32 }
  0xca   :  { %435 = vrot.lane.b32.xlu0 %v429_v49, %s3811_s10 }
  0xcb   :  { %v146_v47 = vmul.f32 %v141_v34, %v130_v39 }
  0xcc   :  { %439 = vrot.lane.b32.xlu2 %v431_v48, %s3811_s10  ;;  %437 = vrot.lane.b32.xlu1 %v430_v50, %s3811_s10 }
  0xcd   :  { %v455_v53 = vpop.permute.xlu0 %454 }
  0xce   :  { %v458_v55 = vmul.f32 %v455_v53, %v3969_v38  ;;  %v459_v56 = vmul.f32 0.0, %v455_v53  ;;  %v457_v57 = vmul.f32 %v455_v53, %v3966_v36 }
  0xd0   :  { %v476_v58 = vmul.f32 %v468_v51, %v459_v56  ;;  %v474_v59 = vmul.f32 %v466_v52, %v457_v57  ;;  %v475_v60 = vmul.f32 %v470_v54, %v458_v55 }
  0xd2   :  { %480 = vrot.lane.b32.xlu0 %v474_v59, %s3812_s21 }
  0xd4   :  { %484 = vrot.lane.b32.xlu2 %v476_v58, %s3812_s21  ;;  %482 = vrot.lane.b32.xlu1 %v475_v60, %s3812_s21 }
  0xda   :  { %1420 = vrot.lane.b32.xlu0 %v1417_v62, %s3799_s22 }
  0xdc   :  { %1408 = vperm.xlu1 %3659, %v1405_v0   ;;  %1418 = vrot.lane.b32.xlu2 %v1416_v63, %s3799_s22 }
  0xe2   :  { %1446 = vrot.lane.b32.xlu0 %v1443_v2, %s3800_s23 }
  0xe4   :  { %1433 = vperm.xlu1 %3659, %v3574_v4   ;;  %1444 = vrot.lane.b32.xlu2 %v1442_v3, %s3800_s23 }
  0xec   :  { %1487 = vrot.lane.b32.xlu2 %v1485_v7, %s3801_s6 }
  0xf4   :  { %1530 = vrot.lane.b32.xlu2 %v1528_v10, %s3802_s14 }
  0xf6   :  { %v183_v5 = vpop.permute.xlu2 %182 }
  0xf7   :  { %v192_v51 = vadd.f32 %v183_v5, %v147_v46 }
  0xfc   :  { %1607 = vrot.lane.b32.xlu2 %v1605_v14, %s3803_s18 }
  0xfe   :  { %v228_v8 = vpop.permute.xlu2 %227 }
  0xff   :  { %v237_v40 = vadd.f32 %v228_v8, %v192_v51 }
 0x104   :  { %1650 = vrot.lane.b32.xlu2 %v1648_v18, %s3804_s20 }
 0x106   :  { %v272_v15 = vpop.permute.xlu2 %271 }
 0x107   :  { %v280_v41 = vadd.f32 %v272_v15, %v237_v40 }
 0x10c   :  { %1693 = vrot.lane.b32.xlu2 %v1691_v23, %s3805_s27 }
 0x10e   :  { %v181_v11 = vpop.permute.xlu1 %180  ;;  %v304_v20 = vpop.permute.xlu2 %303 }
 0x10f   :  { %v179_v13 = vpop.permute.xlu0 %178  ;;  %v186_v45 = vsel %vm184_vm2, %v181_v11, %v183_v5  ;;  %v311_v63 = vadd.f32 %v304_v20, %v280_v41  ;;  %v4175_v41 = vstv %s3562_s24  ;;  %s3567_s24 = sld [smem:[#allocation3 + $0xf]] }
 0x110   :  { %v185_v35 = vsel %vm184_vm2, %v179_v13, %v181_v11  ;;  %v191_v52 = vadd.f32 %v186_v45, %v146_v47  ;;  %v4158_v47 = vstv %s3558_s5  ;;  %s4709_s5 = sld [smem:[#allocation9 + $0x18]] }
 0x111   :  { %v190_v48 = vadd.f32 %v185_v35, %v145_v42  ;;  %v4145_v35 = vstv %s4114_s16  ;;  %v613_v42 = vstv %s4118_s17  ;;  %s4701_s16 = sld [smem:[#allocation9 + $0x8]] }
 0x112   :  { %s4703_s17 = sld [smem:[#allocation9 + $0x10]] }
 0x114   :  { %1736 = vrot.lane.b32.xlu2 %v1734_v28, %s3806_s8 }
 0x116   :  { %v226_v16 = vpop.permute.xlu1 %225  ;;  %v350_v25 = vpop.permute.xlu2 %349 }
 0x117   :  { %v224_v19 = vpop.permute.xlu0 %223  ;;  %v231_v49 = vsel %vm229_vm8, %v226_v16, %v228_v8 }
 0x118   :  { %v230_v38 = vsel %vm229_vm8, %v224_v19, %v226_v16  ;;  %v236_v43 = vadd.f32 %v231_v49, %v191_v52  ;;  %v1486_v16 = vperm.slane %v4046_v6, 1  ;;  %v496_v19 = vstv %s4102_s30  ;;  %s823_s30 = sld [smem:[#allocation8]] }
 0x119   :  { %v235_v53 = vadd.f32 %v230_v38, %v190_v48 }
 0x11a   :  { %1489 = vrot.lane.b32.xlu0 %v1486_v16, %s3801_s6  ;;  %s3563_s6 = sld [smem:[#allocation3 + $0xe]] }
 0x11e   :  { %v270_v21 = vpop.permute.xlu1 %269  ;;  %v395_v31 = vpop.permute.xlu2 %394 }
 0x11f   :  { %v268_v24 = vpop.permute.xlu0 %267  ;;  %v274_v36 = vsel %vm167_vm0, %v270_v21, %v272_v15 }
 0x120   :  { %v273_v50 = vsel %vm167_vm0, %v268_v24, %v270_v21  ;;  %v279_v58 = vadd.f32 %v274_v36, %v236_v43  ;;  %v4167_v36 = vstv %s3559_s1  ;;  %s4716_s1 = sld [smem:[#allocation9 + $0xb]] }
 0x121   :  { %v278_v55 = vadd.f32 %v273_v50, %v235_v53  ;;  %v4163_v53 = vstv %s3556_s7  ;;  %s4712_s7 = sld [smem:[#allocation9 + $0x3]] }
 0x126   :  { %v302_v26 = vpop.permute.xlu1 %301  ;;  %v440_v54 = vpop.permute.xlu2 %439 }
 0x127   :  { %v305_v56 = vsel %vm140_vm7, %v302_v26, %v304_v20  ;;  %v309_v59 = vadd.f32 %v302_v26, %v278_v55 }
 0x128   :  { %v310_v0 = vadd.f32 %v305_v56, %v279_v58  ;;  %v4171_v56 = vstv %s3560_s9  ;;  %s3566_s9 = sld [smem:[#allocation3 + $0xb]] }
 0x12c   :  { %v346_v29 = vpop.permute.xlu0 %345 }
 0x12d   :  { %v357_v1 = vadd.f32 %v346_v29, %v309_v59 }
 0x12e   :  { %v348_v30 = vpop.permute.xlu1 %347  ;;  %v485_v11 = vpop.permute.xlu2 %484 }
 0x12f   :  { %v352_v61 = vsel %vm5698_vm9, %v346_v29, %v348_v30  ;;  %v353_v62 = vsel %vm5698_vm9, %v348_v30, %v350_v25  ;;  %v501_v25 = vstv %s4104_s12  ;;  %v4133_v30 = vstv %s4108_s13  ;;  %s3569_s12 = sld [smem:[#allocation8 + $0x1]] }
 0x130   :  { %v358_v4 = vadd.f32 %v352_v61, %v310_v0  ;;  %v359_v5 = vadd.f32 %v353_v62, %v311_v63  ;;  %v4181_v62 = vstv %s3563_s6  ;;  %s809_s6 = sld [smem:[#allocation6]] }
 0x131   :  { %s3571_s13 = sld [smem:[#allocation8 + $0x2]] }
 0x134   :  { %v391_v37 = vpop.permute.xlu0 %390 }
 0x135   :  { %v402_v7 = vadd.f32 %v391_v37, %v357_v1 }
 0x136   :  { %v393_v44 = vpop.permute.xlu1 %392 }
 0x137   :  { %v397_v2 = vsel %vm5697_vm10, %v391_v37, %v393_v44  ;;  %v398_v3 = vsel %vm5697_vm10, %v393_v44, %v395_v31  ;;  %v4148_v37 = vstv %s4112_s15  ;;  %v4153_v44 = vpop.permute.xlu2 %1418  ;;  %s4695_s15 = sld [smem:[#allocation9 + $0x19]] }
 0x138   :  { %v403_v13 = vadd.f32 %v397_v2, %v358_v4  ;;  %v404_v14 = vadd.f32 %v398_v3, %v359_v5  ;;  %5703 = vst [vmem:[#allocation20_spill] sm:$0xff] %v4153_v44 }
 0x13c   :  { %v436_v57 = vpop.permute.xlu0 %435 }
 0x13d   :  { %v447_v15 = vadd.f32 %v436_v57, %v402_v7 }
 0x13e   :  { %v438_v60 = vpop.permute.xlu1 %437 }
 0x13f   :  { %v442_v8 = vsel %vm5695_vm11, %v436_v57, %v438_v60  ;;  %v443_v10 = vsel %vm5695_vm11, %v438_v60, %v440_v54 }
 0x140   :  { %v448_v20 = vadd.f32 %v442_v8, %v403_v13  ;;  %v449_v21 = vadd.f32 %v443_v10, %v404_v14 }
 0x144   :  { %v481_v18 = vpop.permute.xlu0 %480 }
 0x145   :  { %v4122_v23 = vadd.f32 %v481_v18, %v447_v15  ;;  %v4202_v15 = vpop.permute.xlu2 %1444 }
 0x146   :  { %v483_v24 = vpop.permute.xlu1 %482 }
 0x147   :  { %v487_v26 = vsel %vm5694_vm12, %v481_v18, %v483_v24  ;;  %v488_v6 = vsel %vm5694_vm12, %v483_v24, %v485_v11  ;;  %v4136_v31 = vmul.f32 %v496_v19, %v4122_v23  ;;  %v4139_v32 = vmul.f32 %v501_v25, %v4122_v23 }
 0x148   :  { %v4128_v28 = vadd.f32 %v487_v26, %v448_v20  ;;  %v4130_v29 = vadd.f32 %v488_v6, %v449_v21  ;;  %v614_v52 = vmul.f32 %v613_v42, %v4122_v23  ;;  %v609_v0 = vmul.f32 %v4171_v56, %v4122_v23 }
 0x149   :  { %v631_v10 = vmul.f32 %v4175_v41, %v4122_v23 }
 0x14a   :  { %v504_v33 = vmul.f32 %v501_v25, %v4130_v29  ;;  %v521_v34 = vmul.f32 %v4133_v30, %v4130_v29  ;;  %v559_v39 = vmul.f32 %v4145_v35, %v4128_v28  ;;  %v499_v45 = vmul.f32 %v496_v19, %v4130_v29 }
 0x14b   :  { %v538_v46 = vmul.f32 %v4148_v37, %v4130_v29  ;;  %v576_v54 = vmul.f32 %v4158_v47, %v4128_v28  ;;  %v554_v55 = vmul.f32 %v4163_v53, %v4128_v28  ;;  %v593_v57 = vmul.f32 %v4167_v36, %v4128_v28 }
 0x14c   :  { %v510_v38 = vrot.slane %v504_v33, 1  ;;  %v527_v50 = vrot.slane %v521_v34, 2  ;;  %v565_v51 = vrot.slane %v559_v39, 1  ;;  %v611_v58 = vmul.f32 %v4171_v56, %v4130_v29 }
 0x14d   :  { %v544_v43 = vrot.slane %v538_v46, 3  ;;  %v620_v61 = vrot.slane %v614_v52, 1  ;;  %v582_v63 = vrot.slane %v576_v54, 2  ;;  %v616_v1 = vmul.f32 %v613_v42, %v4130_v29 }
 0x14e   :  { %v4160_v48 = vpop.permute.xlu1 %1408  ;;  %v516_v49 = vadd.f32 %v510_v38, %v499_v45  ;;  %v571_v60 = vadd.f32 %v565_v51, %v554_v55  ;;  %v633_v2 = vmul.f32 %v4175_v41, %v4130_v29  ;;  %v650_v3 = vmul.f32 %v4181_v62, %v4130_v29 }
 0x14f   :  { %v498_v4 = vmul.f32 %v496_v19, %v4128_v28  ;;  %v503_v5 = vmul.f32 %v501_v25, %v4128_v28  ;;  %v520_v7 = vmul.f32 %v4133_v30, %v4128_v28  ;;  %v599_v8 = vrot.slane %v593_v57, 3 }
 0x150   :  { %v533_v40 = vadd.f32 %v527_v50, %v516_v49  ;;  %v622_v11 = vrot.slane %v616_v1, 1  ;;  %v537_v13 = vmul.f32 %v4148_v37, %v4128_v28  ;;  %v588_v16 = vadd.f32 %v582_v63, %v571_v60 }
 0x151   :  { %v626_v18 = vadd.f32 %v620_v61, %v609_v0  ;;  %v615_v19 = vmul.f32 %v613_v42, %v4128_v28  ;;  %v509_v20 = vrot.slane %v503_v5, 1  ;;  %v639_v25 = vrot.slane %v633_v2, 2 }
 0x152   :  { %v4179_v59 = vadd.f32 %v544_v43, %v533_v40  ;;  %v628_v24 = vadd.f32 %v622_v11, %v611_v58  ;;  %v526_v26 = vrot.slane %v520_v7, 2  ;;  %v555_v33 = vmul.f32 %v4163_v53, %v4130_v29 }
 0x153   :  { %v515_v6 = vadd.f32 %v509_v20, %v498_v4  ;;  %v560_v34 = vmul.f32 %v4145_v35, %v4130_v29  ;;  %v577_v39 = vmul.f32 %v4158_v47, %v4130_v29  ;;  %v656_v42 = vrot.slane %v650_v3, 3 }
 0x154   :  { %726 = vrot.lane.b32.xlu2 %v4179_v59, %s3806_s8  ;;  %v645_v38 = vadd.f32 %v639_v25, %v628_v24  ;;  %v594_v46 = vmul.f32 %v4167_v36, %v4130_v29  ;;  %v4215_v49 = vadd.f32 %v599_v8, %v588_v16  ;;  %v543_v51 = vrot.slane %v537_v13, 3 }
 0x155   :  { %v532_v50 = vadd.f32 %v526_v26, %v515_v6  ;;  %v566_v52 = vrot.slane %v560_v34, 1  ;;  %v637_v54 = vrot.slane %v631_v10, 2  ;;  %v648_v40 = vmul.f32 %v4181_v62, %v4122_v23 }
 0x156   :  { %v4200_v14 = vpop.permute.xlu1 %1433  ;;  %v4220_v43 = vadd.f32 %v656_v42, %v645_v38  ;;  %v583_v58 = vrot.slane %v577_v39, 2  ;;  %v508_v60 = vrot.slane %v4139_v32, 1  ;;  %v621_v63 = vrot.slane %v615_v19, 1  ;;  %v4270_v38 = vpop.permute.xlu2 %1487 }
 0x157   :  { %v1436_v21 = vmul.f32 0.0, %v4200_v14  ;;  %v4224_v55 = vadd.f32 %v543_v51, %v532_v50  ;;  %v572_v57 = vadd.f32 %v566_v52, %v555_v33  ;;  %v643_v61 = vadd.f32 %v637_v54, %v626_v18 }
 0x158   :  { %v519_v0 = vmul.f32 %v4133_v30, %v4122_v23  ;;  %v536_v1 = vmul.f32 %v4148_v37, %v4122_v23  ;;  %v600_v3 = vrot.slane %v594_v46, 3  ;;  %v514_v4 = vadd.f32 %v508_v60, %v4136_v31  ;;  %v3576_v30 = vld [vmem:[%s5682_s2 + $0x10] sm:$0xff]  ;;  %v3578_v46 = vld [vmem:[%s5682_s2 + $0x18] sm:$0xff] }
 0x159   :  { %v1452_v45 = vmul.f32 %v4202_v15, %v1436_v21  ;;  %v589_v2 = vadd.f32 %v583_v58, %v572_v57  ;;  %v553_v5 = vmul.f32 %v4163_v53, %v4122_v23  ;;  %v654_v7 = vrot.slane %v648_v40, 3  ;;  %v3580_v57 = vld [vmem:[%s5682_s2 + $0x20] sm:$0xff]  ;;  %v3584_v58 = vld [vmem:[%s5682_s2 + $0x30] sm:$0xff]  ;;  %v3586_v60 = vld [vmem:[%s5682_s2 + $0x38] sm:$0xff] }
 0x15a   :  { %v525_v8 = vrot.slane %v519_v0, 2  ;;  %v558_v32 = vmul.f32 %v4145_v35, %v4122_v23  ;;  %v575_v10 = vmul.f32 %v4158_v47, %v4122_v23  ;;  %v610_v37 = vmul.f32 %v4171_v56, %v4128_v28 }
 0x15b   :  { %1458 = vrot.lane.b32.xlu1 %v1452_v45, %s3802_s14  ;;  %v632_v31 = vmul.f32 %v4175_v41, %v4128_v28  ;;  %v4245_v11 = vadd.f32 %v600_v3, %v589_v2  ;;  %v592_v53 = vmul.f32 %v4167_v36, %v4122_v23  ;;  %v542_v35 = vrot.slane %v536_v1, 3 }
 0x15c   :  { %832 = vrot.lane.b32.xlu2 %v4215_v49, %s3806_s8  ;;  %v531_v13 = vadd.f32 %v525_v8, %v514_v4  ;;  %v564_v16 = vrot.slane %v558_v32, 1  ;;  %v4249_v18 = vadd.f32 %v654_v7, %v643_v61  ;;  %v627_v47 = vadd.f32 %v621_v63, %v610_v37  ;;  %v3588_v61 = vld [vmem:[%s5682_s2 + $0x40] sm:$0xff]  ;;  %v4307_v63 = vpop.permute.xlu0 %1420 }
 0x15d   :  { %v581_v21 = vrot.slane %v575_v10, 2  ;;  %v638_v56 = vrot.slane %v632_v31, 2  ;;  %v649_v41 = vmul.f32 %v4181_v62, %v4128_v28  ;;  %v598_v36 = vrot.slane %v592_v53, 3  ;;  %5705 = vst [vmem:[#allocation22_spill] sm:$0xff] %v4307_v63 }
 0x15e   :  { %v4251_v19 = vadd.f32 %v542_v35, %v531_v13  ;;  %v570_v20 = vadd.f32 %v564_v16, %v553_v5  ;;  %v1529_v34 = vperm.slane %v4053_v9, 1  ;;  %v1606_v9 = vperm.slane %v4060_v12, 1  ;;  %v4284_v54 = vpop.permute.xlu2 %1530  ;;  %v3582_v12 = vld [vmem:[%s5682_s2 + $0x28] sm:$0xff]  ;;  %s3565_s2 = sld [smem:[#allocation3 + $0x7]] }
 0x15f   :  { %v644_v25 = vadd.f32 %v638_v56, %v627_v47  ;;  %v655_v6 = vrot.slane %v649_v41, 3  ;;  %v1649_v10 = vperm.slane %v4067_v17, 1  ;;  %v1692_v35 = vperm.slane %v4074_v22, 1 }
 0x160   :  { %v587_v24 = vadd.f32 %v581_v21, %v570_v20  ;;  %1532 = vrot.lane.b32.xlu0 %v1529_v34, %s3802_s14 }
 0x161   :  { %v4259_v33 = vadd.f32 %v655_v6, %v644_v25 }
 0x162   :  { %v4257_v26 = vadd.f32 %v598_v36, %v587_v24  ;;  %v686_v36 = vstv %s3566_s9  ;;  %s4726_s9 = sld [smem:[#allocation9 + $0x6]] }
 0x163   :  { %1476 = vperm.xlu1 %3659, %v3576_v30   ;;  %v689_v6 = vmul.f32 %v686_v36, %v4130_v29 }
 0x164   :  { %936 = vrot.lane.b32.xlu2 %v4249_v18, %s3806_s8  ;;  %v4309_v0 = vpop.permute.xlu0 %1446  ;;  %v669_v21 = vstv %s3565_s2  ;;  %s4718_s2 = sld [smem:[#allocation9 + $0x13]] }
 0x165   :  { %v672_v41 = vmul.f32 %v669_v21, %v4130_v29 }
 0x167   :  { %v678_v22 = vrot.slane %v672_v41, 1 }
 0x168   :  { %1609 = vrot.lane.b32.xlu0 %v1606_v9, %s3803_s18  ;;  %s4699_s18 = sld [smem:[#allocation9]] }
 0x16c   :  { %938 = vrot.lane.b32.xlu2 %v4259_v33, %s3806_s8 }
 0x18c   :  { %v4311_v1 = vpop.permute.xlu0 %1489 }
 0x1cd   :  { %v4265_v39 = vpop.permute.xlu1 %1458 }
 0x1d2   :  { %v4315_v3 = vpop.permute.xlu0 %1532 }
 0x1d5   :  { %v4267_v45 = vpop.permute.xlu1 %1476 }
 0x1d6   :  { %v1479_v62 = vmul.f32 0.0, %v4267_v45 }
 0x1d8   :  { %v1495_v42 = vmul.f32 %v4270_v38, %v1479_v62  ;;  %v703_v62 = vstv %s3567_s24  ;;  %s4730_s24 = sld [smem:[#allocation9 + $0xe]] }
 0x1da   :  { %1501 = vrot.lane.b32.xlu1 %v1495_v42, %s3808_s0  ;;  %v4321_v7 = vpop.permute.xlu0 %1609  ;;  %v695_v42 = vrot.slane %v689_v6, 2 }
 0x1e2   :  { %1519 = vperm.xlu1 %3659, %v3578_v46   ;;  %v706_v46 = vmul.f32 %v703_v62, %v4130_v29 }
 0x24c   :  { %v4279_v50 = vpop.permute.xlu1 %1501 }
 0x24d   :  { %5704 = vst [vmem:[#allocation21_spill] sm:$0xff] %v4279_v50 }
 0x254   :  { %v4281_v51 = vpop.permute.xlu1 %1519 }
 0x255   :  { %v1522_v52 = vmul.f32 0.0, %v4281_v51 }
 0x257   :  { %v1538_v40 = vmul.f32 %v4284_v54, %v1522_v52  ;;  %v712_v52 = vrot.slane %v706_v46, 3 }
 0x259   :  { %1544 = vrot.lane.b32.xlu1 %v1538_v40, %s3800_s23 }
 0x261   :  { %1562 = vperm.xlu1 %3659, %v3580_v57   ;;  %v670_v57 = vmul.f32 %v669_v21, %v4122_v23 }
 0x269   :  { %1596 = vperm.xlu1 %3659, %v3582_v12   ;;  %v676_v12 = vrot.slane %v670_v57, 1 }
 0x271   :  { %1639 = vperm.xlu1 %3659, %v3584_v58  }
 0x279   :  { %1682 = vperm.xlu1 %3659, %v3586_v60   ;;  %v687_v60 = vmul.f32 %v686_v36, %v4122_v23 }
 0x281   :  { %1725 = vperm.xlu1 %3659, %v3588_v61  }
 0x289   :  { %940 = vrot.lane.b32.xlu1 %v4220_v43, %s3806_s8 }
 0x291   :  { %724 = vrot.lane.b32.xlu1 %v4224_v55, %s3806_s8 }
 0x2cb   :  { %v4313_v2 = vpop.permute.xlu1 %1544 }
 0x2cc   :  { %5706 = vst [vmem:[#allocation23_spill] sm:$0xff] %v4313_v2 }
 0x2d3   :  { %v4317_v4 = vpop.permute.xlu1 %1562 }
 0x2db   :  { %v4319_v5 = vpop.permute.xlu1 %1596 }
 0x2dc   :  { %v1601_v8 = vmul.f32 0.0, %v4319_v5 }
 0x2de   :  { %v1617_v32 = vmul.f32 %v4321_v7, %v1601_v8  ;;  %v693_v8 = vrot.slane %v687_v60, 2 }
 0x2e0   :  { %1625 = vrot.lane.b32.xlu0 %v1617_v32, %s3809_s3  ;;  %v704_v32 = vmul.f32 %v703_v62, %v4122_v23 }
 0x2e3   :  { %v4330_v37 = vpop.permute.xlu1 %1639 }
 0x2e4   :  { %v1644_v31 = vmul.f32 0.0, %v4330_v37 }
 0x2e8   :  { %1652 = vrot.lane.b32.xlu0 %v1649_v10, %s3804_s20  ;;  %s3564_s20 = sld [smem:[#allocation3 + $0x3]] }
 0x2eb   :  { %v4341_v17 = vpop.permute.xlu1 %1682 }
 0x2ec   :  { %v1687_v47 = vmul.f32 0.0, %v4341_v17 }
 0x2ee   :  { %v664_v24 = vstv %s3564_s20  ;;  %s4722_s20 = sld [smem:[#allocation9 + $0x1b]] }
 0x2ef   :  { %v667_v25 = vmul.f32 %v664_v24, %v4130_v29  ;;  %v665_v58 = vmul.f32 %v664_v24, %v4122_v23  ;;  %v671_v29 = vmul.f32 %v669_v21, %v4128_v28  ;;  %v4378_v23 = vpop.permute.xlu2 %1607 }
 0x2f1   :  { %v684_v34 = vadd.f32 %v678_v22, %v667_v25  ;;  %v682_v61 = vadd.f32 %v676_v12, %v665_v58  ;;  %v705_v22 = vmul.f32 %v703_v62, %v4128_v28 }
 0x2f3   :  { %v701_v9 = vadd.f32 %v695_v42, %v684_v34  ;;  %v699_v10 = vadd.f32 %v693_v8, %v682_v61  ;;  %v711_v6 = vrot.slane %v705_v22, 3  ;;  %v4386_v46 = vpop.permute.xlu1 %1725 }
 0x2f5   :  { %v4354_v40 = vadd.f32 %v712_v52, %v701_v9 }
 0x2fb   :  { %v941_v52 = vpop.permute.xlu1 %940 }
 0x303   :  { %v725_v58 = vpop.permute.xlu1 %724 }
 0x352   :  { %v4328_v30 = vpop.permute.xlu0 %1625 }
 0x353   :  { %5707 = vst [vmem:[#allocation24_spill] sm:$0xff] %v4328_v30 }
 0x35a   :  { %v4333_v53 = vpop.permute.xlu0 %1652 }
 0x35b   :  { %v1660_v13 = vmul.f32 %v4333_v53, %v1644_v31  ;;  %v677_v31 = vrot.slane %v671_v29, 1 }
 0x35d   :  { %1668 = vrot.lane.b32.xlu0 %v1660_v13, %s3810_s19  ;;  %v710_v13 = vrot.slane %v704_v32, 3 }
 0x365   :  { %1695 = vrot.lane.b32.xlu0 %v1692_v35, %s3805_s27  ;;  %v666_v35 = vmul.f32 %v664_v24, %v4128_v28  ;;  %v4380_v24 = vpop.permute.xlu2 %1650 }
 0x367   :  { %v683_v41 = vadd.f32 %v677_v31, %v666_v35 }
 0x3cf   :  { %v4339_v16 = vpop.permute.xlu0 %1668 }
 0x3d0   :  { %5708 = vst [vmem:[#allocation25_spill] sm:$0xff] %v4339_v16 }
 0x3d7   :  { %v4344_v20 = vpop.permute.xlu0 %1695 }
 0x3d8   :  { %v1703_v56 = vmul.f32 %v4344_v20, %v1687_v47  ;;  %v688_v47 = vmul.f32 %v686_v36, %v4128_v28  ;;  %v4382_v36 = vpop.permute.xlu2 %1693 }
 0x3da   :  { %1711 = vrot.lane.b32.xlu0 %v1703_v56, %s3811_s10  ;;  %v4369_v56 = vadd.f32 %v710_v13, %v699_v10  ;;  %v694_v21 = vrot.slane %v688_v47, 2 }
 0x3dc   :  { %v700_v25 = vadd.f32 %v694_v21, %v683_v41 }
 0x3de   :  { %v4374_v34 = vadd.f32 %v711_v6, %v700_v25 }
 0x3e0   :  { %v4384_v42 = vpop.permute.xlu2 %1736 }
 0x3e2   :  { %834 = vrot.lane.b32.xlu0 %v4245_v11, %s3806_s8 }
 0x3e8   :  { %v727_v28 = vpop.permute.xlu2 %726 }
 0x3e9   :  { %v729_v60 = vsel %vm469_vm6, %v725_v58, %v727_v28 }
 0x3ea   :  { %1046 = vrot.lane.b32.xlu0 %v4354_v40, %s3806_s8  ;;  %v740_v10 = vsel %vm5693_vm13, %v729_v60, 0.0  ;;  %v734_v13 = vsel %vm732_vm14, %v729_v60, 0.0 }
 0x3f0   :  { %v833_v57 = vpop.permute.xlu2 %832 }
 0x3f2   :  { %722 = vrot.lane.b32.xlu0 %v4251_v19, %s3806_s8 }
 0x3f8   :  { %v937_v8 = vpop.permute.xlu2 %936 }
 0x3fa   :  { %830 = vrot.lane.b32.xlu0 %v4257_v26, %s3806_s8 }
 0x400   :  { %v939_v60 = vpop.permute.xlu2 %938 }
 0x402   :  { %1042 = vrot.lane.b32.xlu0 %v4369_v56, %s3806_s8 }
 0x40a   :  { %1044 = vrot.lane.b32.xlu0 %v4374_v34, %s3806_s8 }
 0x44c   :  { %v4388_v9 = vpop.permute.xlu0 %1711 }
 0x44d   :  { %5709 = vst [vmem:[#allocation26_spill] sm:$0xff] %v4388_v9 }
 0x454   :  { %v835_v62 = vpop.permute.xlu0 %834 }
 0x455   :  { %v837_v41 = vsel %vm469_vm6, %v833_v57, %v835_v62  ;;  %v942_v62 = vsel %vm469_vm6, %v937_v8, %v939_v60 }
 0x456   :  { %v846_v6 = vsel %vm5693_vm13, %v837_v41, 0.0 }
 0x45c   :  { %v1047_v12 = vpop.permute.xlu0 %1046 }
 0x464   :  { %v723_v61 = vpop.permute.xlu0 %722 }
 0x465   :  { %v728_v29 = vsel %vm469_vm6, %v723_v61, %v725_v58  ;;  %v841_v58 = vsel %vm732_vm14, %v837_v41, 0.0 }
 0x466   :  { %v739_v32 = vsel %vm5693_vm13, %v728_v29, 0.0  ;;  %v733_v31 = vsel %vm732_vm14, %v728_v29, 0.0 }
 0x467   :  { %v741_v35 = vadd.f32 %v740_v10, %v739_v32  ;;  %v735_v47 = vadd.f32 %v734_v13, %v733_v31  ;;  %v943_v32 = vsel %vm469_vm6, %v939_v60, %v941_v52  ;;  %v946_v13 = vsel %vm732_vm14, %v942_v62, 0.0 }
 0x468   :  { %v952_v31 = vsel %vm5693_vm13, %v943_v32, 0.0 }
 0x469   :  { %742 = vadd.xlane.f32.xlu1 %v741_v35  ;;  %736 = vadd.xlane.f32.xlu0 %v735_v47  ;;  %v951_v35 = vsel %vm5693_vm13, %v942_v62, 0.0 }
 0x46a   :  { %v953_v41 = vadd.f32 %v952_v31, %v951_v35 }
 0x46c   :  { %v831_v21 = vpop.permute.xlu0 %830 }
 0x46d   :  { %v836_v22 = vsel %vm469_vm6, %v831_v21, %v833_v57  ;;  %v947_v57 = vsel %vm732_vm14, %v943_v32, 0.0 }
 0x46e   :  { %v845_v25 = vsel %vm5693_vm13, %v836_v22, 0.0  ;;  %v840_v28 = vsel %vm732_vm14, %v836_v22, 0.0  ;;  %v948_v47 = vadd.f32 %v947_v57, %v946_v13 }
 0x46f   :  { %v847_v61 = vadd.f32 %v846_v6, %v845_v25  ;;  %v842_v29 = vadd.f32 %v841_v58, %v840_v28 }
 0x471   :  { %848 = vadd.xlane.f32.xlu2 %v847_v61  ;;  %843 = vadd.xlane.f32.xlu0 %v842_v29  ;;  %v1735_v29 = vperm.slane %v4081_v27, 1 }
 0x474   :  { %v1043_v10 = vpop.permute.xlu0 %1042 }
 0x479   :  { %949 = vadd.xlane.f32.xlu2 %v948_v47  ;;  %954 = vadd.xlane.f32.xlu0 %v953_v41 }
 0x47c   :  { %v1045_v21 = vpop.permute.xlu0 %1044 }
 0x47d   :  { %v1048_v52 = vsel %vm469_vm6, %v1043_v10, %v1045_v21  ;;  %v1049_v22 = vsel %vm469_vm6, %v1045_v21, %v1047_v12 }
 0x47e   :  { %v1057_v8 = vsel %vm5693_vm13, %v1048_v52, 0.0  ;;  %v1058_v25 = vsel %vm5693_vm13, %v1049_v22, 0.0  ;;  %v1052_v6 = vsel %vm732_vm14, %v1048_v52, 0.0  ;;  %v1053_v28 = vsel %vm732_vm14, %v1049_v22, 0.0 }
 0x47f   :  { %v1059_v58 = vadd.f32 %v1058_v25, %v1057_v8  ;;  %v1054_v61 = vadd.f32 %v1053_v28, %v1052_v6 }
 0x481   :  { %1060 = vadd.xlane.f32.xlu0 %v1059_v58  ;;  %1055 = vadd.xlane.f32.xlu2 %v1054_v61  ;;  %v4428_v61 = vld [vmem:[#allocation2] sm:$0xff] }
 0x495   :  { %1738 = vrot.lane.b32.xlu0 %v1735_v29, %s3806_s8  ;;  %v1730_v29 = vmul.f32 %v4428_v61, %v4386_v46 }
 0x4dc   :  { %v743_v60 = vpop.xlane.xlu1 %742  ;;  %v737_v32 = vpop.xlane.xlu0 %736 }
 0x4dd   :  { %v745_v62 = vrot.slane %v743_v60, 4 }
 0x4df   :  { %v747_v12 = vadd.f32 %v745_v62, %v737_v32 }
 0x4e1   :  { %v4416_v10 = vmul.f32 0.001953125, %v747_v12 }
 0x4e3   :  { %751 = vperm.xlu2 %3660, %v4416_v10  }
 0x4e4   :  { %v849_v57 = vpop.xlane.xlu2 %848  ;;  %v844_v31 = vpop.xlane.xlu0 %843 }
 0x4e5   :  { %v851_v13 = vrot.slane %v849_v57, 4 }
 0x4e7   :  { %v853_v35 = vadd.f32 %v851_v13, %v844_v31 }
 0x4e9   :  { %v4419_v47 = vmul.f32 0.001953125, %v853_v35 }
 0x4eb   :  { %857 = vperm.xlu1 %3659, %v4419_v47  }
 0x4ec   :  { %v950_v41 = vpop.xlane.xlu2 %949  ;;  %v955_v27 = vpop.xlane.xlu0 %954 }
 0x4ed   :  { %v957_v21 = vrot.slane %v955_v27, 4 }
 0x4ef   :  { %v959_v52 = vadd.f32 %v957_v21, %v950_v41 }
 0x4f1   :  { %v4422_v22 = vmul.f32 0.001953125, %v959_v52 }
 0x4f3   :  { %963 = vperm.xlu1 %3659, %v4422_v22  }
 0x4f4   :  { %v1061_v8 = vpop.xlane.xlu0 %1060  ;;  %v1056_v6 = vpop.xlane.xlu2 %1055 }
 0x4f5   :  { %v1063_v25 = vrot.slane %v1061_v8, 4 }
 0x4f7   :  { %v1065_v28 = vadd.f32 %v1063_v25, %v1056_v6 }
 0x4f9   :  { %v4425_v58 = vmul.f32 0.001953125, %v1065_v28 }
 0x4fb   :  { %1069 = vperm.xlu1 %3659, %v4425_v58  }
 0x507   :  { %v4432_v60 = vpop.permute.xlu0 %1738 }
 0x508   :  { %v1746_v32 = vmul.f32 %v4432_v60, %v1730_v29 }
 0x50a   :  { %1754 = vrot.lane.b32.xlu0 %v1746_v32, %s3812_s21 }
 0x53d   :  { %v752_v62 = vpop.permute.xlu2 %751 }
 0x53e   :  { %v754_v12 = vsub.f32 %v4251_v19, %v752_v62  ;;  %v755_v31 = vsub.f32 %v4224_v55, %v752_v62  ;;  %v756_v35 = vsub.f32 %v4179_v59, %v752_v62 }
 0x540   :  { %v757_v57 = vmul.f32 %v754_v12, %v754_v12  ;;  %v758_v13 = vmul.f32 %v755_v31, %v755_v31  ;;  %v759_v41 = vmul.f32 %v756_v35, %v756_v35 }
 0x542   :  { %763 = vrot.lane.b32.xlu2 %v757_v57, %s3806_s8 }
 0x54a   :  { %765 = vrot.lane.b32.xlu2 %v758_v13, %s3806_s8 }
 0x552   :  { %767 = vrot.lane.b32.xlu2 %v759_v41, %s3806_s8 }
 0x55d   :  { %v858_v27 = vpop.permute.xlu1 %857 }
 0x55e   :  { %v862_v21 = vsub.f32 %v4245_v11, %v858_v27  ;;  %v861_v52 = vsub.f32 %v4215_v49, %v858_v27  ;;  %v860_v8 = vsub.f32 %v4257_v26, %v858_v27 }
 0x560   :  { %v865_v25 = vmul.f32 %v862_v21, %v862_v21  ;;  %v864_v6 = vmul.f32 %v861_v52, %v861_v52  ;;  %v863_v28 = vmul.f32 %v860_v8, %v860_v8  ;;  %v884_v52 = vrot.slane %v858_v27, 4 }
 0x562   :  { %873 = vrot.lane.b32.xlu2 %v865_v25, %s3806_s8  ;;  %871 = vrot.lane.b32.xlu1 %v864_v6, %s3806_s8 }
 0x563   :  { %869 = vrot.lane.b32.xlu0 %v863_v28, %s3806_s8  ;;  %v778_v28 = vrot.slane %v752_v62, 4 }
 0x565   :  { %v964_v29 = vpop.permute.xlu1 %963  ;;  %v781_v62 = vsub.f32 %v4224_v55, %v778_v28 }
 0x566   :  { %v967_v32 = vsub.f32 %v4259_v33, %v964_v29  ;;  %v966_v12 = vsub.f32 %v4249_v18, %v964_v29  ;;  %v968_v13 = vsub.f32 %v4220_v43, %v964_v29 }
 0x568   :  { %v970_v57 = vmul.f32 %v967_v32, %v967_v32  ;;  %v969_v31 = vmul.f32 %v966_v12, %v966_v12  ;;  %v971_v8 = vmul.f32 %v968_v13, %v968_v13  ;;  %v888_v12 = vsub.f32 %v4245_v11, %v884_v52 }
 0x56a   :  { %977 = vrot.lane.b32.xlu1 %v970_v57, %s3806_s8  ;;  %v780_v57 = vsub.f32 %v4251_v19, %v778_v28  ;;  %v891_v16 = vmul.f32 %v888_v12, %v888_v12 }
 0x56b   :  { %975 = vrot.lane.b32.xlu0 %v969_v31, %s3806_s8  ;;  %v990_v31 = vrot.slane %v964_v29, 4  ;;  %v886_v29 = vsub.f32 %v4257_v26, %v884_v52 }
 0x56c   :  { %v783_v27 = vmul.f32 %v780_v57, %v780_v57 }
 0x56d   :  { %v1070_v35 = vpop.permute.xlu1 %1069  ;;  %v994_v13 = vsub.f32 %v4220_v43, %v990_v31  ;;  %v889_v57 = vmul.f32 %v886_v29, %v886_v29 }
 0x56e   :  { %v1072_v41 = vsub.f32 %v4369_v56, %v1070_v35  ;;  %v1073_v21 = vsub.f32 %v4374_v34, %v1070_v35  ;;  %v1074_v32 = vsub.f32 %v4354_v40, %v1070_v35 }
 0x570   :  { %v1075_v25 = vmul.f32 %v1072_v41, %v1072_v41  ;;  %v1076_v6 = vmul.f32 %v1073_v21, %v1073_v21  ;;  %v1077_v9 = vmul.f32 %v1074_v32, %v1074_v32  ;;  %v782_v41 = vsub.f32 %v4179_v59, %v778_v28 }
 0x571   :  { %v1096_v21 = vrot.slane %v1070_v35, 4  ;;  %v887_v28 = vsub.f32 %v4215_v49, %v884_v52 }
 0x572   :  { %979 = vrot.lane.b32.xlu1 %v971_v8, %s3806_s8  ;;  %1081 = vrot.lane.b32.xlu2 %v1075_v25, %s3806_s8  ;;  %v784_v8 = vmul.f32 %v781_v62, %v781_v62  ;;  %v997_v25 = vmul.f32 %v994_v13, %v994_v13  ;;  %v993_v13 = vsub.f32 %v4259_v33, %v990_v31 }
 0x573   :  { %1083 = vrot.lane.b32.xlu0 %v1076_v6, %s3806_s8  ;;  %v785_v6 = vmul.f32 %v782_v41, %v782_v41  ;;  %v1100_v35 = vsub.f32 %v4354_v40, %v1096_v21  ;;  %v890_v62 = vmul.f32 %v887_v28, %v887_v28 }
 0x574   :  { %v996_v41 = vmul.f32 %v993_v13, %v993_v13 }
 0x57a   :  { %1085 = vrot.lane.b32.xlu1 %v1077_v9, %s3806_s8  ;;  %899 = vrot.lane.b32.xlu2 %v891_v16, %s3806_s8  ;;  %v992_v16 = vsub.f32 %v4249_v18, %v990_v31  ;;  %v1098_v9 = vsub.f32 %v4369_v56, %v1096_v21 }
 0x57b   :  { %789 = vrot.lane.b32.xlu0 %v783_v27, %s3806_s8  ;;  %v1103_v27 = vmul.f32 %v1100_v35, %v1100_v35 }
 0x57c   :  { %v995_v32 = vmul.f32 %v992_v16, %v992_v16  ;;  %v1101_v12 = vmul.f32 %v1098_v9, %v1098_v9 }
 0x582   :  { %791 = vrot.lane.b32.xlu1 %v784_v8, %s3806_s8  ;;  %1005 = vrot.lane.b32.xlu2 %v997_v25, %s3806_s8  ;;  %v1099_v25 = vsub.f32 %v4374_v34, %v1096_v21 }
 0x583   :  { %793 = vrot.lane.b32.xlu0 %v785_v6, %s3806_s8 }
 0x584   :  { %v1102_v6 = vmul.f32 %v1099_v25, %v1099_v25 }
 0x58a   :  { %1001 = vrot.lane.b32.xlu1 %v995_v32, %s3806_s8  ;;  %1107 = vrot.lane.b32.xlu2 %v1101_v12, %s3806_s8 }
 0x58b   :  { %895 = vrot.lane.b32.xlu0 %v889_v57, %s3806_s8  ;;  %v4488_v57 = vpop.permute.xlu0 %1754 }
 0x58c   :  { %5710 = vst [vmem:[#allocation27_spill] sm:$0xff] %v4488_v57 }
 0x592   :  { %1111 = vrot.lane.b32.xlu2 %v1103_v27, %s3806_s8 }
 0x593   :  { %897 = vrot.lane.b32.xlu0 %v890_v62, %s3806_s8 }
 0x59b   :  { %1003 = vrot.lane.b32.xlu0 %v996_v41, %s3806_s8 }
 0x59c   :  { %v764_v8 = vpop.permute.xlu2 %763 }
 0x5a3   :  { %1109 = vrot.lane.b32.xlu0 %v1102_v6, %s3806_s8 }
 0x5a4   :  { %v766_v16 = vpop.permute.xlu2 %765 }
 0x5a5   :  { %v769_v29 = vsel %vm469_vm6, %v764_v8, %v766_v16 }
 0x5a6   :  { %v773_v12 = vsel %vm732_vm14, %v769_v29, 0.0 }
 0x5ac   :  { %v768_v9 = vpop.permute.xlu2 %767 }
 0x5ad   :  { %v770_v52 = vsel %vm469_vm6, %v766_v16, %v768_v9 }
 0x5ae   :  { %v774_v32 = vsel %vm732_vm14, %v770_v52, 0.0 }
 0x5af   :  { %v775_v31 = vadd.f32 %v774_v32, %v773_v12 }
 0x5bb   :  { %776 = vadd.xlane.f32.xlu2 %v775_v31 }
 0x5bc   :  { %v874_v35 = vpop.permute.xlu2 %873 }
 0x5d4   :  { %v872_v28 = vpop.permute.xlu1 %871 }
 0x5d5   :  { %v870_v21 = vpop.permute.xlu0 %869  ;;  %v876_v27 = vsel %vm469_vm6, %v872_v28, %v874_v35  ;;  %v1082_v35 = vpop.permute.xlu2 %1081 }
 0x5d6   :  { %v875_v62 = vsel %vm469_vm6, %v870_v21, %v872_v28  ;;  %v880_v13 = vsel %vm732_vm14, %v876_v27, 0.0 }
 0x5d7   :  { %v879_v41 = vsel %vm732_vm14, %v875_v62, 0.0 }
 0x5d8   :  { %v881_v8 = vadd.f32 %v880_v13, %v879_v41 }
 0x5da   :  { %882 = vadd.xlane.f32.xlu1 %v881_v8 }
 0x5dc   :  { %v978_v25 = vpop.permute.xlu1 %977 }
 0x5dd   :  { %v976_v6 = vpop.permute.xlu0 %975 }
 0x5de   :  { %v981_v16 = vsel %vm469_vm6, %v976_v6, %v978_v25 }
 0x5df   :  { %v985_v32 = vsel %vm732_vm14, %v981_v16, 0.0 }
 0x5e4   :  { %v980_v9 = vpop.permute.xlu1 %979 }
 0x5e5   :  { %v982_v52 = vsel %vm469_vm6, %v978_v25, %v980_v9  ;;  %v1084_v29 = vpop.permute.xlu0 %1083 }
 0x5e6   :  { %v986_v12 = vsel %vm732_vm14, %v982_v52, 0.0  ;;  %v1087_v28 = vsel %vm469_vm6, %v1082_v35, %v1084_v29 }
 0x5e7   :  { %v987_v31 = vadd.f32 %v986_v12, %v985_v32  ;;  %v1091_v13 = vsel %vm732_vm14, %v1087_v28, 0.0  ;;  %v900_v32 = vpop.permute.xlu2 %899 }
 0x5e9   :  { %988 = vadd.xlane.f32.xlu2 %v987_v31 }
 0x5ec   :  { %v1086_v21 = vpop.permute.xlu1 %1085 }
 0x5ed   :  { %v1088_v27 = vsel %vm469_vm6, %v1084_v29, %v1086_v21  ;;  %v790_v62 = vpop.permute.xlu0 %789 }
 0x5ee   :  { %v1092_v41 = vsel %vm732_vm14, %v1088_v27, 0.0 }
 0x5ef   :  { %v1093_v8 = vadd.f32 %v1092_v41, %v1091_v13  ;;  %v1006_v35 = vpop.permute.xlu2 %1005 }
 0x5f1   :  { %1094 = vadd.xlane.f32.xlu1 %v1093_v8 }
 0x5f4   :  { %v792_v25 = vpop.permute.xlu1 %791 }
 0x5f5   :  { %v794_v6 = vpop.permute.xlu0 %793  ;;  %v795_v16 = vsel %vm469_vm6, %v790_v62, %v792_v25 }
 0x5f6   :  { %v796_v9 = vsel %vm469_vm6, %v792_v25, %v794_v6  ;;  %v799_v52 = vsel %vm5693_vm13, %v795_v16, 0.0 }
 0x5f7   :  { %v800_v12 = vsel %vm5693_vm13, %v796_v9, 0.0  ;;  %v1108_v8 = vpop.permute.xlu2 %1107 }
 0x5f8   :  { %v801_v31 = vadd.f32 %v800_v12, %v799_v52 }
 0x5fa   :  { %802 = vadd.xlane.f32.xlu1 %v801_v31 }
 0x5fc   :  { %v1002_v25 = vpop.permute.xlu1 %1001 }
 0x5fd   :  { %v896_v29 = vpop.permute.xlu0 %895 }
 0x605   :  { %v898_v28 = vpop.permute.xlu0 %897 }
 0x606   :  { %v901_v21 = vsel %vm469_vm6, %v896_v29, %v898_v28  ;;  %v902_v27 = vsel %vm469_vm6, %v898_v28, %v900_v32  ;;  %v1112_v32 = vpop.permute.xlu2 %1111 }
 0x607   :  { %v905_v13 = vsel %vm5693_vm13, %v901_v21, 0.0  ;;  %v906_v62 = vsel %vm5693_vm13, %v902_v27, 0.0 }
 0x608   :  { %v907_v41 = vadd.f32 %v906_v62, %v905_v13 }
 0x60a   :  { %908 = vadd.xlane.f32.xlu0 %v907_v41 }
 0x60d   :  { %v1004_v6 = vpop.permute.xlu0 %1003 }
 0x60e   :  { %v1007_v16 = vsel %vm469_vm6, %v1002_v25, %v1004_v6  ;;  %v1008_v9 = vsel %vm469_vm6, %v1004_v6, %v1006_v35 }
 0x60f   :  { %v1011_v52 = vsel %vm5693_vm13, %v1007_v16, 0.0  ;;  %v1012_v12 = vsel %vm5693_vm13, %v1008_v9, 0.0 }
 0x610   :  { %v1013_v31 = vadd.f32 %v1012_v12, %v1011_v52 }
 0x612   :  { %1014 = vadd.xlane.f32.xlu1 %v1013_v31 }
 0x615   :  { %v1110_v29 = vpop.permute.xlu0 %1109 }
 0x616   :  { %v1113_v28 = vsel %vm469_vm6, %v1108_v8, %v1110_v29  ;;  %v1114_v21 = vsel %vm469_vm6, %v1110_v29, %v1112_v32 }
 0x617   :  { %v1117_v27 = vsel %vm5693_vm13, %v1113_v28, 0.0  ;;  %v1118_v13 = vsel %vm5693_vm13, %v1114_v21, 0.0 }
 0x618   :  { %v1119_v62 = vadd.f32 %v1118_v13, %v1117_v27 }
 0x61a   :  { %1120 = vadd.xlane.f32.xlu0 %v1119_v62 }
 0x62e   :  { %v777_v16 = vpop.xlane.xlu2 %776 }
 0x64d   :  { %v883_v41 = vpop.xlane.xlu1 %882 }
 0x664   :  { %v1095_v35 = vpop.xlane.xlu1 %1094 }
 0x66d   :  { %v803_v25 = vpop.xlane.xlu1 %802 }
 0x66e   :  { %v805_v6 = vrot.slane %v803_v25, 4  ;;  %v821_v25 = vstv %s809_s6  ;;  %s4732_s6 = sld [smem:[#allocation9 + $0x16]] }
 0x670   :  { %v807_v9 = vadd.f32 %v805_v6, %v777_v16  ;;  %v989_v16 = vpop.xlane.xlu2 %988 }
 0x672   :  { %v808_v52 = vmul.f32 0.001953125, %v807_v9 }
 0x674   :  { %v810_v12 = vadd.f32 1e-05, %v808_v52 }
 0x676   :  { %3661 = vrsqrt.f32 %v810_v12  ;;  %vm817_vm13 = vweird.f32 %v810_v12 }
 0x67c   :  { %v3662_v31 = vpop.eup %3661 }
 0x67d   :  { %v812_v57 = vmul.f32 %v3662_v31, %v810_v12  ;;  %v909_v8 = vpop.xlane.xlu0 %908  ;;  %vm818_vm15 = vweird.f32 %v3662_v31 }
 0x67e   :  { %v911_v32 = vrot.slane %v909_v8, 4  ;;  %vm819_vm12 = vmor %vm817_vm13, %vm818_vm15 }
 0x67f   :  { %v813_v29 = vmul.f32 %v3662_v31, %v812_v57 }
 0x680   :  { %v913_v28 = vadd.f32 %v911_v32, %v883_v41 }
 0x681   :  { %v814_v30 = vmul.f32 0.5, %v813_v29 }
 0x682   :  { %v914_v21 = vmul.f32 0.001953125, %v913_v28 }
 0x683   :  { %v815_v27 = vsub.f32 1.5, %v814_v30 }
 0x684   :  { %v916_v13 = vadd.f32 1e-05, %v914_v21 }
 0x685   :  { %v1015_v62 = vpop.xlane.xlu1 %1014  ;;  %v816_v63 = vmul.f32 %v3662_v31, %v815_v27 }
 0x686   :  { %3663 = vrsqrt.f32 %v916_v13  ;;  %v1017_v6 = vrot.slane %v1015_v62, 4 }
 0x687   :  { %v820_v9 = vsel %vm819_vm12, %v3662_v31, %v816_v63  ;;  %vm923_vm12 = vweird.f32 %v916_v13 }
 0x688   :  { %v1019_v52 = vadd.f32 %v1017_v6, %v989_v16  ;;  %v822_v2 = vmul.f32 %v821_v25, %v820_v9  ;;  %v927_v25 = vstv %s3568_s25  ;;  %s4736_s25 = sld [smem:[#allocation9 + $0x1e]] }
 0x68a   :  { %v1020_v50 = vmul.f32 0.001953125, %v1019_v52  ;;  %1147 = vperm.xlu2 %3660, %v822_v2  }
 0x68c   :  { %v3664_v57 = vpop.eup %3663  ;;  %v1022_v41 = vadd.f32 1e-05, %v1020_v50 }
 0x68d   :  { %v918_v8 = vmul.f32 %v3664_v57, %v916_v13  ;;  %v1121_v32 = vpop.xlane.xlu0 %1120  ;;  %vm924_vm11 = vweird.f32 %v3664_v57 }
 0x68e   :  { %3665 = vrsqrt.f32 %v1022_v41  ;;  %v1123_v30 = vrot.slane %v1121_v32, 4  ;;  %vm925_vm13 = vmor %vm923_vm12, %vm924_vm11  ;;  %vm1029_vm10 = vweird.f32 %v1022_v41 }
 0x68f   :  { %v919_v29 = vmul.f32 %v3664_v57, %v918_v8 }
 0x690   :  { %v1125_v28 = vadd.f32 %v1123_v30, %v1095_v35  ;;  %v1033_v30 = vstv %s3570_s26  ;;  %s4744_s26 = sld [smem:[#allocation9 + $0x4]] }
 0x691   :  { %v920_v12 = vmul.f32 0.5, %v919_v29 }
 0x692   :  { %v1126_v21 = vmul.f32 0.001953125, %v1125_v28 }
 0x693   :  { %v921_v27 = vsub.f32 1.5, %v920_v12 }
 0x694   :  { %v3666_v62 = vpop.eup %3665  ;;  %v1128_v44 = vadd.f32 1e-05, %v1126_v21 }
 0x695   :  { %v1024_v63 = vmul.f32 %v3666_v62, %v1022_v41  ;;  %v922_v31 = vmul.f32 %v3664_v57, %v921_v27  ;;  %vm1030_vm15 = vweird.f32 %v3666_v62  ;;  %v1139_v27 = vstv %s3572_s28  ;;  %s4746_s28 = sld [smem:[#allocation9 + $0xc]] }
 0x696   :  { %3667 = vrsqrt.f32 %v1128_v44  ;;  %vm1031_vm9 = vmor %vm1029_vm10, %vm1030_vm15  ;;  %vm1135_vm12 = vweird.f32 %v1128_v44  ;;  %vm5733_vm15 = vcmask 1044484  }
 0x697   :  { %v1025_v50 = vmul.f32 %v3666_v62, %v1024_v63  ;;  %v926_v6 = vsel %vm925_vm13, %v3664_v57, %v922_v31  ;;  %v1143_v31 = vstv %s3573_s29  ;;  %s4749_s29 = sld [smem:[#allocation9 + $0x14]] }
 0x698   :  { %v928_v16 = vmul.f32 %v927_v25, %v926_v6  ;;  %v825_v6 = vstv %s823_s30  ;;  %s4751_s30 = sld [smem:[#allocation9 + $0x1c]] }
 0x699   :  { %v1026_v9 = vmul.f32 0.5, %v1025_v50 }
 0x69a   :  { %1186 = vperm.xlu1 %3659, %v928_v16  }
 0x69b   :  { %v1027_v52 = vsub.f32 1.5, %v1026_v9 }
 0x69c   :  { %v3668_v35 = vpop.eup %3667 }
 0x69d   :  { %v1130_v8 = vmul.f32 %v3668_v35, %v1128_v44  ;;  %v1028_v32 = vmul.f32 %v3666_v62, %v1027_v52  ;;  %vm1136_vm11 = vweird.f32 %v3668_v35  ;;  %v930_v52 = vmul.f32 %v928_v16, %v4419_v47 }
 0x69e   :  { %vm1137_vm13 = vmor %vm1135_vm12, %vm1136_vm11  ;;  %v931_v44 = vstv %s3569_s12  ;;  %s4754_s12 = sld [smem:[#allocation9 + $0x7]] }
 0x69f   :  { %v1131_v29 = vmul.f32 %v3668_v35, %v1130_v8  ;;  %v1032_v13 = vsel %vm1031_vm9, %v3666_v62, %v1028_v32  ;;  %v824_v62 = vmul.f32 %v822_v2, %v4416_v10  ;;  %v932_v8 = vsub.f32 %v931_v44, %v930_v52  ;;  %vm5734_vm11 = vmmov %vm5733_vm15 }
 0x6a0   :  { %v1034_v28 = vmul.f32 %v1033_v30, %v1032_v13  ;;  %v1037_v32 = vstv %s3571_s13  ;;  %vm1170_vm9 = vcmask 1041408   ;;  %s4762_s13 = sld [smem:[#allocation9 + $0xf]]  ;;  %vm5735_vm12 = vmmov %vm5734_vm11 }
 0x6a1   :  { %v1132_v12 = vmul.f32 0.5, %v1131_v29  ;;  %v826_v9 = vsub.f32 %v825_v6, %v824_v62 }
 0x6a2   :  { %1220 = vperm.xlu0 %3658, %v1034_v28  }
 0x6a3   :  { %v1133_v21 = vsub.f32 1.5, %v1132_v12 }
 0x6a5   :  { %v1134_v57 = vmul.f32 %v3668_v35, %v1133_v21 }
 0x6a7   :  { %v1138_v63 = vsel %vm1137_vm13, %v3668_v35, %v1134_v57  ;;  %v1036_v35 = vmul.f32 %v1034_v28, %v4422_v22  ;;  %vm5736_vm13 = vmmov %vm5734_vm11 }
 0x6a8   :  { %v1140_v41 = vmul.f32 %v1139_v27, %v1138_v63 }
 0x6a9   :  { %v1038_v30 = vsub.f32 %v1037_v32, %v1036_v35 }
 0x6aa   :  { %1254 = vperm.xlu2 %3660, %v1140_v41   ;;  %v1142_v25 = vmul.f32 %v1140_v41, %v4425_v58 }
 0x6ac   :  { %v1144_v50 = vsub.f32 %v1143_v31, %v1142_v25 }
 0x6ae   :  { %1262 = vperm.xlu1 %3659, %v1144_v50  }
 0x6b2   :  { %1155 = vperm.xlu2 %3660, %v826_v9  }
 0x6ba   :  { %1194 = vperm.xlu2 %3660, %v932_v8  }
 0x6c2   :  { %1228 = vperm.xlu2 %3660, %v1038_v30  }
 0x6e4   :  { %v1148_v58 = vpop.permute.xlu2 %1147 }
 0x6e5   :  { %v1286_v2 = vrot.slane %v1148_v58, 4  ;;  %v1151_v10 = vmul.f32 %v1148_v58, %v4224_v55  ;;  %v1152_v13 = vmul.f32 %v1148_v58, %v4179_v59  ;;  %v1150_v63 = vmul.f32 %v1148_v58, %v4251_v19 }
 0x6e7   :  { %v1288_v47 = vmul.f32 %v1286_v2, %v4251_v19  ;;  %v1289_v16 = vmul.f32 %v1286_v2, %v4224_v55  ;;  %v1290_v57 = vmul.f32 %v1286_v2, %v4179_v59 }
 0x704   :  { %v4522_v29 = vpop.permute.xlu2 %1254 }
 0x70c   :  { %v1156_v12 = vpop.permute.xlu2 %1155  ;;  %v1187_v21 = vpop.permute.xlu1 %1186 }
 0x70d   :  { %v1159_v22 = vadd.f32 %v1156_v12, %v1151_v10  ;;  %v1291_v28 = vrot.slane %v1156_v12, 4  ;;  %v1160_v27 = vadd.f32 %v1156_v12, %v1152_v13  ;;  %v1315_v41 = vrot.slane %v1187_v21, 4 }
 0x70e   :  { %v1158_v62 = vadd.f32 %v1156_v12, %v1150_v63  ;;  %v1190_v55 = vmul.f32 %v1187_v21, %v4215_v49  ;;  %v1189_v35 = vmul.f32 %v1187_v21, %v4257_v26  ;;  %v1191_v59 = vmul.f32 %v1187_v21, %v4245_v11 }
 0x70f   :  { %v1293_v31 = vadd.f32 %v1291_v28, %v1288_v47  ;;  %v1294_v25 = vadd.f32 %v1291_v28, %v1289_v16  ;;  %v1295_v50 = vadd.f32 %v1291_v28, %v1290_v57  ;;  %v1162_v6 = vmax.f32 %v1159_v22, 0.0 }
 0x710   :  { %v1163_v8 = vmax.f32 %v1160_v27, 0.0  ;;  %v1317_v32 = vmul.f32 %v1315_v41, %v4257_v26  ;;  %v1318_v30 = vmul.f32 %v1315_v41, %v4215_v49  ;;  %v1319_v13 = vmul.f32 %v1315_v41, %v4245_v11 }
 0x711   :  { %v1296_v9 = vmax.f32 %v1293_v31, 0.0  ;;  %v1297_v52 = vmax.f32 %v1294_v25, 0.0  ;;  %v1298_v44 = vmax.f32 %v1295_v50, 0.0  ;;  %v1167_v10 = vrot.slane %v1162_v6, 7 }
 0x712   :  { %v1161_v47 = vmax.f32 %v1158_v62, 0.0  ;;  %v1168_v16 = vrot.slane %v1163_v8, 6 }
 0x713   :  { %1302 = vst [vmem:[#allocation1] sm:$0xff] %v1296_v9 }
 0x714   :  { %v1195_v19 = vpop.permute.xlu2 %1194  ;;  %1303 = vst [vmem:[#allocation1 + $0x9] sm:$0xff] %v1297_v52  ;;  %v1221_v26 = vpop.permute.xlu0 %1220  ;;  %v1169_v31 = vsel %vm732_vm14, %v1161_v47, %v1167_v10 }
 0x715   :  { %v1198_v58 = vadd.f32 %v1195_v19, %v1190_v55  ;;  %v1320_v2 = vrot.slane %v1195_v19, 4  ;;  %1304 = vst [vmem:[#allocation1 + $0x12] sm:$0xff] %v1298_v44  ;;  %v1199_v12 = vadd.f32 %v1195_v19, %v1191_v59  ;;  %v1197_v57 = vadd.f32 %v1195_v19, %v1189_v35 }
 0x716   :  { %v1344_v25 = vrot.slane %v1221_v26, 4  ;;  %v1171_v50 = vsel %vm1170_vm9, %v1169_v31, %v1168_v16  ;;  %v1224_v41 = vmul.f32 %v1221_v26, %v4259_v33  ;;  %v1225_v62 = vmul.f32 %v1221_v26, %v4220_v43 }
 0x717   :  { %v1201_v22 = vmax.f32 %v1198_v58, 0.0  ;;  %v1322_v21 = vadd.f32 %v1320_v2, %v1317_v32  ;;  %v1323_v28 = vadd.f32 %v1320_v2, %v1318_v30  ;;  %v1324_v27 = vadd.f32 %v1320_v2, %v1319_v13  ;;  %1172 = vrot.lane.b32.xlu2 %v1171_v50, %s3806_s8 }
 0x718   :  { %v1202_v6 = vmax.f32 %v1199_v12, 0.0  ;;  %v1200_v9 = vmax.f32 %v1197_v57, 0.0  ;;  %v1223_v44 = vmul.f32 %v1221_v26, %v4249_v18  ;;  %v1257_v58 = vmul.f32 %v4522_v29, %v4369_v56 }
 0x719   :  { %v1206_v63 = vrot.slane %v1201_v22, 7  ;;  %v1325_v49 = vmax.f32 %v1322_v21, 0.0  ;;  %v1326_v11 = vmax.f32 %v1323_v28, 0.0  ;;  %v1327_v52 = vmax.f32 %v1324_v27, 0.0 }
 0x71a   :  { %v1207_v55 = vrot.slane %v1202_v6, 6  ;;  %v1258_v2 = vmul.f32 %v4522_v29, %v4374_v34  ;;  %v1346_v10 = vmul.f32 %v1344_v25, %v4249_v18  ;;  %v1259_v13 = vmul.f32 %v4522_v29, %v4354_v40 }
 0x71b   :  { %v1208_v19 = vsel %vm732_vm14, %v1200_v9, %v1206_v63  ;;  %v1347_v12 = vmul.f32 %v1344_v25, %v4259_v33  ;;  %v1348_v47 = vmul.f32 %v1344_v25, %v4220_v43 }
 0x71c   :  { %v1229_v8 = vpop.permute.xlu2 %1228  ;;  %v1306_v35 = vld [vmem:[#allocation1 + $0x4] ss:$9 sm:$0xff]  ;;  %v1209_v22 = vsel %vm1170_vm9, %v1208_v19, %v1207_v55 }
 0x71d   :  { %v1232_v59 = vadd.f32 %v1229_v8, %v1224_v41  ;;  %v1349_v32 = vrot.slane %v1229_v8, 4  ;;  %v1233_v30 = vadd.f32 %v1229_v8, %v1225_v62  ;;  %1331 = vst [vmem:[#allocation1] sm:$0xff] %v1325_v49  ;;  %1307 = vrot.lane.b32.xlu0 %v1306_v35, %s3806_s8  ;;  %v1231_v16 = vadd.f32 %v1229_v8, %v1223_v44 }
 0x71e   :  { %1332 = vst [vmem:[#allocation1 + $0x9] sm:$0xff] %v1326_v11  ;;  %v1373_v62 = vrot.slane %v4522_v29, 4 }
 0x71f   :  { %1333 = vst [vmem:[#allocation1 + $0x12] sm:$0xff] %v1327_v52  ;;  %v1351_v57 = vadd.f32 %v1349_v32, %v1346_v10  ;;  %v1235_v28 = vmax.f32 %v1232_v59, 0.0  ;;  %v1236_v26 = vmax.f32 %v1233_v30, 0.0  ;;  %v1352_v27 = vadd.f32 %v1349_v32, %v1347_v12  ;;  %1210 = vrot.lane.b32.xlu2 %v1209_v22, %s3806_s8 }
 0x720   :  { %v1263_v21 = vpop.permute.xlu1 %1262  ;;  %v1353_v18 = vadd.f32 %v1349_v32, %v1348_v47  ;;  %v1234_v6 = vmax.f32 %v1231_v16, 0.0  ;;  %v1376_v29 = vmul.f32 %v1373_v62, %v4374_v34  ;;  %v1177_v34 = vlaneseq }
 0x721   :  { %v1265_v63 = vadd.f32 %v1263_v21, %v1257_v58  ;;  %v1266_v31 = vadd.f32 %v1263_v21, %v1258_v2  ;;  %v1267_v49 = vadd.f32 %v1263_v21, %v1259_v13  ;;  %v1240_v50 = vrot.slane %v1235_v28, 7 }
 0x722   :  { %v1241_v33 = vrot.slane %v1236_v26, 6  ;;  %v1354_v9 = vmax.f32 %v1351_v57, 0.0  ;;  %v1355_v25 = vmax.f32 %v1352_v27, 0.0  ;;  %v1356_v52 = vmax.f32 %v1353_v18, 0.0 }
 0x723   :  { %v1269_v43 = vmax.f32 %v1266_v31, 0.0  ;;  %v1242_v11 = vsel %vm732_vm14, %v1234_v6, %v1240_v50  ;;  %v1270_v41 = vmax.f32 %v1267_v49, 0.0  ;;  %v1268_v44 = vmax.f32 %v1265_v63, 0.0 }
 0x724   :  { %v1243_v35 = vsel %vm1170_vm9, %v1242_v11, %v1241_v33  ;;  %v1378_v32 = vrot.slane %v1263_v21, 4  ;;  %v1375_v58 = vmul.f32 %v1373_v62, %v4369_v56  ;;  %v1377_v2 = vmul.f32 %v1373_v62, %v4354_v40 }
 0x725   :  { %v1274_v8 = vrot.slane %v1269_v43, 7  ;;  %v1275_v59 = vrot.slane %v1270_v41, 6  ;;  %1244 = vrot.lane.b32.xlu1 %v1243_v35, %s3806_s8  ;;  %vm4568_vm10 = vcmp.lt.s32.totalorder %v1177_v34, 256  ;;  %v5711_v40 = vmov 0 }
 0x726   :  { %v1335_v55 = vld [vmem:[#allocation1 + $0x4] ss:$9 sm:$0xff]  ;;  %v1380_v10 = vadd.f32 %v1378_v32, %v1375_v58  ;;  %v1381_v13 = vadd.f32 %v1378_v32, %v1376_v29  ;;  %v1382_v12 = vadd.f32 %v1378_v32, %v1377_v2  ;;  %v5712_v40 = vsel %vm4568_vm10, 4294967295, %v5711_v40 }
 0x727   :  { %1360 = vst [vmem:[#allocation1] sm:$0xff] %v1354_v9  ;;  %v1276_v19 = vsel %vm732_vm14, %v1268_v44, %v1274_v8 }
 0x728   :  { %1361 = vst [vmem:[#allocation1 + $0x9] sm:$0xff] %v1355_v25  ;;  %v1277_v30 = vsel %vm1170_vm9, %v1276_v19, %v1275_v59  ;;  %v1383_v47 = vmax.f32 %v1380_v10, 0.0  ;;  %v1384_v57 = vmax.f32 %v1381_v13, 0.0  ;;  %v1385_v22 = vmax.f32 %v1382_v12, 0.0 }
 0x729   :  { %1362 = vst [vmem:[#allocation1 + $0x12] sm:$0xff] %v1356_v52  ;;  %1278 = vrot.lane.b32.xlu2 %v1277_v30, %s3806_s8  ;;  %v1448_v10 = vsel %vm167_vm0, %v4202_v15, %v4309_v0 }
 0x72a   :  { %5713 = vst [vmem:[#allocation28_spill] sm:$0xff] %v5712_v40 }
 0x72d   :  { %1336 = vrot.lane.b32.xlu1 %v1335_v55, %s3806_s8 }
 0x730   :  { %v1364_v16 = vld [vmem:[#allocation1 + $0x4] ss:$9 sm:$0xff] }
 0x731   :  { %1389 = vst [vmem:[#allocation1] sm:$0xff] %v1383_v47  ;;  %1365 = vrot.lane.b32.xlu2 %v1364_v16, %s3806_s8 }
 0x732   :  { %1390 = vst [vmem:[#allocation1 + $0x9] sm:$0xff] %v1384_v57 }
 0x733   :  { %1391 = vst [vmem:[#allocation1 + $0x12] sm:$0xff] %v1385_v22 }
 0x73a   :  { %v1393_v56 = vld [vmem:[#allocation1 + $0x4] ss:$9 sm:$0xff] }
 0x73b   :  { %1394 = vrot.lane.b32.xlu0 %v1393_v56, %s3806_s8 }
 0x771   :  { %v1173_v21 = vpop.permute.xlu2 %1172 }
 0x772   :  { %v1174_v28 = vrot.slane %v1173_v21, 1 }
 0x774   :  { %v1175_v26 = vsel %vm469_vm6, %v1173_v21, %v1174_v28 }
 0x775   :  { %1182 = vst.msk [vmem:[#allocation2 + $0x8] ss:$8 sm:$0x3] %vm4568_vm10, %v1175_v26 }
 0x779   :  { %v1211_v27 = vpop.permute.xlu2 %1210 }
 0x77a   :  { %v1212_v18 = vrot.slane %v1211_v27, 1 }
 0x77c   :  { %v1213_v63 = vsel %vm469_vm6, %v1211_v27, %v1212_v18  ;;  %v3581_v27 = vld [vmem:[%s5684_s4 + $0x8] sm:$0x3]  ;;  %s4679_s4 = sld [smem:[#allocation9 + $0x2]] }
 0x77d   :  { %1216 = vst.msk [vmem:[#allocation2 + $0x9] ss:$8 sm:$0x3] %vm4568_vm10, %v1213_v63  ;;  %v1571_v18 = vperm.slane %v3581_v27, 1  ;;  %v1570_v63 = vperm.slane %v3581_v27, 0 }
 0x783   :  { %v1279_v31 = vpop.permute.xlu2 %1278 }
 0x784   :  { %v1280_v49 = vrot.slane %v1279_v31, 1 }
 0x786   :  { %v1281_v50 = vsel %vm469_vm6, %v1279_v31, %v1280_v49 }
 0x787   :  { %1284 = vst.msk [vmem:[#allocation2 + $0xb] ss:$8 sm:$0x3] %vm4568_vm10, %v1281_v50 }
 0x78b   :  { %v1366_v6 = vpop.permute.xlu2 %1365 }
 0x78c   :  { %v1367_v33 = vrot.slane %v1366_v6, 1 }
 0x78e   :  { %v1368_v9 = vsel %vm469_vm6, %v1366_v6, %v1367_v33  ;;  %v1611_v33 = vsel %vm334_vm3, %v4378_v23, %v4321_v7  ;;  %v1697_v7 = vsel %vm424_vm5, %v4382_v36, %v4344_v20  ;;  %vm5725_vm3 = vcmask 777216  }
 0x78f   :  { %v1308_v43 = vpop.permute.xlu0 %1307  ;;  %1371 = vst.msk [vmem:[#allocation2 + $0xe] ss:$8 sm:$0x3] %vm4568_vm10, %v1368_v9  ;;  %vm5728_vm5 = vcmask 769024  }
 0x790   :  { %v1309_v25 = vrot.slane %v1308_v43, 1 }
 0x792   :  { %v1310_v11 = vsel %vm469_vm6, %v1308_v43, %v1309_v25  ;;  %v1654_v43 = vsel %vm379_vm4, %v4380_v24, %v4333_v53  ;;  %v1740_v53 = vsel %vm469_vm6, %v4384_v42, %v4432_v60 }
 0x793   :  { %1313 = vst.msk [vmem:[#allocation2 + $0xc] ss:$8 sm:$0x3] %vm4568_vm10, %v1310_v11 }
 0x797   :  { %v1245_v41 = vpop.permute.xlu1 %1244 }
 0x798   :  { %v1246_v62 = vrot.slane %v1245_v41, 1 }
 0x79a   :  { %v1247_v52 = vsel %vm469_vm6, %v1245_v41, %v1246_v62 }
 0x79b   :  { %1250 = vst.msk [vmem:[#allocation2 + $0xa] ss:$8 sm:$0x3] %vm4568_vm10, %v1247_v52 }
 0x79f   :  { %v1337_v44 = vpop.permute.xlu1 %1336 }
 0x7a0   :  { %v1338_v8 = vrot.slane %v1337_v44, 1 }
 0x7a2   :  { %v1339_v55 = vsel %vm469_vm6, %v1337_v44, %v1338_v8  ;;  %v5714_v44 = vld [vmem:[#allocation20_spill] sm:$0xff] }
 0x7a3   :  { %1342 = vst.msk [vmem:[#allocation2 + $0xd] ss:$8 sm:$0x3] %vm4568_vm10, %v1339_v55 }
 0x7ad   :  { %v1395_v35 = vpop.permute.xlu0 %1394 }
 0x7ae   :  { %v1396_v59 = vrot.slane %v1395_v35, 1 }
 0x7b0   :  { %v1397_v32 = vsel %vm469_vm6, %v1395_v35, %v1396_v59 }
 0x7b1   :  { %1400 = vst.msk [vmem:[#allocation2 + $0xf] ss:$8 sm:$0x3] %vm4568_vm10, %v1397_v32  ;;  %v5716_v32 = vld [vmem:[#allocation23_spill] sm:$0xff] }
 0x7b8   :  { %v4596_v19 = vld [vmem:[#allocation2 + $0x8] sm:$0xff]  ;;  %v4598_v30 = vld [vmem:[#allocation2 + $0x10] sm:$0xff] }
 0x7b9   :  { %v1599_v58 = vmul.f32 %v4319_v5, %v4596_v19  ;;  %v1438_v29 = vmul.f32 %v4200_v14, %v4598_v30  ;;  %v1437_v2 = vmul.f32 %v4596_v19, %v4200_v14  ;;  %v1642_v16 = vmul.f32 %v4330_v37, %v4596_v19 }
 0x7ba   :  { %v1481_v14 = vmul.f32 %v4267_v45, %v4598_v30  ;;  %v1480_v15 = vmul.f32 %v4596_v19, %v4267_v45  ;;  %v1685_v34 = vmul.f32 %v4341_v17, %v4596_v19  ;;  %v1524_v45 = vmul.f32 %v4281_v51, %v4598_v30 }
 0x7bb   :  { %v1615_v13 = vmul.f32 %v4378_v23, %v1599_v58  ;;  %v1454_v12 = vmul.f32 %v4309_v0, %v1438_v29  ;;  %v1453_v47 = vmul.f32 %v1448_v10, %v1437_v2  ;;  %v1491_v0 = vsel %vm212_vm1, %v4270_v38, %v4311_v1 }
 0x7bc   :  { %v1658_v57 = vmul.f32 %v4380_v24, %v1642_v16  ;;  %v1497_v22 = vmul.f32 %v4311_v1, %v1481_v14  ;;  %v1496_v56 = vmul.f32 %v1491_v0, %v1480_v15  ;;  %v1523_v38 = vmul.f32 %v4596_v19, %v4281_v51 }
 0x7bd   :  { %1621 = vrot.lane.b32.xlu1 %v1615_v13, %s3809_s3  ;;  %1462 = vrot.lane.b32.xlu0 %v1454_v12, %s3802_s14  ;;  %v1534_v1 = vsel %vm184_vm2, %v4284_v54, %v4315_v3  ;;  %v1701_v21 = vmul.f32 %v4382_v36, %v1685_v34  ;;  %v1540_v28 = vmul.f32 %v4315_v3, %v1524_v45  ;;  %vm5718_vm1 = vcmask 900096  }
 0x7be   :  { %1460 = vrot.lane.b32.xlu2 %v1453_v47, %s3802_s14  ;;  %v1539_v26 = vmul.f32 %v1534_v1, %v1523_v38  ;;  %v1728_v51 = vmul.f32 %v4386_v46, %v4596_v19  ;;  %v1566_v54 = vmul.f32 %v4317_v4, %v4598_v30  ;;  %v1565_v3 = vmul.f32 %v4596_v19, %v4317_v4  ;;  %v5717_v47 = vld [vmem:[#allocation22_spill] sm:$0xff]  ;;  %s4769_s14 = sld [smem:[#allocation9 + $0x17]] }
 0x7bf   :  { %v1600_v6 = vmul.f32 %v4319_v5, %v4598_v30  ;;  %v1643_v4 = vmul.f32 %v4330_v37, %v4598_v30  ;;  %v1686_v5 = vmul.f32 %v4341_v17, %v4598_v30  ;;  %v1729_v37 = vmul.f32 %v4386_v46, %v4598_v30 }
 0x7c0   :  { %v1744_v31 = vmul.f32 %v4384_v42, %v1728_v51  ;;  %v1575_v49 = vmul.f32 %v1571_v18, %v1566_v54  ;;  %v1574_v50 = vmul.f32 %v1570_v63, %v1565_v3  ;;  %v1411_v42 = vmul.f32 %v4428_v61, %v4160_v48  ;;  %v5715_v61 = vld [vmem:[#allocation21_spill] sm:$0xff]  ;;  %v5719_v54 = vld [vmem:[#allocation24_spill] sm:$0xff] }
 0x7c1   :  { %v1616_v9 = vmul.f32 %v1611_v33, %v1600_v6  ;;  %v1659_v25 = vmul.f32 %v1654_v43, %v1643_v4  ;;  %v1702_v23 = vmul.f32 %v1697_v7, %v1686_v5  ;;  %v1745_v24 = vmul.f32 %v1740_v53, %v1729_v37 }
 0x7c2   :  { %v1426_v8 = vmul.f32 %v5714_v44, %v1411_v42  ;;  %v1413_v29 = vmul.f32 %v4160_v48, %v4598_v30  ;;  %v1412_v2 = vmul.f32 %v4596_v19, %v4160_v48  ;;  %v1422_v16 = vsel %vm140_vm7, %v5714_v44, %v5717_v47 }
 0x7c3   :  { %v4757_v1 = vstv %s4679_s4  ;;  %s4789_s4 = sld [smem:[#allocation9 + $0x5]]  ;;  %v4793_v7 = vstv %s4695_s15  ;;  %v4801_v53 = vstv %s4701_s16  ;;  %v4825_v44 = vstv %s4722_s20 }
 0x7c4   :  { %v1428_v30 = vmul.f32 %v5717_v47, %v1413_v29  ;;  %v1427_v15 = vmul.f32 %v1422_v16, %v1412_v2  ;;  %v4845_v29 = vstv %s4746_s28  ;;  %s3622_s15 = sld [smem:[#allocation12 + $0x1]]  ;;  %s3521_s28 = sshll.u32 %s5691_s11, 4  ;;  %s3522_s28 = int_to_ptr.hbm [resolvable:$true] %s3521_s28 }
 0x7c5   :  { %1664 = vrot.lane.b32.xlu1 %v1658_v57, %s3810_s19  ;;  %1505 = vrot.lane.b32.xlu0 %v1497_v22, %s3808_s0  ;;  %s3624_s16 = sld [smem:[#allocation12 + $0x2]] }
 0x7c6   :  { %1503 = vrot.lane.b32.xlu2 %v1496_v56, %s3808_s0  ;;  %s4779_s0 = sld [smem:[#allocation9 + $0x1f]] }
 0x7c7   :  { %s3633_s20 = sld [smem:[#allocation11 + $0x7]] }
 0x7cd   :  { %1707 = vrot.lane.b32.xlu1 %v1701_v21, %s3811_s10  ;;  %1548 = vrot.lane.b32.xlu0 %v1540_v28, %s3800_s23 }
 0x7ce   :  { %1546 = vrot.lane.b32.xlu2 %v1539_v26, %s3800_s23  ;;  %s4683_s23 = sld [smem:[#allocation9 + $0x12]] }
 0x7d4   :  { %v4767_v51 = vstv %s4683_s23  ;;  %s4809_s23 = sld [smem:[#allocation9 + $0x15]] }
 0x7d5   :  { %1750 = vrot.lane.b32.xlu1 %v1744_v31, %s3812_s21  ;;  %1580 = vrot.lane.b32.xlu0 %v1575_v49, %s3799_s22 }
 0x7d6   :  { %1578 = vrot.lane.b32.xlu2 %v1574_v50, %s3799_s22  ;;  %s4681_s22 = sld [smem:[#allocation9 + $0xa]] }
 0x7dc   :  { %v4760_v21 = vstv %s4681_s22  ;;  %s4798_s22 = sld [smem:[#allocation9 + $0xd]] }
 0x7de   :  { %1623 = vrot.lane.b32.xlu2 %v1616_v9, %s3809_s3  ;;  %s4685_s3 = sld [smem:[#allocation9 + $0x1a]] }
 0x7e4   :  { %v4774_v31 = vstv %s4685_s3  ;;  %s4952_s3 = sld [smem:[#allocation9 + $0x1d]] }
 0x7e5   :  { %5721 = vst [vmem:[#allocation20_spill] sm:$0xff] %v4774_v31 }
 0x7e6   :  { %1666 = vrot.lane.b32.xlu2 %v1659_v25, %s3810_s19  ;;  %s4689_s19 = sld [smem:[#allocation9 + $0x1]] }
 0x7ec   :  { %v4777_v49 = vstv %s4689_s19  ;;  %s2300_s19 = sld [smem:[#allocation11]] }
 0x7ee   :  { %1709 = vrot.lane.b32.xlu2 %v1702_v23, %s3811_s10  ;;  %s4691_s10 = sld [smem:[#allocation9 + $0x9]]  ;;  %v4796_v23 = vstv %s4699_s18 }
 0x7ef   :  { %s3623_s18 = sld [smem:[#allocation11 + $0x2]] }
 0x7f4   :  { %v4784_v4 = vstv %s4691_s10  ;;  %s2314_s10 = sld [smem:[#allocation12]] }
 0x7f6   :  { %1752 = vrot.lane.b32.xlu2 %v1745_v24, %s3812_s21  ;;  %s4693_s21 = sld [smem:[#allocation9 + $0x11]]  ;;  %v4804_v24 = vstv %s4703_s17 }
 0x7f7   :  { %s3625_s17 = sld [smem:[#allocation11 + $0x3]] }
 0x7fc   :  { %v4787_v43 = vstv %s4693_s21  ;;  %s3621_s21 = sld [smem:[#allocation11 + $0x1]] }
 0x818   :  { %v1461_v11 = vpop.permute.xlu2 %1460 }
 0x819   :  { %v1464_v60 = vsel %vm184_vm2, %v4265_v39, %v1461_v11 }
 0x81a   :  { %v1469_v59 = vadd.f32 %v1464_v60, %v1426_v8  ;;  %v5724_v8 = vld [vmem:[#allocation26_spill] sm:$0xff] }
 0x820   :  { %v1504_v41 = vpop.permute.xlu2 %1503 }
 0x821   :  { %v1507_v35 = vsel %vm229_vm8, %v5715_v61, %v1504_v41  ;;  %v4830_v61 = vstv %s4726_s9  ;;  %s3634_s9 = sld [smem:[#allocation12 + $0x7]] }
 0x822   :  { %v1512_v58 = vadd.f32 %v1507_v35, %v1469_v59  ;;  %v4833_v35 = vstv %s4730_s24  ;;  %v4836_v59 = vstv %s4732_s6  ;;  %s5498_s24 = sld [smem:[#allocation11 + $0x5]] }
 0x823   :  { %s5510_s6 = sld [smem:[#allocation12 + $0x5]] }
 0x828   :  { %v1547_v17 = vpop.permute.xlu2 %1546 }
 0x829   :  { %v1550_v39 = vsel %vm167_vm0, %v5716_v32, %v1547_v17 }
 0x82a   :  { %v1555_v10 = vadd.f32 %v1550_v39, %v1512_v58  ;;  %v4839_v39 = vstv %s4736_s25  ;;  %v4842_v58 = vstv %s4744_s26  ;;  %s5517_s25 = sld [smem:[#allocation12 + $0x6]] }
 0x82f   :  { %v1622_v20 = vpop.permute.xlu1 %1621  ;;  %v1463_v36 = vpop.permute.xlu0 %1462 }
 0x830   :  { %v4687_v46 = vpop.permute.xlu2 %1578  ;;  %v1465_v14 = vsel %vm184_vm2, %v1461_v11, %v1463_v36  ;;  %v1471_v0 = vadd.f32 %v1463_v36, %v1428_v30  ;;  %v4807_v11 = vstv %s4709_s5  ;;  %vm5723_vm2 = vcmask 785408   ;;  %s3626_s5 = sld [smem:[#allocation12 + $0x3]] }
 0x831   :  { %v1586_v48 = vadd.f32 %v4687_v46, %v1555_v10  ;;  %v1470_v22 = vadd.f32 %v1465_v14, %v1427_v15  ;;  %v4816_v36 = vstv %s4712_s7  ;;  %vm5726_vm4 = vmmov %vm5723_vm2  ;;  %v4850_v10 = vstv %s4749_s29  ;;  %s3627_s7 = sld [smem:[#allocation11 + $0x4]]  ;;  %s3813_s29 = smov [#allocation14]  }
 0x832   :  { %v4860_v14 = vstv %s4754_s12  ;;  %v4866_v15 = vstv %s4769_s14  ;;  %s3814_s12 = smov 256  }
 0x833   :  { %v1632_v56 = vadd.f32 %v1622_v20, %v1586_v48  ;;  %v4863_v48 = vstv %s4762_s13 }
 0x837   :  { %v4707_v62 = vpop.permute.xlu1 %1664  ;;  %v1506_v52 = vpop.permute.xlu0 %1505 }
 0x838   :  { %v1624_v55 = vpop.permute.xlu2 %1623  ;;  %v1508_v57 = vsel %vm229_vm8, %v1504_v41, %v1506_v52  ;;  %v1514_v34 = vadd.f32 %v1506_v52, %v1471_v0  ;;  %v1675_v28 = vadd.f32 %v4707_v62, %v1632_v56  ;;  %v5722_v41 = vld [vmem:[#allocation25_spill] sm:$0xff]  ;;  %v4822_v52 = vstv %s4718_s2  ;;  %v5727_v0 = vld [vmem:[#allocation27_spill] sm:$0xff]  ;;  %vm5730_vm8 = vmmov %vm5728_vm5  ;;  %s3631_s2 = sld [smem:[#allocation11 + $0x6]] }
 0x839   :  { %v1513_v38 = vadd.f32 %v1508_v57, %v1470_v22  ;;  %v1627_v26 = vsel %vm5718_vm1, %v1622_v20, %v1624_v55  ;;  %v4874_v57 = vstv %s4789_s4  ;;  %v4877_v22 = vstv %s4798_s22 }
 0x83f   :  { %v4734_v13 = vpop.permute.xlu1 %1707  ;;  %v1549_v12 = vpop.permute.xlu0 %1548 }
 0x840   :  { %v1667_v19 = vpop.permute.xlu2 %1666  ;;  %v1551_v45 = vsel %vm167_vm0, %v1547_v17, %v1549_v12  ;;  %v1557_v27 = vadd.f32 %v1549_v12, %v1514_v34  ;;  %vm5720_vm0 = vmmov %vm5718_vm1  ;;  %v1718_v25 = vadd.f32 %v4734_v13, %v1675_v28  ;;  %v4853_v12 = vstv %s4751_s30  ;;  %s3519_s30 = sshll.u32 %s3813_s29, 4  ;;  %s3520_s30 = int_to_ptr.vmem [resolvable:$true] %s3519_s30 }
 0x841   :  { %v1628_v18 = vsel %vm5720_vm0, %v1624_v55, %v5719_v54  ;;  %v1556_v3 = vadd.f32 %v1551_v45, %v1513_v38  ;;  %v1671_v17 = vsel %vm5723_vm2, %v1667_v19, %v5722_v41  ;;  %v1670_v2 = vsel %vm5726_vm4, %v4707_v62, %v1667_v19  ;;  %vm5737_vm1 = vmmov %vm5734_vm11 }
 0x842   :  { %v4871_v19 = vstv %s4779_s0  ;;  %v4888_v38 = vstv %s4809_s23  ;;  %vm5738_vm0 = vmmov %vm5737_vm1 }
 0x843   :  { %vm5739_vm2 = vmmov %vm5738_vm0 }
 0x844   :  { %vm5741_vm4 = vmmov %vm5738_vm0 }
 0x847   :  { %v1581_v63 = vpop.permute.xlu0 %1580  ;;  %v1751_v50 = vpop.permute.xlu1 %1750 }
 0x848   :  { %v1582_v6 = vsel %vm140_vm7, %v4687_v46, %v1581_v63  ;;  %v1588_v33 = vadd.f32 %v1581_v63, %v1557_v27  ;;  %v1710_v9 = vpop.permute.xlu2 %1709  ;;  %v4813_v20 = vadd.f32 %v1751_v50, %v1718_v25  ;;  %v4819_v46 = vstv %s4716_s1  ;;  %vm5729_vm7 = vmmov %vm5725_vm3  ;;  %s3628_s1 = sld [smem:[#allocation12 + $0x4]] }
 0x849   :  { %v1587_v5 = vadd.f32 %v1582_v6, %v1556_v3  ;;  %v1714_v55 = vsel %vm5725_vm3, %v1710_v9, %v5724_v8  ;;  %v1713_v56 = vsel %vm5729_vm7, %v4734_v13, %v1710_v9  ;;  %vm5740_vm3 = vmmov %vm5738_vm0 }
 0x84a   :  { %v1634_v37 = vadd.f32 %v1628_v18, %v1588_v33  ;;  %v4857_v47 = vmul.f32 %v4801_v53, %v4813_v20  ;;  %v4885_v45 = vmul.f32 %v4796_v23, %v4813_v20  ;;  %v4897_v27 = vmul.f32 %v4807_v11, %v4813_v20  ;;  %vm5743_vm7 = vmmov %vm5738_vm0 }
 0x84b   :  { %v1633_v42 = vadd.f32 %v1627_v26, %v1587_v5  ;;  %v4893_v26 = vmul.f32 %v4804_v24, %v4813_v20  ;;  %v4901_v13 = vmul.f32 %v4784_v4, %v4813_v20 }
 0x84c   :  { %v1677_v60 = vadd.f32 %v1671_v17, %v1634_v37 }
 0x84d   :  { %v1676_v16 = vadd.f32 %v1670_v2, %v1633_v42 }
 0x84e   :  { %v1720_v32 = vadd.f32 %v1714_v55, %v1677_v60 }
 0x84f   :  { %v1719_v54 = vadd.f32 %v1713_v56, %v1676_v16 }
 0x850   :  { %v1753_v30 = vpop.permute.xlu2 %1752 }
 0x851   :  { %v1757_v62 = vsel %vm5728_vm5, %v1753_v30, %v5727_v0  ;;  %v1756_v6 = vsel %vm5730_vm8, %v1751_v50, %v1753_v30  ;;  %vm5742_vm5 = vmmov %vm5738_vm0 }
 0x852   :  { %v4881_v34 = vadd.f32 %v1757_v62, %v1720_v32  ;;  %vm5744_vm8 = vmmov %vm5738_vm0 }
 0x854   :  { %v1885_v18 = vmul.f32 %v4760_v21, %v4881_v34  ;;  %v1902_v3 = vmul.f32 %v4767_v51, %v4881_v34  ;;  %v1919_v63 = vmul.f32 %v4774_v31, %v4881_v34  ;;  %v1880_v33 = vmul.f32 %v4757_v1, %v4881_v34 }
 0x855   :  { %v1829_v9 = vmul.f32 %v4784_v4, %v4881_v34  ;;  %v1846_v25 = vmul.f32 %v4787_v43, %v4881_v34  ;;  %v1824_v41 = vmul.f32 %v4777_v49, %v4881_v34  ;;  %v1863_v17 = vmul.f32 %v4793_v7, %v4881_v34 }
 0x856   :  { %v1891_v5 = vrot.slane %v1885_v18, 1  ;;  %v1908_v37 = vrot.slane %v1902_v3, 2  ;;  %v1925_v42 = vrot.slane %v1919_v63, 3  ;;  %v1768_v50 = vmul.f32 %v4796_v23, %v4881_v34 }
 0x857   :  { %v1835_v60 = vrot.slane %v1829_v9, 1  ;;  %v1773_v8 = vmul.f32 %v4801_v53, %v4881_v34  ;;  %v1852_v32 = vrot.slane %v1846_v25, 2  ;;  %v1790_v2 = vmul.f32 %v4804_v24, %v4881_v34 }
 0x858   :  { %v1897_v55 = vadd.f32 %v1891_v5, %v1880_v33  ;;  %v1807_v16 = vmul.f32 %v4807_v11, %v4881_v34  ;;  %v1941_v62 = vmul.f32 %v4819_v46, %v4881_v34  ;;  %v1958_v56 = vmul.f32 %v4822_v52, %v4881_v34 }
 0x859   :  { %v1841_v30 = vadd.f32 %v1835_v60, %v1824_v41  ;;  %v1779_v0 = vrot.slane %v1773_v8, 1  ;;  %v1869_v3 = vrot.slane %v1863_v17, 3  ;;  %v1796_v63 = vrot.slane %v1790_v2, 2 }
 0x85a   :  { %v1914_v18 = vadd.f32 %v1908_v37, %v1897_v55  ;;  %v1936_v33 = vmul.f32 %v4816_v36, %v4881_v34  ;;  %v1813_v5 = vrot.slane %v1807_v16, 3  ;;  %v1947_v28 = vrot.slane %v1941_v62, 1 }
 0x85b   :  { %v1858_v9 = vadd.f32 %v1852_v32, %v1841_v30  ;;  %v1785_v25 = vadd.f32 %v1779_v0, %v1768_v50  ;;  %v1964_v41 = vrot.slane %v1958_v56, 2  ;;  %v1975_v60 = vmul.f32 %v4825_v44, %v4881_v34 }
 0x85c   :  { %v4934_v40 = vadd.f32 %v1925_v42, %v1914_v18  ;;  %v2109_v8 = vmul.f32 %v4833_v35, %v4881_v34  ;;  %v1953_v17 = vadd.f32 %v1947_v28, %v1936_v33  ;;  %v2126_v55 = vmul.f32 %v4836_v59, %v4881_v34 }
 0x85d   :  { %v4940_v31 = vadd.f32 %v1869_v3, %v1858_v9  ;;  %v1802_v37 = vadd.f32 %v1796_v63, %v1785_v25  ;;  %v2104_v42 = vmul.f32 %v4830_v61, %v4881_v34  ;;  %v2143_v32 = vmul.f32 %v4839_v39, %v4881_v34 }
 0x85e   :  { %2431 = vrot.lane.b32.xlu2 %v4934_v40, %s3806_s8  ;;  %v2115_v50 = vrot.slane %v2109_v8, 1  ;;  %v1997_v2 = vmul.f32 %v4845_v29, %v4881_v34  ;;  %v1970_v16 = vadd.f32 %v1964_v41, %v1953_v17  ;;  %v1992_v30 = vmul.f32 %v4842_v58, %v4881_v34 }
 0x85f   :  { %2325 = vrot.lane.b32.xlu1 %v4940_v31, %s3806_s8  ;;  %v4956_v28 = vadd.f32 %v1813_v5, %v1802_v37  ;;  %v2014_v0 = vmul.f32 %v4850_v10, %v4881_v34  ;;  %v2132_v56 = vrot.slane %v2126_v55, 2  ;;  %v2031_v3 = vmul.f32 %v4853_v12, %v4881_v34 }
 0x860   :  { %v2121_v62 = vadd.f32 %v2115_v50, %v2104_v42  ;;  %v2003_v18 = vrot.slane %v1997_v2, 1  ;;  %v4964_v63 = vadd.f32 %v1756_v6, %v1719_v54  ;;  %v1981_v33 = vrot.slane %v1975_v60, 3 }
 0x861   :  { %2219 = vrot.lane.b32.xlu0 %v4956_v28, %s3806_s8  ;;  %v2165_v9 = vmul.f32 %v4863_v48, %v4881_v34  ;;  %v5731_v25 = vrot.slane %v4857_v47, 1  ;;  %v2020_v37 = vrot.slane %v2014_v0, 2  ;;  %v2182_v17 = vmul.f32 %v4866_v15, %v4881_v34 }
 0x862   :  { %v2138_v41 = vadd.f32 %v2132_v56, %v2121_v62  ;;  %v2009_v8 = vadd.f32 %v2003_v18, %v1992_v30  ;;  %v2149_v54 = vrot.slane %v2143_v32, 3  ;;  %v2160_v6 = vmul.f32 %v4860_v14, %v4881_v34 }
 0x863   :  { %v1783_v5 = vadd.f32 %v5731_v25, %v4885_v45  ;;  %v2171_v55 = vrot.slane %v2165_v9, 1  ;;  %v2053_v60 = vmul.f32 %v4877_v22, %v4881_v34  ;;  %v4979_v42 = vadd.f32 %v1981_v33, %v1970_v16 }
 0x864   :  { %v2026_v50 = vadd.f32 %v2020_v37, %v2009_v8  ;;  %v2037_v47 = vrot.slane %v2031_v3, 3  ;;  %v2048_v45 = vmul.f32 %v4874_v57, %v4881_v34  ;;  %v4983_v2 = vadd.f32 %v2149_v54, %v2138_v41 }
 0x865   :  { %v2177_v30 = vadd.f32 %v2171_v55, %v2160_v6  ;;  %v2059_v0 = vrot.slane %v2053_v60, 1  ;;  %v2070_v32 = vmul.f32 %v4888_v38, %v4881_v34  ;;  %v2188_v62 = vrot.slane %v2182_v17, 2 }
 0x866   :  { %2537 = vrot.lane.b32.xlu2 %v4979_v42, %s3806_s8  ;;  %v2199_v16 = vmul.f32 %v4871_v19, %v4881_v34  ;;  %v4992_v56 = vstv %s4952_s3  ;;  %v1822_v18 = vmul.f32 %v4777_v49, %v4813_v20  ;;  %v4998_v3 = vadd.f32 %v2037_v47, %v2026_v50 }
 0x867   :  { %2855 = vrot.lane.b32.xlu1 %v4983_v2, %s3806_s8  ;;  %v1794_v33 = vrot.slane %v4893_v26, 2  ;;  %v2065_v9 = vadd.f32 %v2059_v0, %v2048_v45  ;;  %v1828_v25 = vmul.f32 %v4784_v4, %v4964_v63  ;;  %v2194_v41 = vadd.f32 %v2188_v62, %v2177_v30 }
 0x868   :  { %v1833_v8 = vrot.slane %v4901_v13, 1  ;;  %v1844_v37 = vmul.f32 %v4787_v43, %v4813_v20  ;;  %v1772_v17 = vmul.f32 %v4801_v53, %v4964_v63  ;;  %v1811_v6 = vrot.slane %v4897_v27, 3 }
 0x869   :  { %2643 = vrot.lane.b32.xlu0 %v4998_v3, %s3806_s8  ;;  %v1800_v54 = vadd.f32 %v1794_v33, %v1783_v5  ;;  %v2076_v26 = vrot.slane %v2070_v32, 2  ;;  %v2087_v55 = vmul.f32 %v4992_v56, %v4881_v34  ;;  %v2205_v4 = vrot.slane %v2199_v16, 3 }
 0x86a   :  { %v1767_v13 = vmul.f32 %v4796_v23, %v4964_v63  ;;  %v1778_v60 = vrot.slane %v1772_v17, 1  ;;  %v1789_v50 = vmul.f32 %v4804_v24, %v4964_v63  ;;  %v1834_v53 = vrot.slane %v1828_v25, 1 }
 0x86b   :  { %v2082_v47 = vadd.f32 %v2076_v26, %v2065_v9  ;;  %v1883_v45 = vmul.f32 %v4760_v21, %v4813_v20  ;;  %v1939_v27 = vmul.f32 %v4819_v46, %v4813_v20  ;;  %v5021_v5 = vadd.f32 %v2205_v4, %v2194_v41 }
 0x86c   :  { %v1839_v30 = vadd.f32 %v1833_v8, %v1822_v18  ;;  %v1861_v34 = vmul.f32 %v4793_v7, %v4813_v20  ;;  %v1784_v0 = vadd.f32 %v1778_v60, %v1767_v13  ;;  %v5025_v23 = vadd.f32 %v1811_v6, %v1800_v54 }
 0x86d   :  { %v2093_v32 = vrot.slane %v2087_v55, 3  ;;  %v1823_v24 = vmul.f32 %v4777_v49, %v4964_v63  ;;  %v1845_v62 = vmul.f32 %v4787_v43, %v4964_v63  ;;  %v1850_v16 = vrot.slane %v1844_v37, 2 }
 0x86e   :  { %2961 = vrot.lane.b32.xlu2 %v5021_v5, %s3806_s8  ;;  %v1795_v33 = vrot.slane %v1789_v50, 2  ;;  %v1806_v18 = vmul.f32 %v4807_v11, %v4964_v63  ;;  %v1878_v9 = vmul.f32 %v4757_v1, %v4813_v20  ;;  %v1889_v41 = vrot.slane %v1883_v45, 1 }
 0x86f   :  { %2215 = vrot.lane.b32.xlu1 %v5025_v23, %s3806_s8  ;;  %v5039_v25 = vadd.f32 %v2093_v32, %v2082_v47  ;;  %v1840_v49 = vadd.f32 %v1834_v53, %v1823_v24  ;;  %v1945_v8 = vrot.slane %v1939_v27, 1  ;;  %v1900_v17 = vmul.f32 %v4767_v51, %v4813_v20  ;;  %v5732_v47 = vld [vmem:[#allocation20_spill] sm:$0xff] }
 0x870   :  { %v1801_v43 = vadd.f32 %v1795_v33, %v1784_v0  ;;  %v1934_v37 = vmul.f32 %v4816_v36, %v4813_v20  ;;  %v1884_v11 = vmul.f32 %v4760_v21, %v4964_v63  ;;  %v1856_v54 = vadd.f32 %v1850_v16, %v1839_v30 }
 0x871   :  { %2749 = vrot.lane.b32.xlu0 %v5039_v25, %s3806_s8  ;;  %v1851_v6 = vrot.slane %v1845_v62, 2  ;;  %v1862_v26 = vmul.f32 %v4793_v7, %v4964_v63  ;;  %v1956_v55 = vmul.f32 %v4822_v52, %v4813_v20  ;;  %v1867_v4 = vrot.slane %v1861_v34, 3 }
 0x872   :  { %v1812_v13 = vrot.slane %v1806_v18, 3  ;;  %v1895_v50 = vadd.f32 %v1889_v41, %v1878_v9  ;;  %v1917_v53 = vmul.f32 %v5732_v47, %v4813_v20  ;;  %v1951_v45 = vadd.f32 %v1945_v8, %v1934_v37 }
 0x873   :  { %v1857_v60 = vadd.f32 %v1851_v6, %v1840_v49  ;;  %v1906_v27 = vrot.slane %v1900_v17, 2  ;;  %v1890_v0 = vrot.slane %v1884_v11, 1  ;;  %v1940_v30 = vmul.f32 %v4819_v46, %v4964_v63 }
 0x874   :  { %v5055_v21 = vadd.f32 %v1812_v13, %v1801_v43  ;;  %v5059_v32 = vadd.f32 %v1867_v4, %v1856_v54  ;;  %v1868_v7 = vrot.slane %v1862_v26, 3  ;;  %v1962_v24 = vrot.slane %v1956_v55, 2 }
 0x875   :  { %v1973_v34 = vmul.f32 %v4825_v44, %v4813_v20  ;;  %v1879_v62 = vmul.f32 %v4757_v1, %v4964_v63  ;;  %v1901_v16 = vmul.f32 %v4767_v51, %v4964_v63  ;;  %v1912_v33 = vadd.f32 %v1906_v27, %v1895_v50 }
 0x876   :  { %2217 = vrot.lane.b32.xlu2 %v5055_v21, %s3806_s8  ;;  %v5071_v46 = vadd.f32 %v1868_v7, %v1857_v60  ;;  %v1968_v18 = vadd.f32 %v1962_v24, %v1951_v45  ;;  %v1918_v9 = vmul.f32 %v5732_v47, %v4964_v63  ;;  %v1946_v41 = vrot.slane %v1940_v30, 1 }
 0x877   :  { %2321 = vrot.lane.b32.xlu1 %v5059_v32, %s3806_s8  ;;  %v1896_v49 = vadd.f32 %v1890_v0, %v1879_v62  ;;  %v1995_v8 = vmul.f32 %v4845_v29, %v4813_v20  ;;  %v1923_v1 = vrot.slane %v1917_v53, 3  ;;  %v1979_v51 = vrot.slane %v1973_v34, 3 }
 0x878   :  { %v1957_v43 = vmul.f32 %v4822_v52, %v4964_v63  ;;  %v1907_v17 = vrot.slane %v1901_v16, 2  ;;  %v1935_v37 = vmul.f32 %v4816_v36, %v4964_v63  ;;  %v1974_v11 = vmul.f32 %v4825_v44, %v4964_v63 }
 0x879   :  { %2323 = vrot.lane.b32.xlu0 %v5071_v46, %s3806_s8  ;;  %v2012_v54 = vmul.f32 %v4850_v10, %v4813_v20  ;;  %v5087_v6 = vadd.f32 %v1923_v1, %v1912_v33  ;;  %v5089_v26 = vadd.f32 %v1979_v51, %v1968_v18  ;;  %v1924_v55 = vrot.slane %v1918_v9, 3 }
 0x87a   :  { %v1913_v4 = vadd.f32 %v1907_v17, %v1896_v49  ;;  %v1952_v13 = vadd.f32 %v1946_v41, %v1935_v37  ;;  %v2001_v60 = vrot.slane %v1995_v8, 1  ;;  %v2102_v52 = vmul.f32 %v4830_v61, %v4813_v20 }
 0x87b   :  { %v1963_v50 = vrot.slane %v1957_v43, 2  ;;  %v1990_v36 = vmul.f32 %v4842_v58, %v4813_v20  ;;  %v2107_v44 = vmul.f32 %v4833_v35, %v4813_v20  ;;  %v2124_v47 = vmul.f32 %v4836_v59, %v4813_v20 }
 0x87c   :  { %v1980_v53 = vrot.slane %v1974_v11, 3  ;;  %v2018_v45 = vrot.slane %v2012_v54, 2  ;;  %v2141_v27 = vmul.f32 %v4839_v39, %v4813_v20  ;;  %v2103_v0 = vmul.f32 %v4830_v61, %v4964_v63 }
 0x87d   :  { %v1996_v30 = vmul.f32 %v4845_v29, %v4964_v63  ;;  %v2113_v7 = vrot.slane %v2107_v44, 1  ;;  %v2108_v24 = vmul.f32 %v4833_v35, %v4964_v63  ;;  %v2125_v34 = vmul.f32 %v4836_v59, %v4964_v63 }
 0x87e   :  { %2533 = vrot.lane.b32.xlu2 %v5089_v26, %s3806_s8  ;;  %v5113_v62 = vadd.f32 %v1924_v55, %v1913_v4  ;;  %v1969_v16 = vadd.f32 %v1963_v50, %v1952_v13  ;;  %v2007_v33 = vadd.f32 %v2001_v60, %v1990_v36  ;;  %v2142_v61 = vmul.f32 %v4839_v39, %v4964_v63 }
 0x87f   :  { %2427 = vrot.lane.b32.xlu1 %v5087_v6, %s3806_s8  ;;  %v2119_v18 = vadd.f32 %v2113_v7, %v2102_v52  ;;  %v2130_v9 = vrot.slane %v2124_v47, 2  ;;  %v2114_v49 = vrot.slane %v2108_v24, 1  ;;  %v2158_v29 = vmul.f32 %v4860_v14, %v4813_v20 }
 0x880   :  { %v2147_v41 = vrot.slane %v2141_v27, 3  ;;  %v2131_v8 = vrot.slane %v2125_v34, 2  ;;  %v2163_v35 = vmul.f32 %v4863_v48, %v4813_v20  ;;  %v2180_v59 = vmul.f32 %v4866_v15, %v4813_v20 }
 0x881   :  { %v2136_v1 = vadd.f32 %v2130_v9, %v2119_v18  ;;  %v2120_v51 = vadd.f32 %v2114_v49, %v2103_v0  ;;  %v2197_v43 = vmul.f32 %v4871_v19, %v4813_v20  ;;  %v2159_v39 = vmul.f32 %v4860_v14, %v4964_v63 }
 0x882   :  { %v5127_v17 = vadd.f32 %v1980_v53, %v1969_v16  ;;  %v2169_v37 = vrot.slane %v2163_v35, 1  ;;  %v2164_v11 = vmul.f32 %v4863_v48, %v4964_v63  ;;  %v2181_v54 = vmul.f32 %v4866_v15, %v4964_v63 }
 0x883   :  { %v5133_v55 = vadd.f32 %v2147_v41, %v2136_v1  ;;  %v2137_v4 = vadd.f32 %v2131_v8, %v2120_v51  ;;  %v2148_v13 = vrot.slane %v2142_v61, 3  ;;  %v2198_v60 = vmul.f32 %v4871_v19, %v4964_v63 }
 0x884   :  { %v2029_v14 = vmul.f32 %v4853_v12, %v4813_v20  ;;  %v2175_v52 = vadd.f32 %v2169_v37, %v2158_v29  ;;  %v2186_v50 = vrot.slane %v2180_v59, 2  ;;  %v2170_v36 = vrot.slane %v2164_v11, 1 }
 0x885   :  { %v2024_v48 = vadd.f32 %v2018_v45, %v2007_v33  ;;  %v2002_v15 = vrot.slane %v1996_v30, 1  ;;  %v5143_v44 = vadd.f32 %v2148_v13, %v2137_v4  ;;  %v2203_v53 = vrot.slane %v2197_v43, 3 }
 0x886   :  { %2535 = vrot.lane.b32.xlu2 %v5127_v17, %s3806_s8  ;;  %v2192_v47 = vadd.f32 %v2186_v50, %v2175_v52  ;;  %v2176_v27 = vadd.f32 %v2170_v36, %v2159_v39  ;;  %v2187_v19 = vrot.slane %v2181_v54, 2  ;;  %v1991_v0 = vmul.f32 %v4842_v58, %v4964_v63 }
 0x887   :  { %2429 = vrot.lane.b32.xlu1 %v5113_v62, %s3806_s8  ;;  %v2013_v7 = vmul.f32 %v4850_v10, %v4964_v63  ;;  %v2035_v24 = vrot.slane %v2029_v14, 3  ;;  %v2204_v61 = vrot.slane %v2198_v60, 3  ;;  %v2051_v30 = vmul.f32 %v4877_v22, %v4813_v20 }
 0x888   :  { %v5149_v34 = vadd.f32 %v2203_v53, %v2192_v47  ;;  %v2193_v16 = vadd.f32 %v2187_v19, %v2176_v27  ;;  %v2008_v45 = vadd.f32 %v2002_v15, %v1991_v0  ;;  %v2030_v10 = vmul.f32 %v4853_v12, %v4964_v63 }
 0x889   :  { %v5151_v18 = vadd.f32 %v2035_v24, %v2024_v48  ;;  %v2019_v58 = vrot.slane %v2013_v7, 2  ;;  %v2057_v49 = vrot.slane %v2051_v30, 1  ;;  %v2046_v41 = vmul.f32 %v4874_v57, %v4813_v20 }
 0x88a   :  { %v5155_v33 = vadd.f32 %v2204_v61, %v2193_v16  ;;  %v2036_v29 = vrot.slane %v2030_v10, 3  ;;  %v2068_v8 = vmul.f32 %v4888_v38, %v4813_v20  ;;  %v2052_v1 = vmul.f32 %v4877_v22, %v4964_v63 }
 0x88b   :  { %v2025_v9 = vadd.f32 %v2019_v58, %v2008_v45  ;;  %v2063_v59 = vadd.f32 %v2057_v49, %v2046_v41  ;;  %v2085_v12 = vmul.f32 %v4992_v56, %v4813_v20  ;;  %v2047_v11 = vmul.f32 %v4874_v57, %v4964_v63 }
 0x88c   :  { %v2074_v51 = vrot.slane %v2068_v8, 2  ;;  %v2058_v39 = vrot.slane %v2052_v1, 1  ;;  %v2069_v54 = vmul.f32 %v4888_v38, %v4964_v63  ;;  %v2086_v60 = vmul.f32 %v4992_v56, %v4964_v63 }
 0x88d   :  { %v5165_v35 = vadd.f32 %v2036_v29, %v2025_v9  ;;  %v2091_v37 = vrot.slane %v2085_v12, 3 }
 0x88e   :  { %2639 = vrot.lane.b32.xlu2 %v5151_v18, %s3806_s8  ;;  %v2080_v43 = vadd.f32 %v2074_v51, %v2063_v59  ;;  %v2064_v13 = vadd.f32 %v2058_v39, %v2047_v11  ;;  %v2075_v22 = vrot.slane %v2069_v54, 2  ;;  %v2092_v14 = vrot.slane %v2086_v60, 3 }
 0x890   :  { %v5177_v4 = vadd.f32 %v2091_v37, %v2080_v43  ;;  %v2081_v20 = vadd.f32 %v2075_v22, %v2064_v13 }
 0x892   :  { %v5183_v52 = vadd.f32 %v2092_v14, %v2081_v20 }
 0x896   :  { %2641 = vrot.lane.b32.xlu2 %v5165_v35, %s3806_s8 }
 0x89e   :  { %2745 = vrot.lane.b32.xlu2 %v5177_v4, %s3806_s8 }
 0x8a6   :  { %2747 = vrot.lane.b32.xlu2 %v5183_v52, %s3806_s8 }
 0x8ae   :  { %2851 = vrot.lane.b32.xlu2 %v5133_v55, %s3806_s8 }
 0x8b6   :  { %2853 = vrot.lane.b32.xlu2 %v5143_v44, %s3806_s8 }
 0x8b8   :  { %v2432_v57 = vpop.permute.xlu2 %2431 }
 0x8be   :  { %2957 = vrot.lane.b32.xlu2 %v5149_v34, %s3806_s8 }
 0x8c0   :  { %v2538_v38 = vpop.permute.xlu2 %2537 }
 0x8c6   :  { %2959 = vrot.lane.b32.xlu2 %v5155_v33, %s3806_s8 }
 0x8c8   :  { %v5195_v63 = vpop.permute.xlu2 %2961 }
 0x8d0   :  { %v2218_v56 = vpop.permute.xlu2 %2217 }
 0x8d1   :  { %v2326_v50 = vpop.permute.xlu1 %2325 }
 0x8d3   :  { %v2220_v36 = vpop.permute.xlu0 %2219 }
 0x8d4   :  { %v2222_v53 = vsel %vm469_vm6, %v2218_v56, %v2220_v36 }
 0x8d5   :  { %v2226_v7 = vsel %vm732_vm14, %v2222_v53, 0.0  ;;  %v2231_v10 = vsel %vm5734_vm11, %v2222_v53, 0.0  ;;  %vm5746_vm11 = vmmov %vm5738_vm0 }
 0x8d8   :  { %v2534_v48 = vpop.permute.xlu2 %2533 }
 0x8d9   :  { %v5197_v15 = vpop.permute.xlu1 %2855 }
 0x8db   :  { %v2644_v47 = vpop.permute.xlu0 %2643 }
 0x8e0   :  { %v2536_v27 = vpop.permute.xlu2 %2535 }
 0x8e1   :  { %v2216_v19 = vpop.permute.xlu1 %2215  ;;  %v2539_v39 = vsel %vm469_vm6, %v2534_v48, %v2536_v27  ;;  %v2540_v37 = vsel %vm469_vm6, %v2536_v27, %v2538_v38 }
 0x8e2   :  { %v2221_v0 = vsel %vm469_vm6, %v2216_v19, %v2218_v56  ;;  %v2543_v13 = vsel %vm732_vm14, %v2539_v39, 0.0  ;;  %v2544_v22 = vsel %vm732_vm14, %v2540_v37, 0.0 }
 0x8e3   :  { %v2225_v24 = vsel %vm732_vm14, %v2221_v0, 0.0  ;;  %v2750_v16 = vpop.permute.xlu0 %2749  ;;  %v2230_v30 = vsel %vm5733_vm15, %v2221_v0, 0.0  ;;  %v2545_v60 = vadd.f32 %v2544_v22, %v2543_v13  ;;  %vm5745_vm15 = vmmov %vm5738_vm0 }
 0x8e4   :  { %v2227_v61 = vadd.f32 %v2226_v7, %v2225_v24  ;;  %v2232_v49 = vadd.f32 %v2231_v10, %v2230_v30  ;;  %v2548_v30 = vsel %vm5741_vm4, %v2539_v39, 0.0  ;;  %vm5752_vm4 = vmmov %vm5738_vm0 }
 0x8e6   :  { %2228 = vadd.xlane.f32.xlu1 %v2227_v61 }
 0x8e8   :  { %v2640_v45 = vpop.permute.xlu2 %2639 }
 0x8e9   :  { %v2322_v58 = vpop.permute.xlu1 %2321 }
 0x8eb   :  { %v2324_v9 = vpop.permute.xlu0 %2323 }
 0x8ec   :  { %v2327_v29 = vsel %vm469_vm6, %v2322_v58, %v2324_v9  ;;  %v2328_v41 = vsel %vm469_vm6, %v2324_v9, %v2326_v50  ;;  %v2549_v58 = vsel %vm5742_vm5, %v2540_v37, 0.0  ;;  %vm5753_vm5 = vmmov %vm5738_vm0 }
 0x8ed   :  { %v2331_v8 = vsel %vm732_vm14, %v2327_v29, 0.0  ;;  %v2332_v59 = vsel %vm732_vm14, %v2328_v41, 0.0  ;;  %v2336_v1 = vsel %vm5735_vm12, %v2327_v29, 0.0  ;;  %v2337_v51 = vsel %vm5736_vm13, %v2328_v41, 0.0  ;;  %vm5747_vm12 = vmmov %vm5738_vm0 }
 0x8ee   :  { %v2333_v12 = vadd.f32 %v2332_v59, %v2331_v8  ;;  %v2338_v43 = vadd.f32 %v2337_v51, %v2336_v1  ;;  %v2550_v29 = vadd.f32 %v2549_v58, %v2548_v30  ;;  %vm5748_vm13 = vmmov %vm5738_vm0 }
 0x8ef   :  { %2233 = vadd.xlane.f32.xlu2 %v2232_v49 }
 0x8f0   :  { %2339 = vadd.xlane.f32.xlu0 %v2338_v43  ;;  %2334 = vadd.xlane.f32.xlu1 %v2333_v12  ;;  %v2642_v11 = vpop.permute.xlu2 %2641 }
 0x8f1   :  { %v2428_v54 = vpop.permute.xlu1 %2427  ;;  %v2645_v20 = vsel %vm469_vm6, %v2640_v45, %v2642_v11  ;;  %v2646_v14 = vsel %vm469_vm6, %v2642_v11, %v2644_v47 }
 0x8f2   :  { %v2654_v36 = vsel %vm5737_vm1, %v2645_v20, 0.0  ;;  %v2655_v38 = vsel %vm5738_vm0, %v2646_v14, 0.0  ;;  %v2649_v59 = vsel %vm732_vm14, %v2645_v20, 0.0  ;;  %v2650_v1 = vsel %vm732_vm14, %v2646_v14, 0.0  ;;  %vm5749_vm1 = vmmov %vm5738_vm0 }
 0x8f3   :  { %v2656_v61 = vadd.f32 %v2655_v38, %v2654_v36  ;;  %v2651_v51 = vadd.f32 %v2650_v1, %v2649_v59 }
 0x8f8   :  { %2546 = vadd.xlane.f32.xlu0 %v2545_v60  ;;  %v2746_v56 = vpop.permute.xlu2 %2745 }
 0x8f9   :  { %v2430_v50 = vpop.permute.xlu1 %2429 }
 0x8fa   :  { %v2433_v48 = vsel %vm469_vm6, %v2428_v54, %v2430_v50  ;;  %v2434_v53 = vsel %vm469_vm6, %v2430_v50, %v2432_v57 }
 0x8fb   :  { %v2437_v27 = vsel %vm732_vm14, %v2433_v48, 0.0  ;;  %v2438_v19 = vsel %vm732_vm14, %v2434_v53, 0.0  ;;  %v2442_v0 = vsel %vm5739_vm2, %v2433_v48, 0.0  ;;  %v2443_v7 = vsel %vm5740_vm3, %v2434_v53, 0.0  ;;  %vm5750_vm2 = vmmov %vm5738_vm0 }
 0x8fc   :  { %v2439_v47 = vadd.f32 %v2438_v19, %v2437_v27  ;;  %v2444_v24 = vadd.f32 %v2443_v7, %v2442_v0  ;;  %vm5751_vm3 = vmmov %vm5738_vm0 }
 0x8fe   :  { %2445 = vadd.xlane.f32.xlu2 %v2444_v24  ;;  %2440 = vadd.xlane.f32.xlu1 %v2439_v47 }
 0x900   :  { %2657 = vadd.xlane.f32.xlu0 %v2656_v61  ;;  %v2748_v45 = vpop.permute.xlu2 %2747 }
 0x901   :  { %v2751_v57 = vsel %vm469_vm6, %v2746_v56, %v2748_v45  ;;  %v2752_v10 = vsel %vm469_vm6, %v2748_v45, %v2750_v16 }
 0x902   :  { %v2760_v9 = vsel %vm5743_vm7, %v2751_v57, 0.0  ;;  %v2761_v49 = vsel %vm5744_vm8, %v2752_v10, 0.0  ;;  %v2755_v43 = vsel %vm732_vm14, %v2751_v57, 0.0  ;;  %v2756_v16 = vsel %vm732_vm14, %v2752_v10, 0.0  ;;  %vm5754_vm7 = vmmov %vm5738_vm0 }
 0x903   :  { %v2762_v41 = vadd.f32 %v2761_v49, %v2760_v9  ;;  %v2757_v22 = vadd.f32 %v2756_v16, %v2755_v43  ;;  %vm5755_vm8 = vmmov %vm5738_vm0 }
 0x906   :  { %2551 = vadd.xlane.f32.xlu2 %v2550_v29 }
 0x908   :  { %2763 = vadd.xlane.f32.xlu0 %v2762_v41  ;;  %v2852_v8 = vpop.permute.xlu2 %2851 }
 0x90e   :  { %2652 = vadd.xlane.f32.xlu2 %v2651_v51 }
 0x910   :  { %v2854_v12 = vpop.permute.xlu2 %2853 }
 0x911   :  { %v2857_v39 = vsel %vm469_vm6, %v2852_v8, %v2854_v12  ;;  %v2858_v37 = vsel %vm469_vm6, %v2854_v12, %v5197_v15 }
 0x912   :  { %v2861_v11 = vsel %vm732_vm14, %v2857_v39, 0.0  ;;  %v2862_v54 = vsel %vm732_vm14, %v2858_v37, 0.0  ;;  %v2866_v20 = vsel %vm5745_vm15, %v2857_v39, 0.0  ;;  %v2867_v14 = vsel %vm5746_vm11, %v2858_v37, 0.0  ;;  %vm5756_vm15 = vmmov %vm5738_vm0 }
 0x913   :  { %v2863_v13 = vadd.f32 %v2862_v54, %v2861_v11  ;;  %v2868_v56 = vadd.f32 %v2867_v14, %v2866_v20  ;;  %vm5757_vm11 = vmmov %vm5738_vm0 }
 0x915   :  { %2864 = vadd.xlane.f32.xlu0 %v2863_v13 }
 0x916   :  { %2758 = vadd.xlane.f32.xlu2 %v2757_v22 }
 0x918   :  { %v2958_v60 = vpop.permute.xlu2 %2957 }
 0x91e   :  { %2869 = vadd.xlane.f32.xlu2 %v2868_v56 }
 0x920   :  { %v2960_v50 = vpop.permute.xlu2 %2959 }
 0x921   :  { %v2963_v36 = vsel %vm469_vm6, %v2958_v60, %v2960_v50  ;;  %v2964_v15 = vsel %vm469_vm6, %v2960_v50, %v5195_v63 }
 0x922   :  { %v2967_v38 = vsel %vm732_vm14, %v2963_v36, 0.0  ;;  %v2968_v48 = vsel %vm732_vm14, %v2964_v15, 0.0  ;;  %v2972_v53 = vsel %vm5747_vm12, %v2963_v36, 0.0  ;;  %v2973_v27 = vsel %vm5748_vm13, %v2964_v15, 0.0  ;;  %vm5758_vm12 = vmmov %vm5738_vm0 }
 0x923   :  { %v2969_v19 = vadd.f32 %v2968_v48, %v2967_v38  ;;  %v2974_v0 = vadd.f32 %v2973_v27, %v2972_v53  ;;  %vm5759_vm13 = vmmov %vm5738_vm0 }
 0x925   :  { %2975 = vadd.xlane.f32.xlu0 %v2974_v0  ;;  %2970 = vadd.xlane.f32.xlu1 %v2969_v19 }
 0x959   :  { %v2229_v7 = vpop.xlane.xlu1 %2228 }
 0x962   :  { %v2234_v47 = vpop.xlane.xlu2 %2233 }
 0x963   :  { %v2340_v24 = vpop.xlane.xlu0 %2339  ;;  %v2236_v61 = vrot.slane %v2234_v47, 4  ;;  %v2335_v30 = vpop.xlane.xlu1 %2334 }
 0x964   :  { %v2342_v45 = vrot.slane %v2340_v24, 4 }
 0x965   :  { %v2238_v58 = vadd.f32 %v2236_v61, %v2229_v7 }
 0x966   :  { %v2344_v63 = vadd.f32 %v2342_v45, %v2335_v30 }
 0x967   :  { %v5249_v57 = vmul.f32 0.001953125, %v2238_v58 }
 0x968   :  { %v5251_v10 = vmul.f32 0.001953125, %v2344_v63 }
 0x969   :  { %2242 = vperm.xlu0 %3658, %v5249_v57  }
 0x96a   :  { %2348 = vperm.xlu2 %3660, %v5251_v10  }
 0x96b   :  { %v2547_v9 = vpop.xlane.xlu0 %2546 }
 0x971   :  { %v2446_v49 = vpop.xlane.xlu2 %2445  ;;  %v2441_v41 = vpop.xlane.xlu1 %2440 }
 0x972   :  { %v2448_v29 = vrot.slane %v2446_v49, 4 }
 0x973   :  { %v2658_v12 = vpop.xlane.xlu0 %2657 }
 0x974   :  { %v2450_v8 = vadd.f32 %v2448_v29, %v2441_v41  ;;  %v2660_v39 = vrot.slane %v2658_v12, 4 }
 0x976   :  { %v5255_v59 = vmul.f32 0.001953125, %v2450_v8 }
 0x978   :  { %2454 = vperm.xlu0 %3658, %v5255_v59  }
 0x979   :  { %v2552_v1 = vpop.xlane.xlu2 %2551 }
 0x97a   :  { %v2554_v51 = vrot.slane %v2552_v1, 4 }
 0x97b   :  { %v2764_v13 = vpop.xlane.xlu0 %2763 }
 0x97c   :  { %v2556_v43 = vadd.f32 %v2554_v51, %v2547_v9  ;;  %v2766_v22 = vrot.slane %v2764_v13, 4 }
 0x97e   :  { %v5258_v16 = vmul.f32 0.001953125, %v2556_v43 }
 0x980   :  { %2560 = vperm.xlu0 %3658, %v5258_v16  }
 0x981   :  { %v2653_v37 = vpop.xlane.xlu2 %2652 }
 0x982   :  { %v2662_v11 = vadd.f32 %v2660_v39, %v2653_v37 }
 0x984   :  { %v5261_v54 = vmul.f32 0.001953125, %v2662_v11 }
 0x986   :  { %2666 = vperm.xlu1 %3659, %v5261_v54  }
 0x988   :  { %v2865_v56 = vpop.xlane.xlu0 %2864 }
 0x989   :  { %v2759_v60 = vpop.xlane.xlu2 %2758 }
 0x98a   :  { %v2768_v20 = vadd.f32 %v2766_v22, %v2759_v60 }
 0x98c   :  { %v5264_v14 = vmul.f32 0.001953125, %v2768_v20 }
 0x98e   :  { %2772 = vperm.xlu1 %3659, %v5264_v14  }
 0x991   :  { %v2870_v50 = vpop.xlane.xlu2 %2869 }
 0x992   :  { %v2872_v36 = vrot.slane %v2870_v50, 4 }
 0x994   :  { %v2874_v15 = vadd.f32 %v2872_v36, %v2865_v56 }
 0x996   :  { %v5267_v38 = vmul.f32 0.001953125, %v2874_v15 }
 0x998   :  { %2878 = vperm.xlu1 %3659, %v5267_v38   ;;  %v2976_v48 = vpop.xlane.xlu0 %2975  ;;  %v2971_v27 = vpop.xlane.xlu1 %2970 }
 0x999   :  { %v2978_v53 = vrot.slane %v2976_v48, 4 }
 0x99b   :  { %v2980_v19 = vadd.f32 %v2978_v53, %v2971_v27 }
 0x99d   :  { %v5270_v0 = vmul.f32 0.001953125, %v2980_v19 }
 0x9a0   :  { %2984 = vperm.xlu1 %3659, %v5270_v0  }
 0x9c4   :  { %v5273_v7 = vpop.permute.xlu2 %2348 }
 0x9c5   :  { %v2351_v47 = vsub.f32 %v5059_v32, %v5273_v7  ;;  %v2352_v24 = vsub.f32 %v5071_v46, %v5273_v7  ;;  %v2353_v12 = vsub.f32 %v4940_v31, %v5273_v7 }
 0x9c7   :  { %v2354_v61 = vmul.f32 %v2351_v47, %v2351_v47  ;;  %v2355_v45 = vmul.f32 %v2352_v24, %v2352_v24  ;;  %v2356_v11 = vmul.f32 %v2353_v12, %v2353_v12 }
 0x9c9   :  { %2362 = vrot.lane.b32.xlu2 %v2355_v45, %s3806_s8  ;;  %2360 = vrot.lane.b32.xlu1 %v2354_v61, %s3806_s8 }
 0x9db   :  { %v2243_v30 = vpop.permute.xlu0 %2242 }
 0x9dc   :  { %v2245_v58 = vsub.f32 %v5025_v23, %v2243_v30  ;;  %v2246_v9 = vsub.f32 %v5055_v21, %v2243_v30  ;;  %v2247_v29 = vsub.f32 %v4956_v28, %v2243_v30 }
 0x9de   :  { %v2248_v63 = vmul.f32 %v2245_v58, %v2245_v58  ;;  %v2249_v49 = vmul.f32 %v2246_v9, %v2246_v9  ;;  %v2250_v51 = vmul.f32 %v2247_v29, %v2247_v29  ;;  %v2269_v9 = vrot.slane %v2243_v30, 4 }
 0x9e0   :  { %2254 = vrot.lane.b32.xlu0 %v2248_v63, %s3806_s8 }
 0x9e8   :  { %2256 = vrot.lane.b32.xlu0 %v2249_v49, %s3806_s8 }
 0x9ea   :  { %v2455_v41 = vpop.permute.xlu0 %2454 }
 0x9eb   :  { %v2457_v8 = vsub.f32 %v5087_v6, %v2455_v41  ;;  %v2458_v20 = vsub.f32 %v5113_v62, %v2455_v41  ;;  %v2459_v27 = vsub.f32 %v4934_v40, %v2455_v41 }
 0x9ed   :  { %v2460_v1 = vmul.f32 %v2457_v8, %v2457_v8  ;;  %v2461_v36 = vmul.f32 %v2458_v20, %v2458_v20  ;;  %v2462_v24 = vmul.f32 %v2459_v27, %v2459_v27 }
 0x9ef   :  { %2466 = vrot.lane.b32.xlu1 %v2460_v1, %s3806_s8  ;;  %v2272_v1 = vsub.f32 %v5055_v21, %v2269_v9 }
 0x9f0   :  { %2258 = vrot.lane.b32.xlu0 %v2250_v51, %s3806_s8  ;;  %v2271_v51 = vsub.f32 %v5025_v23, %v2269_v9 }
 0x9f2   :  { %v2561_v43 = vpop.permute.xlu0 %2560 }
 0x9f3   :  { %v2563_v39 = vsub.f32 %v5089_v26, %v2561_v43  ;;  %v2564_v45 = vsub.f32 %v5127_v17, %v2561_v43  ;;  %v2565_v12 = vsub.f32 %v4979_v42, %v2561_v43 }
 0x9f5   :  { %v2566_v37 = vmul.f32 %v2563_v39, %v2563_v39  ;;  %v2567_v8 = vmul.f32 %v2564_v45, %v2564_v45  ;;  %v2481_v39 = vrot.slane %v2455_v41, 4 }
 0x9f7   :  { %2572 = vrot.lane.b32.xlu1 %v2566_v37, %s3806_s8  ;;  %v2275_v37 = vmul.f32 %v2272_v1, %v2272_v1  ;;  %v2483_v30 = vsub.f32 %v5087_v6, %v2481_v39  ;;  %v2484_v1 = vsub.f32 %v5113_v62, %v2481_v39 }
 0x9f8   :  { %v2667_v13 = vpop.permute.xlu1 %2666  ;;  %2364 = vrot.lane.b32.xlu0 %v2356_v11, %s3806_s8  ;;  %v2274_v11 = vmul.f32 %v2271_v51, %v2271_v51 }
 0x9f9   :  { %v2669_v22 = vsub.f32 %v5151_v18, %v2667_v13  ;;  %v2670_v60 = vsub.f32 %v5165_v35, %v2667_v13  ;;  %v2671_v48 = vsub.f32 %v4998_v3, %v2667_v13 }
 0x9fb   :  { %v2672_v56 = vmul.f32 %v2669_v22, %v2669_v22  ;;  %v2673_v50 = vmul.f32 %v2670_v60, %v2670_v60  ;;  %v2674_v47 = vmul.f32 %v2671_v48, %v2671_v48  ;;  %v2568_v22 = vmul.f32 %v2565_v12, %v2565_v12 }
 0x9fc   :  { %v2273_v60 = vsub.f32 %v4956_v28, %v2269_v9 }
 0x9fd   :  { %2678 = vrot.lane.b32.xlu2 %v2672_v56, %s3806_s8  ;;  %v2375_v56 = vrot.slane %v5273_v7, 4 }
 0x9fe   :  { %v2276_v41 = vmul.f32 %v2273_v60, %v2273_v60 }
 0x9ff   :  { %2680 = vrot.lane.b32.xlu1 %v2673_v50, %s3806_s8  ;;  %v2587_v50 = vrot.slane %v2561_v43, 4  ;;  %v2377_v27 = vsub.f32 %v5059_v32, %v2375_v56  ;;  %v2379_v45 = vsub.f32 %v4940_v31, %v2375_v56  ;;  %v2378_v51 = vsub.f32 %v5071_v46, %v2375_v56 }
 0xa00   :  { %v2773_v15 = vpop.permute.xlu1 %2772  ;;  %2468 = vrot.lane.b32.xlu0 %v2461_v36, %s3806_s8  ;;  %v2486_v36 = vmul.f32 %v2483_v30, %v2483_v30 }
 0xa01   :  { %v2775_v53 = vsub.f32 %v5177_v4, %v2773_v15  ;;  %v2776_v61 = vsub.f32 %v5183_v52, %v2773_v15  ;;  %v2777_v20 = vsub.f32 %v5039_v25, %v2773_v15  ;;  %v2799_v9 = vrot.slane %v2773_v15, 4 }
 0xa03   :  { %v2778_v19 = vmul.f32 %v2775_v53, %v2775_v53  ;;  %v2779_v49 = vmul.f32 %v2776_v61, %v2776_v61  ;;  %v2780_v48 = vmul.f32 %v2777_v20, %v2777_v20  ;;  %v2589_v53 = vsub.f32 %v5089_v26, %v2587_v50 }
 0xa04   :  { %v2380_v61 = vmul.f32 %v2377_v27, %v2377_v27  ;;  %v2803_v15 = vsub.f32 %v5039_v25, %v2799_v9 }
 0xa05   :  { %2784 = vrot.lane.b32.xlu2 %v2778_v19, %s3806_s8 }
 0xa06   :  { %v2806_v20 = vmul.f32 %v2803_v15, %v2803_v15 }
 0xa07   :  { %2682 = vrot.lane.b32.xlu1 %v2674_v47, %s3806_s8  ;;  %v2693_v47 = vrot.slane %v2667_v13, 4  ;;  %v2801_v13 = vsub.f32 %v5177_v4, %v2799_v9 }
 0xa08   :  { %2470 = vrot.lane.b32.xlu0 %v2462_v24, %s3806_s8  ;;  %v2592_v24 = vmul.f32 %v2589_v53, %v2589_v53 }
 0xa09   :  { %v2696_v43 = vsub.f32 %v5165_v35, %v2693_v47  ;;  %v2804_v12 = vmul.f32 %v2801_v13, %v2801_v13  ;;  %v2697_v30 = vsub.f32 %v4998_v3, %v2693_v47 }
 0xa0a   :  { %v2879_v58 = vpop.permute.xlu1 %2878 }
 0xa0b   :  { %v2883_v63 = vsub.f32 %v4983_v2, %v2879_v58  ;;  %v2881_v19 = vsub.f32 %v5133_v55, %v2879_v58  ;;  %v5346_v60 = vrot.slane %v2879_v58, 4  ;;  %v2700_v56 = vmul.f32 %v2697_v30, %v2697_v30 }
 0xa0d   :  { %v2886_v29 = vmul.f32 %v2883_v63, %v2883_v63  ;;  %v2884_v7 = vmul.f32 %v2881_v19, %v2881_v19  ;;  %v2882_v63 = vsub.f32 %v5143_v44, %v2879_v58  ;;  %v2591_v19 = vsub.f32 %v4979_v42, %v2587_v50 }
 0xa0f   :  { %2894 = vrot.lane.b32.xlu2 %v2886_v29, %s3806_s8  ;;  %2786 = vrot.lane.b32.xlu1 %v2779_v49, %s3806_s8  ;;  %v2699_v49 = vmul.f32 %v2696_v43, %v2696_v43  ;;  %v2382_v29 = vmul.f32 %v2379_v45, %v2379_v45 }
 0xa10   :  { %2574 = vrot.lane.b32.xlu0 %v2567_v8, %s3806_s8  ;;  %v2885_v8 = vmul.f32 %v2882_v63, %v2882_v63 }
 0xa17   :  { %2282 = vrot.lane.b32.xlu2 %v2275_v37, %s3806_s8  ;;  %2280 = vrot.lane.b32.xlu1 %v2274_v11, %s3806_s8  ;;  %v2487_v37 = vmul.f32 %v2484_v1, %v2484_v1  ;;  %v2381_v11 = vmul.f32 %v2378_v51, %v2378_v51 }
 0xa18   :  { %2576 = vrot.lane.b32.xlu0 %v2568_v22, %s3806_s8  ;;  %v2485_v22 = vsub.f32 %v4934_v40, %v2481_v39  ;;  %v2802_v39 = vsub.f32 %v5183_v52, %v2799_v9 }
 0xa1a   :  { %v2805_v58 = vmul.f32 %v2802_v39, %v2802_v39 }
 0xa1f   :  { %2492 = vrot.lane.b32.xlu2 %v2486_v36, %s3806_s8  ;;  %2284 = vrot.lane.b32.xlu1 %v2276_v41, %s3806_s8  ;;  %v2488_v36 = vmul.f32 %v2485_v22, %v2485_v22  ;;  %v2907_v41 = vsub.f32 %v5133_v55, %v5346_v60 }
 0xa20   :  { %2788 = vrot.lane.b32.xlu0 %v2780_v48, %s3806_s8  ;;  %v2590_v48 = vsub.f32 %v5127_v17, %v2587_v50 }
 0xa21   :  { %v2910_v53 = vmul.f32 %v2907_v41, %v2907_v41 }
 0xa22   :  { %v2593_v27 = vmul.f32 %v2590_v48, %v2590_v48 }
 0xa27   :  { %2598 = vrot.lane.b32.xlu2 %v2592_v24, %s3806_s8  ;;  %2386 = vrot.lane.b32.xlu1 %v2380_v61, %s3806_s8  ;;  %v2594_v24 = vmul.f32 %v2591_v19, %v2591_v19  ;;  %v5360_v61 = vpop.permute.xlu1 %2984 }
 0xa28   :  { %2890 = vrot.lane.b32.xlu0 %v2884_v7, %s3806_s8  ;;  %v2695_v7 = vsub.f32 %v5151_v18, %v2693_v47 }
 0xa2a   :  { %v2698_v45 = vmul.f32 %v2695_v7, %v2695_v7 }
 0xa2f   :  { %2706 = vrot.lane.b32.xlu2 %v2699_v49, %s3806_s8  ;;  %2390 = vrot.lane.b32.xlu1 %v2382_v29, %s3806_s8 }
 0xa30   :  { %2892 = vrot.lane.b32.xlu0 %v2885_v8, %s3806_s8  ;;  %v2363_v8 = vpop.permute.xlu2 %2362 }
 0xa37   :  { %2810 = vrot.lane.b32.xlu2 %v2804_v12, %s3806_s8  ;;  %2494 = vrot.lane.b32.xlu1 %v2487_v37, %s3806_s8 }
 0xa38   :  { %2388 = vrot.lane.b32.xlu0 %v2381_v11, %s3806_s8 }
 0xa3b   :  { %v2361_v63 = vpop.permute.xlu1 %2360 }
 0xa3c   :  { %v2366_v13 = vsel %vm469_vm6, %v2361_v63, %v2363_v8 }
 0xa3d   :  { %v2370_v37 = vsel %vm732_vm14, %v2366_v13, 0.0 }
 0xa3f   :  { %2814 = vrot.lane.b32.xlu2 %v2806_v20, %s3806_s8  ;;  %2496 = vrot.lane.b32.xlu1 %v2488_v36, %s3806_s8 }
 0xa40   :  { %2708 = vrot.lane.b32.xlu0 %v2700_v56, %s3806_s8 }
 0xa47   :  { %2916 = vrot.lane.b32.xlu2 %v2910_v53, %s3806_s8  ;;  %2600 = vrot.lane.b32.xlu1 %v2593_v27, %s3806_s8 }
 0xa48   :  { %2812 = vrot.lane.b32.xlu0 %v2805_v58, %s3806_s8 }
 0xa4f   :  { %2602 = vrot.lane.b32.xlu1 %v2594_v24, %s3806_s8 }
 0xa52   :  { %v2255_v43 = vpop.permute.xlu0 %2254 }
 0xa57   :  { %2704 = vrot.lane.b32.xlu1 %v2698_v45, %s3806_s8  ;;  %v2679_v47 = vpop.permute.xlu2 %2678 }
 0xa5a   :  { %v2257_v9 = vpop.permute.xlu0 %2256 }
 0xa5b   :  { %v2260_v11 = vsel %vm469_vm6, %v2255_v43, %v2257_v9 }
 0xa5c   :  { %v2264_v20 = vsel %vm732_vm14, %v2260_v11, 0.0 }
 0xa5f   :  { %v2785_v48 = vpop.permute.xlu2 %2784 }
 0xa61   :  { %v2467_v49 = vpop.permute.xlu1 %2466 }
 0xa62   :  { %v2259_v29 = vpop.permute.xlu0 %2258 }
 0xa63   :  { %v2261_v50 = vsel %vm469_vm6, %v2257_v9, %v2259_v29 }
 0xa64   :  { %v2265_v22 = vsel %vm732_vm14, %v2261_v50, 0.0 }
 0xa65   :  { %v2266_v36 = vadd.f32 %v2265_v22, %v2264_v20 }
 0xa69   :  { %v2573_v1 = vpop.permute.xlu1 %2572  ;;  %v2895_v43 = vpop.permute.xlu2 %2894 }
 0xa6a   :  { %v2365_v51 = vpop.permute.xlu0 %2364 }
 0xa6b   :  { %v2367_v12 = vsel %vm469_vm6, %v2363_v8, %v2365_v51 }
 0xa6c   :  { %v2371_v15 = vsel %vm732_vm14, %v2367_v12, 0.0 }
 0xa6d   :  { %v2372_v30 = vadd.f32 %v2371_v15, %v2370_v37 }
 0xa70   :  { %2373 = vadd.xlane.f32.xlu2 %v2372_v30 }
 0xa71   :  { %v2681_v56 = vpop.permute.xlu1 %2680  ;;  %v2283_v9 = vpop.permute.xlu2 %2282 }
 0xa72   :  { %v2469_v41 = vpop.permute.xlu0 %2468  ;;  %2267 = vadd.xlane.f32.xlu0 %v2266_v36  ;;  %v2684_v15 = vsel %vm469_vm6, %v2679_v47, %v2681_v56 }
 0xa73   :  { %v2472_v39 = vsel %vm469_vm6, %v2467_v49, %v2469_v41 }
 0xa74   :  { %v2476_v19 = vsel %vm732_vm14, %v2472_v39, 0.0 }
 0xa79   :  { %v2683_v53 = vpop.permute.xlu1 %2682 }
 0xa7a   :  { %v2471_v27 = vpop.permute.xlu0 %2470  ;;  %v2685_v37 = vsel %vm469_vm6, %v2681_v56, %v2683_v53 }
 0xa7b   :  { %v2473_v58 = vsel %vm469_vm6, %v2469_v41, %v2471_v27  ;;  %v2689_v20 = vsel %vm732_vm14, %v2685_v37, 0.0  ;;  %v2909_v37 = vsub.f32 %v4983_v2, %v5346_v60 }
 0xa7c   :  { %v2477_v24 = vsel %vm732_vm14, %v2473_v58, 0.0  ;;  %v2688_v58 = vsel %vm732_vm14, %v2684_v15, 0.0  ;;  %v3011_v15 = vrot.slane %v5360_v61, 4 }
 0xa7d   :  { %v2478_v7 = vadd.f32 %v2477_v24, %v2476_v19  ;;  %v2690_v19 = vadd.f32 %v2689_v20, %v2688_v58 }
 0xa7e   :  { %v3013_v20 = vsub.f32 %v5149_v34, %v3011_v15 }
 0xa7f   :  { %2479 = vadd.xlane.f32.xlu0 %v2478_v7 }
 0xa81   :  { %v2787_v45 = vpop.permute.xlu1 %2786 }
 0xa82   :  { %v2575_v63 = vpop.permute.xlu0 %2574  ;;  %v2790_v22 = vsel %vm469_vm6, %v2785_v48, %v2787_v45 }
 0xa83   :  { %v2578_v29 = vsel %vm469_vm6, %v2573_v1, %v2575_v63  ;;  %v5384_v1 = vpop.permute.xlu2 %2492  ;;  %v2794_v47 = vsel %vm732_vm14, %v2790_v22, 0.0 }
 0xa84   :  { %v2582_v50 = vsel %vm732_vm14, %v2578_v29, 0.0 }
 0xa89   :  { %v2281_v8 = vpop.permute.xlu1 %2280 }
 0xa8a   :  { %v2577_v13 = vpop.permute.xlu0 %2576  ;;  %v2286_v11 = vsel %vm469_vm6, %v2281_v8, %v2283_v9 }
 0xa8b   :  { %v2579_v49 = vsel %vm469_vm6, %v2575_v63, %v2577_v13  ;;  %v2290_v39 = vsel %vm5749_vm1, %v2286_v11, 0.0  ;;  %v5394_v63 = vpop.permute.xlu2 %2598  ;;  %vm5760_vm1 = vmmov %vm5738_vm0 }
 0xa8c   :  { %v2583_v51 = vsel %vm732_vm14, %v2579_v49, 0.0 }
 0xa8d   :  { %v2584_v12 = vadd.f32 %v2583_v51, %v2582_v50  ;;  %v2908_v51 = vsub.f32 %v5143_v44, %v5346_v60 }
 0xa8f   :  { %2585 = vadd.xlane.f32.xlu0 %v2584_v12  ;;  %v2911_v11 = vmul.f32 %v2908_v51, %v2908_v51 }
 0xa91   :  { %v2285_v30 = vpop.permute.xlu1 %2284 }
 0xa92   :  { %v2287_v36 = vsel %vm469_vm6, %v2283_v9, %v2285_v30  ;;  %v2789_v41 = vpop.permute.xlu0 %2788 }
 0xa93   :  { %v2291_v27 = vsel %vm5738_vm0, %v2287_v36, 0.0  ;;  %v2791_v53 = vsel %vm469_vm6, %v2787_v45, %v2789_v41  ;;  %v5400_v50 = vpop.permute.xlu2 %2706  ;;  %v3014_v36 = vsub.f32 %v5155_v33, %v3011_v15  ;;  %v3016_v41 = vmul.f32 %v3013_v20, %v3013_v20 }
 0xa94   :  { %v2292_v56 = vadd.f32 %v2291_v27, %v2290_v39  ;;  %v2795_v48 = vsel %vm732_vm14, %v2791_v53, 0.0  ;;  %v3015_v53 = vsub.f32 %v5021_v5, %v3011_v15 }
 0xa95   :  { %v2796_v24 = vadd.f32 %v2795_v48, %v2794_v47  ;;  %v3017_v39 = vmul.f32 %v3014_v36, %v3014_v36 }
 0xa96   :  { %2293 = vadd.xlane.f32.xlu2 %v2292_v56 }
 0xa97   :  { %2691 = vadd.xlane.f32.xlu0 %v2690_v19  ;;  %2797 = vadd.xlane.f32.xlu1 %v2796_v24  ;;  %v3018_v24 = vmul.f32 %v3015_v53, %v3015_v53 }
 0xa9a   :  { %v2891_v7 = vpop.permute.xlu0 %2890 }
 0xa9b   :  { %v2811_v22 = vpop.permute.xlu2 %2810 }
 0xaa2   :  { %v2893_v9 = vpop.permute.xlu0 %2892 }
 0xaa3   :  { %v2896_v29 = vsel %vm469_vm6, %v2891_v7, %v2893_v9  ;;  %v2897_v45 = vsel %vm469_vm6, %v2893_v9, %v2895_v43  ;;  %v2912_v43 = vmul.f32 %v2909_v37, %v2909_v37  ;;  %v2815_v27 = vpop.permute.xlu2 %2814  ;;  %v2987_v7 = vsub.f32 %v5149_v34, %v5360_v61  ;;  %v2387_v9 = vpop.permute.xlu1 %2386 }
 0xaa4   :  { %v2900_v8 = vsel %vm732_vm14, %v2896_v29, 0.0  ;;  %v2901_v13 = vsel %vm732_vm14, %v2897_v45, 0.0  ;;  %v2989_v45 = vsub.f32 %v5021_v5, %v5360_v61 }
 0xaa5   :  { %v2902_v49 = vadd.f32 %v2901_v13, %v2900_v8  ;;  %v2990_v29 = vmul.f32 %v2987_v7, %v2987_v7 }
 0xaa6   :  { %v2992_v13 = vmul.f32 %v2989_v45, %v2989_v45 }
 0xaa7   :  { %2903 = vadd.xlane.f32.xlu0 %v2902_v49 }
 0xaaa   :  { %v2389_v12 = vpop.permute.xlu0 %2388 }
 0xaab   :  { %v2391_v8 = vpop.permute.xlu1 %2390  ;;  %v2392_v51 = vsel %vm469_vm6, %v2387_v9, %v2389_v12 }
 0xaac   :  { %v2393_v37 = vsel %vm469_vm6, %v2389_v12, %v2391_v8 }
 0xaad   :  { %v2397_v15 = vsel %vm5753_vm5, %v2393_v37, 0.0 }
 0xaae   :  { %2918 = vrot.lane.b32.xlu2 %v2911_v11, %s3806_s8  ;;  %v2396_v11 = vsel %vm5752_vm4, %v2392_v51, 0.0 }
 0xab0   :  { %2920 = vrot.lane.b32.xlu1 %v2912_v43, %s3806_s8 }
 0xab2   :  { %v2709_v30 = vpop.permute.xlu0 %2708 }
 0xab3   :  { %v2495_v49 = vpop.permute.xlu1 %2494  ;;  %v2711_v45 = vsel %vm469_vm6, %v5400_v50, %v2709_v30 }
 0xab8   :  { %3022 = vrot.lane.b32.xlu1 %v3016_v41, %s3806_s8  ;;  %v2988_v41 = vsub.f32 %v5155_v33, %v5360_v61 }
 0xaba   :  { %v2813_v60 = vpop.permute.xlu0 %2812  ;;  %v2991_v12 = vmul.f32 %v2988_v41, %v2988_v41 }
 0xabb   :  { %v2816_v58 = vsel %vm469_vm6, %v2811_v22, %v2813_v60  ;;  %v2817_v47 = vsel %vm469_vm6, %v2813_v60, %v2815_v27  ;;  %3024 = vrot.lane.b32.xlu0 %v3017_v39, %s3806_s8  ;;  %v2497_v43 = vpop.permute.xlu1 %2496  ;;  %v2398_v22 = vadd.f32 %v2397_v15, %v2396_v11  ;;  %v2498_v39 = vsel %vm469_vm6, %v5384_v1, %v2495_v49 }
 0xabc   :  { %v2820_v56 = vsel %vm5750_vm2, %v2816_v58, 0.0  ;;  %v2821_v48 = vsel %vm5751_vm3, %v2817_v47, 0.0  ;;  %v2499_v36 = vsel %vm469_vm6, %v2495_v49, %v2497_v43  ;;  %v2502_v53 = vsel %vm5755_vm8, %v2498_v39, 0.0  ;;  %v2917_v47 = vpop.permute.xlu2 %2916  ;;  %vm5761_vm2 = vmmov %vm5738_vm0 }
 0xabd   :  { %v5418_v19 = vadd.f32 %v2821_v48, %v2820_v56  ;;  %v2503_v27 = vsel %vm5754_vm7, %v2499_v36, 0.0  ;;  %v2715_v49 = vsel %vm5759_vm13, %v2711_v45, 0.0  ;;  %vm5762_vm3 = vmmov %vm5738_vm0 }
 0xabe   :  { %v2504_v58 = vadd.f32 %v2503_v27, %v2502_v53 }
 0xac0   :  { %3026 = vrot.lane.b32.xlu1 %v3018_v24, %s3806_s8 }
 0xac3   :  { %v2601_v20 = vpop.permute.xlu1 %2600 }
 0xac4   :  { %v2604_v48 = vsel %vm469_vm6, %v5394_v63, %v2601_v20 }
 0xac5   :  { %v2608_v1 = vsel %vm5757_vm11, %v2604_v48, 0.0 }
 0xac8   :  { %2996 = vrot.lane.b32.xlu1 %v2990_v29, %s3806_s8 }
 0xacb   :  { %v2603_v60 = vpop.permute.xlu1 %2602 }
 0xacc   :  { %v2605_v56 = vsel %vm469_vm6, %v2601_v20, %v2603_v60 }
 0xacd   :  { %v2609_v61 = vsel %vm5756_vm15, %v2605_v56, 0.0 }
 0xace   :  { %v2610_v7 = vadd.f32 %v2609_v61, %v2608_v1 }
 0xad0   :  { %3000 = vrot.lane.b32.xlu1 %v2992_v13, %s3806_s8 }
 0xad3   :  { %v2705_v24 = vpop.permute.xlu1 %2704 }
 0xad4   :  { %v2710_v9 = vsel %vm469_vm6, %v2705_v24, %v5400_v50 }
 0xad5   :  { %v2714_v13 = vsel %vm5758_vm12, %v2710_v9, 0.0 }
 0xad6   :  { %v2716_v63 = vadd.f32 %v2715_v49, %v2714_v13 }
 0xae3   :  { %v2374_v29 = vpop.xlane.xlu2 %2373 }
 0xae5   :  { %2399 = vadd.xlane.f32.xlu0 %v2398_v22  ;;  %v2268_v8 = vpop.xlane.xlu0 %2267 }
 0xaf2   :  { %v5450_v37 = vpop.xlane.xlu0 %2479 }
 0xaf9   :  { %2998 = vrot.lane.b32.xlu0 %v2991_v12, %s3806_s8 }
 0xafa   :  { %2505 = vadd.xlane.f32.xlu1 %v2504_v58 }
 0xb02   :  { %2611 = vadd.xlane.f32.xlu1 %v2610_v7  ;;  %v5452_v43 = vpop.xlane.xlu0 %2585 }
 0xb09   :  { %v2294_v51 = vpop.xlane.xlu2 %2293 }
 0xb0a   :  { %2717 = vadd.xlane.f32.xlu1 %v2716_v63  ;;  %v2296_v11 = vrot.slane %v2294_v51, 4  ;;  %v5454_v36 = vpop.xlane.xlu1 %2797  ;;  %v5456_v50 = vpop.xlane.xlu0 %2691 }
 0xb0c   :  { %v2298_v15 = vadd.f32 %v2296_v11, %v2268_v8 }
 0xb0e   :  { %v2299_v22 = vmul.f32 0.001953125, %v2298_v15  ;;  %v2312_v15 = vstv %s2300_s19 }
 0xb10   :  { %v2301_v20 = vadd.f32 1e-05, %v2299_v22 }
 0xb11   :  { %v2919_v30 = vpop.permute.xlu2 %2918 }
 0xb12   :  { %3669 = vrsqrt.f32 %v2301_v20  ;;  %v2922_v41 = vsel %vm469_vm6, %v2917_v47, %v2919_v30  ;;  %vm2308_vm5 = vweird.f32 %v2301_v20 }
 0xb13   :  { %v2926_v12 = vsel %vm5760_vm1, %v2922_v41, 0.0  ;;  %v2316_v41 = vstv %s2314_s10 }
 0xb18   :  { %v3670_v27 = vpop.eup %3669 }
 0xb19   :  { %v2303_v56 = vmul.f32 %v3670_v27, %v2301_v20  ;;  %vm2309_vm4 = vweird.f32 %v3670_v27 }
 0xb1a   :  { %v5462_v48 = vpop.xlane.xlu0 %2903  ;;  %vm2310_vm7 = vmor %vm2308_vm5, %vm2309_vm4 }
 0xb1b   :  { %v2304_v61 = vmul.f32 %v3670_v27, %v2303_v56 }
 0xb1d   :  { %v2305_v24 = vmul.f32 0.5, %v2304_v61 }
 0xb1f   :  { %v2306_v47 = vsub.f32 1.5, %v2305_v24 }
 0xb21   :  { %v2307_v51 = vmul.f32 %v3670_v27, %v2306_v47 }
 0xb22   :  { %v2921_v39 = vpop.permute.xlu1 %2920 }
 0xb23   :  { %v2923_v60 = vsel %vm469_vm6, %v2919_v30, %v2921_v39  ;;  %v2311_v11 = vsel %vm2310_vm7, %v3670_v27, %v2307_v51 }
 0xb24   :  { %v2927_v53 = vsel %vm5738_vm0, %v2923_v60, 0.0  ;;  %v2313_v22 = vmul.f32 %v2312_v15, %v2311_v11  ;;  %v2418_v15 = vstv %s3621_s21 }
 0xb25   :  { %v2928_v58 = vadd.f32 %v2927_v53, %v2926_v12 }
 0xb26   :  { %v2315_v30 = vmul.f32 %v2313_v22, %v5249_v57 }
 0xb27   :  { %2929 = vadd.xlane.f32.xlu2 %v2928_v58 }
 0xb28   :  { %v2317_v39 = vsub.f32 %v2316_v41, %v2315_v30 }
 0xb2a   :  { %v3023_v1 = vpop.permute.xlu1 %3022 }
 0xb2d   :  { %v3025_v7 = vpop.permute.xlu0 %3024 }
 0xb2e   :  { %v3028_v9 = vsel %vm469_vm6, %v3023_v1, %v3025_v7 }
 0xb2f   :  { %v3032_v13 = vsel %vm5761_vm2, %v3028_v9, 0.0 }
 0xb32   :  { %v3027_v45 = vpop.permute.xlu1 %3026 }
 0xb33   :  { %v3029_v8 = vsel %vm469_vm6, %v3025_v7, %v3027_v45 }
 0xb34   :  { %v3033_v49 = vsel %vm5762_vm3, %v3029_v8, 0.0 }
 0xb35   :  { %v3034_v63 = vadd.f32 %v3033_v49, %v3032_v13 }
 0xb37   :  { %3035 = vadd.xlane.f32.xlu1 %v3034_v63 }
 0xb3a   :  { %v2997_v53 = vpop.permute.xlu1 %2996 }
 0xb3f   :  { %3062 = vperm.xlu2 %3660, %v2313_v22  }
 0xb42   :  { %v3001_v1 = vpop.permute.xlu1 %3000 }
 0xb47   :  { %3070 = vperm.xlu2 %3660, %v2317_v39  }
 0xb58   :  { %v2400_v60 = vpop.xlane.xlu0 %2399 }
 0xb59   :  { %v2402_v12 = vrot.slane %v2400_v60, 4  ;;  %v2422_v60 = vstv %s3622_s15 }
 0xb5b   :  { %v2404_v58 = vadd.f32 %v2402_v12, %v2374_v29 }
 0xb5d   :  { %v2405_v56 = vmul.f32 0.001953125, %v2404_v58 }
 0xb5f   :  { %v2407_v61 = vadd.f32 1e-05, %v2405_v56 }
 0xb61   :  { %3671 = vrsqrt.f32 %v2407_v61  ;;  %vm2414_vm15 = vweird.f32 %v2407_v61 }
 0xb67   :  { %v3672_v20 = vpop.eup %3671 }
 0xb68   :  { %v2409_v24 = vmul.f32 %v3672_v20, %v2407_v61  ;;  %vm2415_vm8 = vweird.f32 %v3672_v20 }
 0xb69   :  { %vm2416_vm11 = vmor %vm2414_vm15, %vm2415_vm8 }
 0xb6a   :  { %v2410_v27 = vmul.f32 %v3672_v20, %v2409_v24 }
 0xb6b   :  { %v2999_v7 = vpop.permute.xlu0 %2998 }
 0xb6c   :  { %v2411_v9 = vmul.f32 0.5, %v2410_v27  ;;  %v3002_v47 = vsel %vm469_vm6, %v2997_v53, %v2999_v7  ;;  %v3003_v57 = vsel %vm469_vm6, %v2999_v7, %v3001_v1 }
 0xb6d   :  { %v3006_v45 = vsel %vm732_vm14, %v3002_v47, 0.0  ;;  %v3007_v8 = vsel %vm732_vm14, %v3003_v57, 0.0  ;;  %v2506_v29 = vpop.xlane.xlu1 %2505 }
 0xb6e   :  { %v2412_v13 = vsub.f32 1.5, %v2411_v9  ;;  %v3008_v49 = vadd.f32 %v3007_v8, %v3006_v45  ;;  %v2508_v63 = vrot.slane %v2506_v29, 4 }
 0xb70   :  { %v2413_v51 = vmul.f32 %v3672_v20, %v2412_v13  ;;  %v2510_v11 = vadd.f32 %v2508_v63, %v5450_v37  ;;  %3009 = vadd.xlane.f32.xlu0 %v3008_v49  ;;  %v2524_v13 = vstv %s3623_s18 }
 0xb72   :  { %v2417_v22 = vsel %vm2416_vm11, %v3672_v20, %v2413_v51  ;;  %v2511_v30 = vmul.f32 0.001953125, %v2510_v11 }
 0xb73   :  { %v2419_v41 = vmul.f32 %v2418_v15, %v2417_v22 }
 0xb74   :  { %v2513_v39 = vadd.f32 1e-05, %v2511_v30  ;;  %v2528_v30 = vstv %s3624_s16 }
 0xb75   :  { %v2612_v12 = vpop.xlane.xlu1 %2611  ;;  %v2421_v53 = vmul.f32 %v2419_v41, %v5251_v10 }
 0xb76   :  { %3673 = vrsqrt.f32 %v2513_v39  ;;  %v2614_v58 = vrot.slane %v2612_v12, 4  ;;  %vm2520_vm13 = vweird.f32 %v2513_v39  ;;  %v2630_v12 = vstv %s3625_s17 }
 0xb77   :  { %v2423_v56 = vsub.f32 %v2422_v60, %v2421_v53 }
 0xb78   :  { %v2616_v1 = vadd.f32 %v2614_v58, %v5452_v43  ;;  %2823 = vadd.xlane.f32.xlu0 %v5418_v19 }
 0xb79   :  { %3100 = vperm.xlu1 %3659, %v2423_v56  }
 0xb7a   :  { %v2617_v37 = vmul.f32 0.001953125, %v2616_v1 }
 0xb7c   :  { %v3674_v61 = vpop.eup %3673  ;;  %v2619_v24 = vadd.f32 1e-05, %v2617_v37 }
 0xb7d   :  { %v2515_v27 = vmul.f32 %v3674_v61, %v2513_v39  ;;  %v2718_v20 = vpop.xlane.xlu1 %2717  ;;  %vm2521_vm12 = vweird.f32 %v3674_v61 }
 0xb7e   :  { %3675 = vrsqrt.f32 %v2619_v24  ;;  %v2720_v7 = vrot.slane %v2718_v20, 4  ;;  %vm2522_vm1 = vmor %vm2520_vm13, %vm2521_vm12  ;;  %vm2626_vm2 = vweird.f32 %v2619_v24 }
 0xb7f   :  { %v2516_v9 = vmul.f32 %v3674_v61, %v2515_v27  ;;  %v2736_v27 = vstv %s3627_s7 }
 0xb80   :  { %v2722_v47 = vadd.f32 %v2720_v7, %v5456_v50 }
 0xb81   :  { %v2517_v10 = vmul.f32 0.5, %v2516_v9 }
 0xb82   :  { %v2723_v57 = vmul.f32 0.001953125, %v2722_v47  ;;  %v2740_v47 = vstv %s3628_s1 }
 0xb83   :  { %v2518_v45 = vsub.f32 1.5, %v2517_v10 }
 0xb84   :  { %v3676_v8 = vpop.eup %3675  ;;  %v2725_v43 = vadd.f32 1e-05, %v2723_v57 }
 0xb85   :  { %v2621_v19 = vmul.f32 %v3676_v8, %v2619_v24  ;;  %v2519_v29 = vmul.f32 %v3674_v61, %v2518_v45  ;;  %vm2627_vm0 = vweird.f32 %v3676_v8 }
 0xb86   :  { %3677 = vrsqrt.f32 %v2725_v43  ;;  %vm2628_vm3 = vmor %vm2626_vm2, %vm2627_vm0  ;;  %vm2732_vm5 = vweird.f32 %v2725_v43 }
 0xb87   :  { %v2622_v49 = vmul.f32 %v3676_v8, %v2621_v19  ;;  %v2523_v63 = vsel %vm2522_vm1, %v3674_v61, %v2519_v29 }
 0xb88   :  { %v2525_v51 = vmul.f32 %v2524_v13, %v2523_v63 }
 0xb89   :  { %v2623_v11 = vmul.f32 0.5, %v2622_v49 }
 0xb8a   :  { %3123 = vperm.xlu2 %3660, %v2525_v51   ;;  %v2527_v22 = vmul.f32 %v2525_v51, %v5255_v59 }
 0xb8b   :  { %v2624_v50 = vsub.f32 1.5, %v2623_v11 }
 0xb8c   :  { %v3678_v15 = vpop.eup %3677  ;;  %3092 = vperm.xlu0 %3658, %v2419_v41   ;;  %v2529_v56 = vsub.f32 %v2528_v30, %v2527_v22  ;;  %v2634_v41 = vstv %s3626_s5 }
 0xb8d   :  { %v2727_v39 = vmul.f32 %v3678_v15, %v2725_v43  ;;  %v2625_v60 = vmul.f32 %v3676_v8, %v2624_v50  ;;  %vm2733_vm4 = vweird.f32 %v3678_v15 }
 0xb8e   :  { %vm2734_vm7 = vmor %vm2732_vm5, %vm2733_vm4 }
 0xb8f   :  { %v2728_v53 = vmul.f32 %v3678_v15, %v2727_v39  ;;  %v2629_v58 = vsel %vm2628_vm3, %v3676_v8, %v2625_v60 }
 0xb90   :  { %v2631_v1 = vmul.f32 %v2630_v12, %v2629_v58 }
 0xb91   :  { %v2729_v37 = vmul.f32 0.5, %v2728_v53 }
 0xb92   :  { %3131 = vperm.xlu2 %3660, %v2529_v56   ;;  %v2633_v59 = vmul.f32 %v2631_v1, %v5258_v16 }
 0xb93   :  { %v2730_v61 = vsub.f32 1.5, %v2729_v37 }
 0xb94   :  { %3154 = vperm.xlu0 %3658, %v2631_v1   ;;  %v2635_v7 = vsub.f32 %v2634_v41, %v2633_v59 }
 0xb95   :  { %v2731_v24 = vmul.f32 %v3678_v15, %v2730_v61 }
 0xb97   :  { %v2735_v20 = vsel %vm2734_vm7, %v3678_v15, %v2731_v24 }
 0xb98   :  { %v2737_v9 = vmul.f32 %v2736_v27, %v2735_v20 }
 0xb9a   :  { %v2930_v10 = vpop.xlane.xlu2 %2929  ;;  %3162 = vperm.xlu2 %3660, %v2635_v7   ;;  %v2739_v57 = vmul.f32 %v2737_v9, %v5261_v54 }
 0xb9b   :  { %v2932_v45 = vrot.slane %v2930_v10, 4 }
 0xb9c   :  { %3185 = vperm.xlu0 %3658, %v2737_v9   ;;  %v2741_v8 = vsub.f32 %v2740_v47, %v2739_v57 }
 0xb9d   :  { %v2934_v19 = vadd.f32 %v2932_v45, %v5462_v48 }
 0xb9e   :  { %3193 = vperm.xlu1 %3659, %v2741_v8  }
 0xb9f   :  { %v2935_v16 = vmul.f32 0.001953125, %v2934_v19 }
 0xba1   :  { %v2937_v43 = vadd.f32 1e-05, %v2935_v16 }
 0xba2   :  { %v3063_v29 = vpop.permute.xlu2 %3062 }
 0xba3   :  { %3679 = vrsqrt.f32 %v2937_v43  ;;  %v3307_v13 = vrot.slane %v3063_v29, 4  ;;  %v3065_v63 = vmul.f32 %v3063_v29, %v5025_v23  ;;  %v3066_v51 = vmul.f32 %v3063_v29, %v5055_v21 }
 0xba4   :  { %v3067_v11 = vmul.f32 %v3063_v29, %v4956_v28  ;;  %vm2944_vm15 = vweird.f32 %v2937_v43 }
 0xba5   :  { %v3309_v54 = vmul.f32 %v3307_v13, %v5025_v23  ;;  %v3310_v15 = vmul.f32 %v3307_v13, %v5055_v21  ;;  %v3311_v53 = vmul.f32 %v3307_v13, %v4956_v28  ;;  %v2948_v21 = vstv %s3631_s2 }
 0xba9   :  { %v3680_v49 = vpop.eup %3679 }
 0xbaa   :  { %v2939_v50 = vmul.f32 %v3680_v49, %v2937_v43  ;;  %v3071_v22 = vpop.permute.xlu2 %3070  ;;  %vm2945_vm8 = vweird.f32 %v3680_v49  ;;  %v3036_v7 = vpop.xlane.xlu1 %3035 }
 0xbab   :  { %v3073_v48 = vadd.f32 %v3071_v22, %v3065_v63  ;;  %v3074_v30 = vadd.f32 %v3071_v22, %v3066_v51  ;;  %v3075_v39 = vadd.f32 %v3071_v22, %v3067_v11  ;;  %v3312_v60 = vrot.slane %v3071_v22, 4  ;;  %vm2946_vm11 = vmor %vm2944_vm15, %vm2945_vm8 }
 0xbac   :  { %v2940_v12 = vmul.f32 %v3680_v49, %v2939_v50  ;;  %v3038_v9 = vrot.slane %v3036_v7, 4 }
 0xbad   :  { %v3314_v58 = vadd.f32 %v3312_v60, %v3309_v54  ;;  %v3315_v56 = vadd.f32 %v3312_v60, %v3310_v15  ;;  %v3316_v37 = vadd.f32 %v3312_v60, %v3311_v53  ;;  %v3079_v24 = vrot.slane %v3074_v30, 7 }
 0xbae   :  { %v2941_v1 = vmul.f32 0.5, %v2940_v12  ;;  %v3080_v28 = vrot.slane %v3075_v39, 6  ;;  %v3054_v54 = vstv %s3633_s20  ;;  %v3058_v60 = vstv %s3634_s9 }
 0xbaf   :  { %3320 = vst [vmem:[#allocation1] sm:$0xff] %v3314_v58  ;;  %v3081_v27 = vsel %vm732_vm14, %v3073_v48, %v3079_v24 }
 0xbb0   :  { %v2942_v61 = vsub.f32 1.5, %v2941_v1  ;;  %3321 = vst [vmem:[#allocation1 + $0x9] sm:$0xff] %v3315_v56  ;;  %v5493_v20 = vsel %vm1170_vm9, %v3081_v27, %v3080_v28  ;;  %v2842_v27 = vstv %s5498_s24 }
 0xbb1   :  { %3322 = vst [vmem:[#allocation1 + $0x12] sm:$0xff] %v3316_v37 }
 0xbb2   :  { %v2943_v23 = vmul.f32 %v3680_v49, %v2942_v61 }
 0xbb4   :  { %v2947_v59 = vsel %vm2946_vm11, %v3680_v49, %v2943_v23 }
 0xbb5   :  { %v5488_v41 = vmul.f32 %v2948_v21, %v2947_v59 }
 0xbb7   :  { %3247 = vperm.xlu1 %3659, %v5488_v41  }
 0xbe3   :  { %v3010_v47 = vpop.xlane.xlu0 %3009 }
 0xbe4   :  { %v3040_v10 = vadd.f32 %v3038_v9, %v3010_v47  ;;  %v5496_v51 = vpop.permute.xlu2 %3123 }
 0xbe6   :  { %v3041_v57 = vmul.f32 0.001953125, %v3040_v10  ;;  %v5520_v10 = vld [vmem:[#allocation1 + $0x4] ss:$9 sm:$0xff] }
 0xbe8   :  { %v3043_v45 = vadd.f32 1e-05, %v3041_v57 }
 0xbea   :  { %3681 = vrsqrt.f32 %v3043_v45  ;;  %vm3050_vm13 = vweird.f32 %v3043_v45 }
 0xbeb   :  { %v2824_v8 = vpop.xlane.xlu0 %2823  ;;  %v5508_v1 = vpop.permute.xlu1 %3100 }
 0xbec   :  { %v2826_v19 = vrot.slane %v2824_v8, 4  ;;  %v5502_v12 = vpop.permute.xlu2 %3131  ;;  %v3338_v21 = vrot.slane %v5508_v1, 4 }
 0xbee   :  { %v2828_v16 = vadd.f32 %v2826_v19, %v5454_v36 }
 0xbf0   :  { %v3682_v43 = vpop.eup %3681  ;;  %v2829_v29 = vmul.f32 0.001953125, %v2828_v16 }
 0xbf1   :  { %v3045_v13 = vmul.f32 %v3682_v43, %v3043_v45  ;;  %vm3051_vm12 = vweird.f32 %v3682_v43 }
 0xbf2   :  { %v2831_v49 = vadd.f32 1e-05, %v2829_v29  ;;  %vm3052_vm1 = vmor %vm3050_vm13, %vm3051_vm12  ;;  %v2846_v29 = vstv %s5510_s6 }
 0xbf3   :  { %v3046_v63 = vmul.f32 %v3682_v43, %v3045_v13  ;;  %v3359_v13 = vrot.slane %v5496_v51, 4 }
 0xbf4   :  { %3683 = vrsqrt.f32 %v2831_v49  ;;  %vm2838_vm2 = vweird.f32 %v2831_v49 }
 0xbf5   :  { %v3047_v11 = vmul.f32 0.5, %v3046_v63 }
 0xbf7   :  { %v3048_v50 = vsub.f32 1.5, %v3047_v11 }
 0xbf9   :  { %v3049_v15 = vmul.f32 %v3682_v43, %v3048_v50 }
 0xbfa   :  { %v3684_v22 = vpop.eup %3683 }
 0xbfb   :  { %v3053_v48 = vsel %vm3052_vm1, %v3682_v43, %v3049_v15  ;;  %v2833_v36 = vmul.f32 %v3684_v22, %v2831_v49  ;;  %vm2839_vm0 = vweird.f32 %v3684_v22  ;;  %v3163_v49 = vpop.permute.xlu2 %3162  ;;  %v3364_v15 = vrot.slane %v5502_v12, 4 }
 0xbfc   :  { %v5500_v30 = vmul.f32 %v3054_v54, %v3053_v48  ;;  %vm2840_vm3 = vmor %vm2838_vm2, %vm2839_vm0  ;;  %v2951_v54 = vmul.f32 %v5488_v41, %v5267_v38  ;;  %v2952_v48 = vstv %s5517_s25  ;;  %v3363_v38 = vmul.f32 %v3359_v13, %v4934_v40 }
 0xbfd   :  { %v2834_v39 = vmul.f32 %v3684_v22, %v2833_v36 }
 0xbfe   :  { %v5504_v53 = vpop.permute.xlu0 %3092  ;;  %v3057_v58 = vmul.f32 %v5500_v30, %v5270_v0 }
 0xbff   :  { %v2835_v56 = vmul.f32 0.5, %v2834_v39  ;;  %v3333_v37 = vrot.slane %v5504_v53, 4 }
 0xc00   :  { %v3059_v61 = vsub.f32 %v3058_v60, %v3057_v58  ;;  %v3361_v58 = vmul.f32 %v3359_v13, %v5087_v6 }
 0xc01   :  { %v2836_v23 = vsub.f32 1.5, %v2835_v56  ;;  %v3335_v59 = vmul.f32 %v3333_v37, %v5059_v32  ;;  %v3336_v24 = vmul.f32 %v3333_v37, %v5071_v46  ;;  %v3337_v28 = vmul.f32 %v3333_v37, %v4940_v31 }
 0xc02   :  { %3286 = vperm.xlu1 %3659, %v3059_v61   ;;  %v3362_v56 = vmul.f32 %v3359_v13, %v5113_v62  ;;  %v3127_v61 = vmul.f32 %v5496_v51, %v5113_v62  ;;  %v3366_v41 = vadd.f32 %v3364_v15, %v3361_v58  ;;  %v3128_v62 = vmul.f32 %v5496_v51, %v4934_v40 }
 0xc03   :  { %v2837_v0 = vmul.f32 %v3684_v22, %v2836_v23  ;;  %v3340_v7 = vadd.f32 %v3338_v21, %v3335_v59  ;;  %v3341_v9 = vadd.f32 %v3338_v21, %v3336_v24  ;;  %v3342_v47 = vadd.f32 %v3338_v21, %v3337_v28 }
 0xc04   :  { %v3367_v21 = vadd.f32 %v3364_v15, %v3362_v56  ;;  %v3135_v24 = vadd.f32 %v5502_v12, %v3127_v61  ;;  %v3368_v28 = vadd.f32 %v3364_v15, %v3363_v38 }
 0xc05   :  { %v2841_v57 = vsel %vm2840_vm3, %v3684_v22, %v2837_v0  ;;  %3346 = vst [vmem:[#allocation1] sm:$0xff] %v3340_v7  ;;  %v3096_v0 = vmul.f32 %v5504_v53, %v5071_v46  ;;  %v3136_v7 = vadd.f32 %v5502_v12, %v3128_v62 }
 0xc06   :  { %v3155_v45 = vpop.permute.xlu0 %3154  ;;  %v2843_v8 = vmul.f32 %v2842_v27, %v2841_v57  ;;  %3347 = vst [vmem:[#allocation1 + $0x9] sm:$0xff] %v3341_v9  ;;  %v3097_v9 = vmul.f32 %v5504_v53, %v4940_v31  ;;  %v3140_v57 = vrot.slane %v3135_v24, 7 }
 0xc07   :  { %v3157_v19 = vmul.f32 %v3155_v45, %v5089_v26  ;;  %v3158_v16 = vmul.f32 %v3155_v45, %v5127_v17  ;;  %v3159_v43 = vmul.f32 %v3155_v45, %v4979_v42  ;;  %3348 = vst [vmem:[#allocation1 + $0x12] sm:$0xff] %v3342_v47  ;;  %v3385_v27 = vrot.slane %v3155_v45, 4 }
 0xc08   :  { %3216 = vperm.xlu2 %3660, %v2843_v8   ;;  %v2845_v63 = vmul.f32 %v2843_v8, %v5264_v14  ;;  %v2953_v14 = vsub.f32 %v2952_v48, %v2951_v54  ;;  %v3126_v47 = vmul.f32 %v5496_v51, %v5087_v6  ;;  %v3104_v8 = vadd.f32 %v5508_v1, %v3096_v0 }
 0xc09   :  { %v3166_v11 = vadd.f32 %v3163_v49, %v3158_v16  ;;  %v3167_v50 = vadd.f32 %v3163_v49, %v3159_v43  ;;  %v3165_v36 = vadd.f32 %v3163_v49, %v3157_v19  ;;  %v3387_v46 = vmul.f32 %v3385_v27, %v5089_v26 }
 0xc0a   :  { %v2847_v22 = vsub.f32 %v2846_v29, %v2845_v63  ;;  %v3388_v45 = vmul.f32 %v3385_v27, %v5127_v17  ;;  %v3134_v19 = vadd.f32 %v5502_v12, %v3126_v47  ;;  %v3390_v16 = vrot.slane %v3163_v49, 4 }
 0xc0b   :  { %v3171_v39 = vrot.slane %v3166_v11, 7  ;;  %v3172_v60 = vrot.slane %v3167_v50, 6  ;;  %v3095_v43 = vmul.f32 %v5504_v53, %v5059_v32  ;;  %v3389_v31 = vmul.f32 %v3385_v27, %v4979_v42 }
 0xc0c   :  { %3224 = vperm.xlu0 %3658, %v2847_v22   ;;  %v3141_v29 = vrot.slane %v3136_v7, 6  ;;  %v3105_v6 = vadd.f32 %v5508_v1, %v3097_v9  ;;  %v3109_v51 = vrot.slane %v3104_v8, 7  ;;  %v3392_v13 = vadd.f32 %v3390_v16, %v3387_v46 }
 0xc0d   :  { %v3173_v37 = vsel %vm732_vm14, %v3165_v36, %v3171_v39  ;;  %v3142_v17 = vsel %vm732_vm14, %v3134_v19, %v3140_v57  ;;  %v3393_v12 = vadd.f32 %v3390_v16, %v3388_v45  ;;  %v3103_v32 = vadd.f32 %v5508_v1, %v3095_v43 }
 0xc0e   :  { %v3174_v23 = vsel %vm1170_vm9, %v3173_v37, %v3172_v60  ;;  %v5539_v59 = vld [vmem:[#allocation1 + $0x4] ss:$9 sm:$0xff]  ;;  %v3186_v40 = vpop.permute.xlu0 %3185  ;;  %v3394_v53 = vadd.f32 %v3390_v16, %v3389_v31  ;;  %v3143_v11 = vsel %vm1170_vm9, %v3142_v17, %v3141_v29  ;;  %v3110_v50 = vrot.slane %v3105_v6, 6 }
 0xc0f   :  { %3175 = vrot.lane.b32.xlu1 %v3174_v23, %s3806_s8  ;;  %3372 = vst [vmem:[#allocation1] sm:$0xff] %v3366_v41  ;;  %v3189_v26 = vmul.f32 %v3186_v40, %v5165_v35  ;;  %v3411_v42 = vrot.slane %v3186_v40, 4  ;;  %v3190_v63 = vmul.f32 %v3186_v40, %v4998_v3  ;;  %v3188_v15 = vmul.f32 %v3186_v40, %v5151_v18 }
 0xc10   :  { %3255 = vperm.xlu2 %3660, %v2953_v14   ;;  %3373 = vst [vmem:[#allocation1 + $0x9] sm:$0xff] %v3367_v21  ;;  %v3194_v49 = vpop.permute.xlu1 %3193 }
 0xc11   :  { %3374 = vst [vmem:[#allocation1 + $0x12] sm:$0xff] %v3368_v28  ;;  %v3197_v54 = vadd.f32 %v3194_v49, %v3189_v26  ;;  %v3413_v22 = vmul.f32 %v3411_v42, %v5151_v18  ;;  %v3416_v1 = vrot.slane %v3194_v49, 4  ;;  %v3414_v48 = vmul.f32 %v3411_v42, %v5165_v35 }
 0xc12   :  { %v3198_v36 = vadd.f32 %v3194_v49, %v3190_v63  ;;  %v3415_v60 = vmul.f32 %v3411_v42, %v4998_v3  ;;  %v3196_v56 = vadd.f32 %v3194_v49, %v3188_v15 }
 0xc13   :  { %v3202_v58 = vrot.slane %v3197_v54, 7  ;;  %v3418_v37 = vadd.f32 %v3416_v1, %v3413_v22  ;;  %v3419_v38 = vadd.f32 %v3416_v1, %v3414_v48 }
 0xc14   :  { %3278 = vperm.xlu0 %3658, %v5500_v30   ;;  %v3203_v61 = vrot.slane %v3198_v36, 6  ;;  %v3420_v41 = vadd.f32 %v3416_v1, %v3415_v60 }
 0xc15   :  { %v3204_v18 = vsel %vm732_vm14, %v3196_v56, %v3202_v58 }
 0xc16   :  { %v3205_v35 = vsel %vm1170_vm9, %v3204_v18, %v3203_v61 }
 0xc18   :  { %3083 = vrot.lane.b32.xlu2 %v5493_v20, %s3806_s8  ;;  %v5565_v30 = vld [vmem:[#allocation1 + $0x4] ss:$9 sm:$0xff]  ;;  %v3111_v20 = vsel %vm732_vm14, %v3103_v32, %v3109_v51 }
 0xc19   :  { %3398 = vst [vmem:[#allocation1] sm:$0xff] %v3392_v13  ;;  %v3112_v39 = vsel %vm1170_vm9, %v3111_v20, %v3110_v50 }
 0xc1a   :  { %3399 = vst [vmem:[#allocation1 + $0x9] sm:$0xff] %v3393_v12 }
 0xc1b   :  { %3400 = vst [vmem:[#allocation1 + $0x12] sm:$0xff] %v3394_v53 }
 0xc1c   :  { %3144 = vrot.lane.b32.xlu0 %v3143_v11, %s3806_s8 }
 0xc20   :  { %3113 = vrot.lane.b32.xlu2 %v3112_v39, %s3806_s8 }
 0xc22   :  { %v5578_v14 = vld [vmem:[#allocation1 + $0x4] ss:$9 sm:$0xff] }
 0xc23   :  { %3424 = vst [vmem:[#allocation1] sm:$0xff] %v3418_v37 }
 0xc24   :  { %3425 = vst [vmem:[#allocation1 + $0x9] sm:$0xff] %v3419_v38 }
 0xc25   :  { %3426 = vst [vmem:[#allocation1 + $0x12] sm:$0xff] %v3420_v41 }
 0xc28   :  { %3206 = vrot.lane.b32.xlu2 %v3205_v35, %s3806_s8 }
 0xc29   :  { %v3248_v23 = vpop.permute.xlu1 %3247 }
 0xc2a   :  { %v3251_v21 = vmul.f32 %v3248_v23, %v5143_v44  ;;  %v3252_v24 = vmul.f32 %v3248_v23, %v4983_v2  ;;  %v3250_v0 = vmul.f32 %v3248_v23, %v5133_v55  ;;  %v3463_v60 = vrot.slane %v3248_v23, 4 }
 0xc2c   :  { %v3428_v11 = vld [vmem:[#allocation1 + $0x4] ss:$9 sm:$0xff]  ;;  %v3465_v18 = vmul.f32 %v3463_v60, %v5133_v55  ;;  %v3466_v23 = vmul.f32 %v3463_v60, %v5143_v44 }
 0xc62   :  { %v3217_v3 = vpop.permute.xlu2 %3216 }
 0xc63   :  { %v3437_v43 = vrot.slane %v3217_v3, 4  ;;  %v3220_v6 = vmul.f32 %v3217_v3, %v5183_v52  ;;  %v3221_v51 = vmul.f32 %v3217_v3, %v5039_v25  ;;  %v3219_v26 = vmul.f32 %v3217_v3, %v5177_v4 }
 0xc65   :  { %v3439_v17 = vmul.f32 %v3437_v43, %v5177_v4  ;;  %v3440_v49 = vmul.f32 %v3437_v43, %v5183_v52  ;;  %v3441_v42 = vmul.f32 %v3437_v43, %v5039_v25 }
 0xc6a   :  { %v3256_v28 = vpop.permute.xlu2 %3255 }
 0xc6b   :  { %v3259_v27 = vadd.f32 %v3256_v28, %v3251_v21  ;;  %v3260_v62 = vadd.f32 %v3256_v28, %v3252_v24  ;;  %v3258_v7 = vadd.f32 %v3256_v28, %v3250_v0  ;;  %v3468_v37 = vrot.slane %v3256_v28, 4 }
 0xc6c   :  { %v3467_v21 = vmul.f32 %v3463_v60, %v4983_v2 }
 0xc6d   :  { %v3264_v9 = vrot.slane %v3259_v27, 7  ;;  %v3265_v47 = vrot.slane %v3260_v62, 6  ;;  %v3470_v24 = vadd.f32 %v3468_v37, %v3465_v18  ;;  %v3471_v62 = vadd.f32 %v3468_v37, %v3466_v23 }
 0xc6f   :  { %v3266_v57 = vsel %vm732_vm14, %v3258_v7, %v3264_v9  ;;  %v3472_v9 = vadd.f32 %v3468_v37, %v3467_v21 }
 0xc70   :  { %v3267_v8 = vsel %vm1170_vm9, %v3266_v57, %v3265_v47 }
 0xc71   :  { %3268 = vrot.lane.b32.xlu1 %v3267_v8, %s3806_s8 }
 0xc72   :  { %v3084_v46 = vpop.permute.xlu2 %3083 }
 0xc73   :  { %v3085_v45 = vrot.slane %v3084_v46, 1 }
 0xc74   :  { %v5592_v16 = vpop.permute.xlu1 %3286 }
 0xc75   :  { %v3086_v40 = vsel %vm469_vm6, %v3084_v46, %v3085_v45 }
 0xc76   :  { %3088 = vst.msk [vmem:[#allocation14] ss:$8 sm:$0x3] %vm4568_vm10, %v3086_v40 }
 0xc79   :  { %3351 = vrot.lane.b32.xlu1 %v5539_v59, %s3806_s8 }
 0xc7a   :  { %v3114_v31 = vpop.permute.xlu2 %3113 }
 0xc7b   :  { %v3115_v29 = vrot.slane %v3114_v31, 1 }
 0xc7d   :  { %v3116_v13 = vsel %vm469_vm6, %v3114_v31, %v3115_v29 }
 0xc7e   :  { %3119 = vst.msk [vmem:[#allocation14 + $0x1] ss:$8 sm:$0x3] %vm4568_vm10, %v3116_v13  ;;  %v3225_v12 = vpop.permute.xlu0 %3224 }
 0xc7f   :  { %v3228_v59 = vadd.f32 %v3225_v12, %v3220_v6  ;;  %v3229_v32 = vadd.f32 %v3225_v12, %v3221_v51  ;;  %v3442_v53 = vrot.slane %v3225_v12, 4  ;;  %v3227_v63 = vadd.f32 %v3225_v12, %v3219_v26 }
 0xc81   :  { %v3233_v50 = vrot.slane %v3228_v59, 7  ;;  %v3234_v54 = vrot.slane %v3229_v32, 6  ;;  %v3444_v20 = vadd.f32 %v3442_v53, %v3439_v17  ;;  %v3445_v15 = vadd.f32 %v3442_v53, %v3440_v49  ;;  %3429 = vrot.lane.b32.xlu1 %v3428_v11, %s3806_s8  ;;  %v3176_v4 = vpop.permute.xlu1 %3175 }
 0xc82   :  { %v3446_v22 = vadd.f32 %v3442_v53, %v3441_v42  ;;  %v3177_v1 = vrot.slane %v3176_v4, 1  ;;  %v3207_v48 = vpop.permute.xlu2 %3206 }
 0xc83   :  { %3450 = vst [vmem:[#allocation1] sm:$0xff] %v3444_v20  ;;  %v3208_v36 = vrot.slane %v3207_v48, 1  ;;  %v3235_v52 = vsel %vm732_vm14, %v3227_v63, %v3233_v50 }
 0xc84   :  { %3451 = vst [vmem:[#allocation1 + $0x9] sm:$0xff] %v3445_v15  ;;  %v3178_v39 = vsel %vm469_vm6, %v3176_v4, %v3177_v1  ;;  %v3236_v25 = vsel %vm1170_vm9, %v3235_v52, %v3234_v54 }
 0xc85   :  { %3452 = vst [vmem:[#allocation1 + $0x12] sm:$0xff] %v3446_v22  ;;  %v3209_v58 = vsel %vm469_vm6, %v3207_v48, %v3208_v36  ;;  %3237 = vrot.lane.b32.xlu0 %v3236_v25, %s3806_s8 }
 0xc86   :  { %3181 = vst.msk [vmem:[#allocation14 + $0x3] ss:$8 sm:$0x3] %vm4568_vm10, %v3178_v39  ;;  %v3279_v56 = vpop.permute.xlu0 %3278 }
 0xc87   :  { %3212 = vst.msk [vmem:[#allocation14 + $0x4] ss:$8 sm:$0x3] %vm4568_vm10, %v3209_v58  ;;  %v3281_v61 = vmul.f32 %v3279_v56, %v5149_v34  ;;  %v3282_v38 = vmul.f32 %v3279_v56, %v5155_v33  ;;  %v3283_v41 = vmul.f32 %v3279_v56, %v5021_v5  ;;  %v3489_v47 = vrot.slane %v3279_v56, 4 }
 0xc89   :  { %v3290_v35 = vadd.f32 %v5592_v16, %v3282_v38  ;;  %v3291_v3 = vadd.f32 %v5592_v16, %v3283_v41  ;;  %v3289_v28 = vadd.f32 %v5592_v16, %v3281_v61  ;;  %v3491_v8 = vmul.f32 %v3489_v47, %v5149_v34 }
 0xc8a   :  { %v3492_v45 = vmul.f32 %v3489_v47, %v5155_v33  ;;  %v3493_v40 = vmul.f32 %v3489_v47, %v5021_v5 }
 0xc8b   :  { %v3295_v0 = vrot.slane %v3290_v35, 7  ;;  %v3296_v27 = vrot.slane %v3291_v3, 6 }
 0xc8c   :  { %v3454_v7 = vld [vmem:[#allocation1 + $0x4] ss:$9 sm:$0xff] }
 0xc8d   :  { %3476 = vst [vmem:[#allocation1] sm:$0xff] %v3470_v24  ;;  %3325 = vrot.lane.b32.xlu0 %v5520_v10, %s3806_s8  ;;  %v3297_v55 = vsel %vm732_vm14, %v3289_v28, %v3295_v0  ;;  %v3494_v10 = vrot.slane %v5592_v16, 4 }
 0xc8e   :  { %3477 = vst [vmem:[#allocation1 + $0x9] sm:$0xff] %v3471_v62  ;;  %v3145_v57 = vpop.permute.xlu0 %3144  ;;  %v3298_v44 = vsel %vm1170_vm9, %v3297_v55, %v3296_v27 }
 0xc8f   :  { %3478 = vst [vmem:[#allocation1 + $0x12] sm:$0xff] %v3472_v9  ;;  %v3146_v2 = vrot.slane %v3145_v57, 1  ;;  %3299 = vrot.lane.b32.xlu2 %v3298_v44, %s3806_s8  ;;  %v3496_v43 = vadd.f32 %v3494_v10, %v3491_v8  ;;  %v3497_v31 = vadd.f32 %v3494_v10, %v3492_v45  ;;  %v3498_v6 = vadd.f32 %v3494_v10, %v3493_v40 }
 0xc91   :  { %v3147_v46 = vsel %vm469_vm6, %v3145_v57, %v3146_v2 }
 0xc92   :  { %3150 = vst.msk [vmem:[#allocation14 + $0x2] ss:$8 sm:$0x3] %vm4568_vm10, %v3147_v46 }
 0xc95   :  { %3403 = vrot.lane.b32.xlu0 %v5578_v14, %s3806_s8 }
 0xc96   :  { %v3480_v29 = vld [vmem:[#allocation1 + $0x4] ss:$9 sm:$0xff] }
 0xc97   :  { %3377 = vrot.lane.b32.xlu2 %v5565_v30, %s3806_s8  ;;  %3502 = vst [vmem:[#allocation1] sm:$0xff] %v3496_v43 }
 0xc98   :  { %3503 = vst [vmem:[#allocation1 + $0x9] sm:$0xff] %v3497_v31 }
 0xc99   :  { %3504 = vst [vmem:[#allocation1 + $0x12] sm:$0xff] %v3498_v6 }
 0xc9d   :  { %3481 = vrot.lane.b32.xlu0 %v3480_v29, %s3806_s8 }
 0xc9f   :  { %3455 = vrot.lane.b32.xlu2 %v3454_v7, %s3806_s8 }
 0xca0   :  { %v3506_v34 = vld [vmem:[#allocation1 + $0x4] ss:$9 sm:$0xff] }
 0xca1   :  { %3507 = vrot.lane.b32.xlu1 %v3506_v34, %s3806_s8 }
 0xce3   :  { %v3269_v5 = vpop.permute.xlu1 %3268 }
 0xce4   :  { %v3270_v33 = vrot.slane %v3269_v5, 1 }
 0xce6   :  { %v3271_v14 = vsel %vm469_vm6, %v3269_v5, %v3270_v33 }
 0xce7   :  { %3274 = vst.msk [vmem:[#allocation14 + $0x6] ss:$8 sm:$0x3] %vm4568_vm10, %v3271_v14 }
 0xce9   :  { %v3300_v16 = vpop.permute.xlu2 %3299 }
 0xcea   :  { %v3301_v51 = vrot.slane %v3300_v16, 1 }
 0xceb   :  { %v3352_v30 = vpop.permute.xlu1 %3351 }
 0xcec   :  { %v3302_v13 = vsel %vm469_vm6, %v3300_v16, %v3301_v51  ;;  %v3353_v26 = vrot.slane %v3352_v30, 1 }
 0xced   :  { %3305 = vst.msk [vmem:[#allocation14 + $0x7] ss:$8 sm:$0x3] %vm4568_vm10, %v3302_v13 }
 0xcee   :  { %v3354_v17 = vsel %vm469_vm6, %v3352_v30, %v3353_v26 }
 0xcef   :  { %3357 = vst.msk [vmem:[#allocation14 + $0x11] ss:$8 sm:$0x3] %vm4568_vm10, %v3354_v17 }
 0xcf1   :  { %v3378_v12 = vpop.permute.xlu2 %3377 }
 0xcf2   :  { %v3379_v49 = vrot.slane %v3378_v12, 1 }
 0xcf3   :  { %v3430_v59 = vpop.permute.xlu1 %3429 }
 0xcf4   :  { %v3380_v32 = vsel %vm469_vm6, %v3378_v12, %v3379_v49  ;;  %v3431_v53 = vrot.slane %v3430_v59, 1 }
 0xcf5   :  { %3383 = vst.msk [vmem:[#allocation14 + $0x12] ss:$8 sm:$0x3] %vm4568_vm10, %v3380_v32 }
 0xcf6   :  { %v3432_v42 = vsel %vm469_vm6, %v3430_v59, %v3431_v53 }
 0xcf7   :  { %3435 = vst.msk [vmem:[#allocation14 + $0x14] ss:$8 sm:$0x3] %vm4568_vm10, %v3432_v42  ;;  %v3238_v63 = vpop.permute.xlu0 %3237 }
 0xcf8   :  { %v3239_v11 = vrot.slane %v3238_v63, 1 }
 0xcf9   :  { %v3456_v50 = vpop.permute.xlu2 %3455 }
 0xcfa   :  { %v3240_v54 = vsel %vm469_vm6, %v3238_v63, %v3239_v11  ;;  %v3457_v20 = vrot.slane %v3456_v50, 1 }
 0xcfb   :  { %3243 = vst.msk [vmem:[#allocation14 + $0x5] ss:$8 sm:$0x3] %vm4568_vm10, %v3240_v54 }
 0xcfc   :  { %v3458_v15 = vsel %vm469_vm6, %v3456_v50, %v3457_v20 }
 0xcfd   :  { %3461 = vst.msk [vmem:[#allocation14 + $0x15] ss:$8 sm:$0x3] %vm4568_vm10, %v3458_v15 }
 0xcff   :  { %v3326_v4 = vpop.permute.xlu0 %3325 }
 0xd00   :  { %v3327_v22 = vrot.slane %v3326_v4, 1 }
 0xd02   :  { %v3328_v1 = vsel %vm469_vm6, %v3326_v4, %v3327_v22 }
 0xd03   :  { %3331 = vst.msk [vmem:[#allocation14 + $0x10] ss:$8 sm:$0x3] %vm4568_vm10, %v3328_v1 }
 0xd07   :  { %v3404_v48 = vpop.permute.xlu0 %3403 }
 0xd08   :  { %v3405_v36 = vrot.slane %v3404_v48, 1 }
 0xd0a   :  { %v3406_v52 = vsel %vm469_vm6, %v3404_v48, %v3405_v36 }
 0xd0b   :  { %3409 = vst.msk [vmem:[#allocation14 + $0x13] ss:$8 sm:$0x3] %vm4568_vm10, %v3406_v52 }
 0xd0f   :  { %v3482_v39 = vpop.permute.xlu0 %3481 }
 0xd10   :  { %v3483_v25 = vrot.slane %v3482_v39, 1 }
 0xd12   :  { %v3484_v60 = vsel %vm469_vm6, %v3482_v39, %v3483_v25 }
 0xd13   :  { %v3508_v58 = vpop.permute.xlu1 %3507  ;;  %3487 = vst.msk [vmem:[#allocation14 + $0x16] ss:$8 sm:$0x3] %vm4568_vm10, %v3484_v60 }
 0xd14   :  { %v3509_v56 = vrot.slane %v3508_v58, 1 }
 0xd16   :  { %v3510_v37 = vsel %vm469_vm6, %v3508_v58, %v3509_v56 }
 0xd17   :  { %3513 = vst.msk [vmem:[#allocation14 + $0x17] ss:$8 sm:$0x3] %vm4568_vm10, %v3510_v37 }
 0xd18   :  { %3527 = dma.vmem_to_hbm [thread:$0]  %s3520_s30, 512, %s3522_s28, [#allocation4], %s3814_s12, %s3814_s12, %s3805_s27  }
 0xd19   :  { %3790 = dma.done.wait [#allocation4], 512  }
 0xd1a   :  { %3791 = vsyncadd [#allocation4], 4294966784 }
 0xd1b   :  { %3532 = vsyncpa [#allocation4], 1 }
 0xd1c   :  { %3533 = vsyncpa [#allocation5], 1 }
 0xd1d   :  { %3534 = vsyncpa [#allocation7], 1 }
 0xd1e   :  { %3535 = vsyncpa [#allocation10], 1 }
 0xd1f   :  { %3536 = vsyncpa [#allocation13], 1 }

</bundles_post_ra>
